<compile_context>
chip_gen: v6e
topology: v6e:2x2x1
jax: 0.10.0
libtpu: 0.0.40
codegen_flags: <defaults>
</compile_context>

<pallas_src>
import jax
import jax.numpy as jnp
from jax.experimental import pallas as pl
from jax.experimental.pallas import tpu as pltpu

N_LABELS = 12
N_MAPS = 128
N_LAYERS = 9
EPS = 1e-5


# ----------------------------------------------------------------------------
# Fused kernel: one grid step == one conv layer (0 .. N_LAYERS); head on last step
# ----------------------------------------------------------------------------
def _fused_resnet_kernel(x_ref, w_ref, wout_ref, bout_ref, out_ref, act_ref, old_ref):
    """
    x_ref:    (N, H+2, W+2, C) f32   network input, zero-padded (spatial halo + channel)
    w_ref:    (1, 9*C, C)      bf16  conv weights of the current layer (streamed per step)
    wout_ref: (C, 128)         f32   head Linear weight, lane-padded 12 -> 128
    bout_ref: (1, 128)         f32   head Linear bias,   lane-padded 12 -> 128
    out_ref:  (N, 128)         f32   logits (first N_LABELS columns valid)
    act_ref:  (N, H+2, W+2, C) f32   scratch: current activation, spatially padded
    old_ref:  (N*H*W, C)       f32   scratch: residual branch ("old_x")
    """
    l = pl.program_id(0)
    n_b, hp, wp, c = act_ref.shape
    h, w = hp - 2, wp - 2
    m = n_b * h * w

    # -- step 0: bring the pre-padded input into the resident activation buffer.
    @pl.when(l == 0)
    def _():
        act_ref[...] = x_ref[...]
        old_ref[...] = jnp.zeros_like(old_ref)  # safe value before first real use

    # -- conv3x3 + ReLU: in-VMEM im2col (9 shifted taps of the padded activation,
    #    concatenated on the contraction dim) -> one long-K bf16 MXU matmul.
    taps = [
        act_ref[:, dh:dh + h, dw:dw + w, :].reshape(m, c).astype(jnp.bfloat16)
        for dh in range(3)
        for dw in range(3)
    ]
    im2col = jnp.concatenate(taps, axis=-1)                       # (M, 9*C) bf16
    y = jnp.dot(im2col, w_ref[0], preferred_element_type=jnp.float32)
    y = jnp.maximum(y, 0.0)                                       # (M, C) f32

    # -- residual add on even layers (> 0).
    is_even = jnp.logical_and(l > 0, l % 2 == 0)
    s = y + jnp.where(is_even, old_ref[...], 0.0)                 # s == y when not even

    @pl.when(is_even)
    def _():
        old_ref[...] = s                                          # old_x = y + old_x

    @pl.when(l == 0)
    def _():
        old_ref[...] = y                                          # old_x = relu(conv0(x))
        act_ref[:, 1:1 + h, 1:1 + w, :] = y.reshape(n_b, h, w, c)  # x = y (no BN at i=0)

    @pl.when(l > 0)
    def _():
        # BatchNorm2d(affine=False), training mode: batch statistics, f32 math.
        mean = jnp.sum(s, axis=0, keepdims=True) * (1.0 / m)
        d = s - mean
        var = jnp.sum(d * d, axis=0, keepdims=True) * (1.0 / m)
        xb = d * jax.lax.rsqrt(var + EPS)
        act_ref[:, 1:1 + h, 1:1 + w, :] = xb.reshape(n_b, h, w, c)

    # -- last step: head = global spatial mean + Linear (lane-dense 128-wide output).
    @pl.when(l == pl.num_programs(0) - 1)
    def _():
        xf = act_ref[:, 1:1 + h, 1:1 + w, :].reshape(n_b, h * w, c)
        gap = jnp.sum(xf, axis=1) * (1.0 / (h * w))               # (N, C)
        out_ref[...] = (
            jnp.dot(gap, wout_ref[...], preferred_element_type=jnp.float32)
            + bout_ref[...]
        )


# ----------------------------------------------------------------------------
# Wrapper: parameter packing + single fused pallas_call
# ----------------------------------------------------------------------------
def res_model_forward(x_nchw, w0, ws, w_out, b_out):
    """ResModel.forward.  x_nchw: (N, 1, H, W) f32 -> (N, 12) f32 logits."""
    n, _, h, w = x_nchw.shape
    c = N_MAPS
    hp, wp = h + 2, w + 2

    # NCHW -> NHWC; pad channels 1 -> C (zeros) and a 1-pixel spatial halo (SAME conv).
    x = jnp.transpose(x_nchw, (0, 2, 3, 1)).astype(jnp.float32)
    x = jnp.pad(x, ((0, 0), (1, 1), (1, 1), (0, c - x.shape[-1])))

    # Stack all conv weights; layer-0 Cin zero-padded 1 -> C so every layer is the same
    # (9*C, C) matmul.  bf16 for MXU-native throughput (f32 accumulation in-kernel).
    w0p = jnp.pad(w0, ((0, 0), (0, 0), (0, c - w0.shape[2]), (0, 0)))
    w_all = jnp.stack([w0p] + list(ws), axis=0)                   # (L+1, 3, 3, C, C)
    w_all = w_all.reshape(N_LAYERS + 1, 9 * c, c).astype(jnp.bfloat16)

    # Lane-dense head params (pad 12 output columns to 128; slice after the kernel).
    wout_p = jnp.pad(w_out, ((0, 0), (0, 128 - w_out.shape[1])))
    bout_p = jnp.pad(b_out, ((0, 0), (0, 128 - b_out.shape[1])))

    out = pl.pallas_call(
        _fused_resnet_kernel,
        out_shape=jax.ShapeDtypeStruct((n, 128), jnp.float32),
        grid=(N_LAYERS + 1,),
        in_specs=[
            pl.BlockSpec((n, hp, wp, c), lambda l: (0, 0, 0, 0)),  # input: fetched once
            pl.BlockSpec((1, 9 * c, c), lambda l: (l, 0, 0)),      # weights: streamed
            pl.BlockSpec((c, 128), lambda l: (0, 0)),              # head weight
            pl.BlockSpec((1, 128), lambda l: (0, 0)),              # head bias
        ],
        out_specs=pl.BlockSpec((n, 128), lambda l: (0, 0)),        # written on last step
        scratch_shapes=[
            pltpu.VMEM((n, hp, wp, c), jnp.float32),               # padded activation
            pltpu.VMEM((n * h * w, c), jnp.float32),               # residual (old_x)
        ],
        compiler_params=pltpu.CompilerParams(
            # Layers are strictly sequential (residual + batch-stat BN) -> arbitrary.
            dimension_semantics=("arbitrary",),
        ),
    )(x, w_all, wout_p, bout_p)
    return out[:, :N_LABELS]


res_model_forward = jax.jit(res_model_forward)


# ----------------------------------------------------------------------------
# Pure-JAX reference (same params).  matmul_dtype=bfloat16 matches the kernel's
# MXU precision; float32 gives the exact original model for a drift bound.
# ----------------------------------------------------------------------------
def ref_forward(x_nchw, w0, ws, w_out, b_out, matmul_dtype=jnp.float32):
    x = jnp.transpose(x_nchw, (0, 2, 3, 1)).astype(jnp.float32)

    def conv(a, wt):
        return jax.lax.conv_general_dilated(
            a.astype(matmul_dtype), wt.astype(matmul_dtype), (1, 1), "SAME",
            dimension_numbers=("NHWC", "HWIO", "NHWC"),
            preferred_element_type=jnp.float32,
            precision=jax.lax.Precision.HIGHEST,
        )

    def bn(a):
        mean = a.mean(axis=(0, 1, 2), keepdims=True)
        var = ((a - mean) ** 2).mean(axis=(0, 1, 2), keepdims=True)
        return (a - mean) * jax.lax.rsqrt(var + EPS)

    y = jax.nn.relu(conv(x, w0))
    old_x = y
    x = y
    for i in range(1, N_LAYERS + 1):
        y = jax.nn.relu(conv(x, ws[i - 1]))
        if i % 2 == 0:
            s = y + old_x
            old_x = s
            x = bn(s)
        else:
            x = bn(y)
    m = x.mean(axis=(1, 2))                                       # (N, C)
    return m @ w_out + b_out                                      # (N, 12)


# ----------------------------------------------------------------------------
if __name__ == "__main__":
    key = jax.random.PRNGKey(0)
    keys = jax.random.split(key, 13)

    # deterministic parameter init (shapes from ResModel.__init__)
    w0 = jax.random.normal(keys[0], (3, 3, 1, N_MAPS), jnp.float32) * (2.0 / 9.0) ** 0.5
    ws = tuple(
        jax.random.normal(keys[1 + i], (3, 3, N_MAPS, N_MAPS), jnp.float32)
        * (2.0 / (9.0 * N_MAPS)) ** 0.5
        for i in range(N_LAYERS)
    )
    w_out = jax.random.normal(keys[10], (N_MAPS, N_LABELS), jnp.float32) * (1.0 / N_MAPS) ** 0.5
    b_out = jax.random.normal(keys[11], (1, N_LABELS), jnp.float32) * 0.01

    # small input consistent with Conv2d(1, ...): NCHW, batch=2, 1 channel, 16x16
    x = jax.random.normal(keys[12], (2, 1, 16, 16), jnp.float32)

    out = jax.block_until_ready(res_model_forward(x, w0, ws, w_out, b_out))

    assert out.shape == (2, N_LABELS), out.shape
    assert bool(jnp.all(jnp.isfinite(out)))

    # Structural check: reference using the same bf16-matmul / f32-accumulate precision.
    ref_bf16 = jax.block_until_ready(
        ref_forward(x, w0, ws, w_out, b_out, matmul_dtype=jnp.bfloat16))
    assert bool(jnp.allclose(out, ref_bf16, rtol=5e-3, atol=5e-3)), (
        float(jnp.max(jnp.abs(out - ref_bf16))))

    # Precision bound vs. the exact f32 model (bf16 MXU drift stays small under BN).
    ref_f32 = jax.block_until_ready(
        ref_forward(x, w0, ws, w_out, b_out, matmul_dtype=jnp.float32))
    assert bool(jnp.allclose(out, ref_f32, rtol=5e-2, atol=5e-2)), (
        float(jnp.max(jnp.abs(out - ref_f32))))

    print("KERNEL_OK")
</pallas_src>

<mosaic_0001>
module attributes {stable_mosaic.version = 11 : i64} {
  func.func @_fused_resnet_kernel(%arg0: i32, %arg1: memref<2x18x18x128xf32, #tpu.memory_space<vmem>>, %arg2: memref<1x1152x128xbf16, #tpu.memory_space<vmem>>, %arg3: memref<128x128xf32, #tpu.memory_space<vmem>>, %arg4: memref<1x128xf32, #tpu.memory_space<vmem>>, %arg5: memref<2x128xf32, #tpu.memory_space<vmem>>, %arg6: memref<2x18x18x128xf32, #tpu.memory_space<vmem>>, %arg7: memref<512x128xf32, #tpu.memory_space<vmem>>) attributes {dimension_semantics = [#tpu.dimension_semantics<arbitrary>], iteration_bounds = array<i64: 10>, scalar_prefetch = 0 : i64, scratch_operands = 2 : i64, tpu.core_type = #tpu.core_type<tc>, window_params = [{pipeline_mode = #tpu.pipeline_mode<synchronous>, transform_indices = @transform_0, window_bounds = array<i64: 2, 18, 18, 128>}, {transform_indices = @transform_1, window_bounds = array<i64: 1, 1152, 128>}, {pipeline_mode = #tpu.pipeline_mode<synchronous>, transform_indices = @transform_2, window_bounds = array<i64: 128, 128>}, {pipeline_mode = #tpu.pipeline_mode<synchronous>, transform_indices = @transform_3, window_bounds = array<i64: 1, 128>}, {pipeline_mode = #tpu.pipeline_mode<synchronous>, transform_indices = @transform_4, window_bounds = array<i64: 2, 128>}]} {
    %c0_i32 = arith.constant 0 : i32
    %0 = arith.cmpi eq, %arg0, %c0_i32 : i32
    %1 = arith.extui %0 : i1 to i32
    %c0_i32_0 = arith.constant 0 : i32
    %2 = arith.cmpi ne, %1, %c0_i32_0 : i32
    scf.if %2 {
      %c0_53 = arith.constant 0 : index
      %c0_54 = arith.constant 0 : index
      %c0_55 = arith.constant 0 : index
      %c0_56 = arith.constant 0 : index
      %64 = vector.load %arg1[%c0_53, %c0_54, %c0_55, %c0_56] : memref<2x18x18x128xf32, #tpu.memory_space<vmem>>, vector<2x18x18x128xf32>
      %c0_57 = arith.constant 0 : index
      %c0_58 = arith.constant 0 : index
      %c0_59 = arith.constant 0 : index
      %c0_60 = arith.constant 0 : index
      %65 = vector.load %arg6[%c0_57, %c0_58, %c0_59, %c0_60] : memref<2x18x18x128xf32, #tpu.memory_space<vmem>>, vector<2x18x18x128xf32>
      tpu.vector_store %arg6[%c0_57, %c0_58, %c0_59, %c0_60], %64 {strides = array<i32>} : memref<2x18x18x128xf32, #tpu.memory_space<vmem>>, vector<2x18x18x128xf32>,
      %cst_61 = arith.constant 0.000000e+00 : f32
      %66 = vector.broadcast %cst_61 : f32 to vector<512x128xf32>
      %c0_62 = arith.constant 0 : index
      %c0_63 = arith.constant 0 : index
      %67 = vector.load %arg7[%c0_62, %c0_63] : memref<512x128xf32, #tpu.memory_space<vmem>>, vector<512x128xf32>
      tpu.vector_store %arg7[%c0_62, %c0_63], %66 {strides = array<i32>} : memref<512x128xf32, #tpu.memory_space<vmem>>, vector<512x128xf32>,
    } else {
    }
    %c0 = arith.constant 0 : index
    %c0_1 = arith.constant 0 : index
    %c0_2 = arith.constant 0 : index
    %c0_3 = arith.constant 0 : index
    %3 = vector.load %arg6[%c0, %c0_1, %c0_2, %c0_3] : memref<2x18x18x128xf32, #tpu.memory_space<vmem>>, vector<2x16x16x128xf32>
    %4 = vector.shape_cast %3 : vector<2x16x16x128xf32> to vector<512x128xf32>
    %5 = arith.truncf %4 : vector<512x128xf32> to vector<512x128xbf16>
    %c0_4 = arith.constant 0 : index
    %c0_5 = arith.constant 0 : index
    %c1 = arith.constant 1 : index
    %c0_6 = arith.constant 0 : index
    %6 = vector.load %arg6[%c0_4, %c0_5, %c1, %c0_6] : memref<2x18x18x128xf32, #tpu.memory_space<vmem>>, vector<2x16x16x128xf32>
    %7 = vector.shape_cast %6 : vector<2x16x16x128xf32> to vector<512x128xf32>
    %8 = arith.truncf %7 : vector<512x128xf32> to vector<512x128xbf16>
    %c0_7 = arith.constant 0 : index
    %c0_8 = arith.constant 0 : index
    %c2 = arith.constant 2 : index
    %c0_9 = arith.constant 0 : index
    %9 = vector.load %arg6[%c0_7, %c0_8, %c2, %c0_9] : memref<2x18x18x128xf32, #tpu.memory_space<vmem>>, vector<2x16x16x128xf32>
    %10 = vector.shape_cast %9 : vector<2x16x16x128xf32> to vector<512x128xf32>
    %11 = arith.truncf %10 : vector<512x128xf32> to vector<512x128xbf16>
    %c0_10 = arith.constant 0 : index
    %c1_11 = arith.constant 1 : index
    %c0_12 = arith.constant 0 : index
    %c0_13 = arith.constant 0 : index
    %12 = vector.load %arg6[%c0_10, %c1_11, %c0_12, %c0_13] : memref<2x18x18x128xf32, #tpu.memory_space<vmem>>, vector<2x16x16x128xf32>
    %13 = vector.shape_cast %12 : vector<2x16x16x128xf32> to vector<512x128xf32>
    %14 = arith.truncf %13 : vector<512x128xf32> to vector<512x128xbf16>
    %c0_14 = arith.constant 0 : index
    %c1_15 = arith.constant 1 : index
    %c1_16 = arith.constant 1 : index
    %c0_17 = arith.constant 0 : index
    %15 = vector.load %arg6[%c0_14, %c1_15, %c1_16, %c0_17] : memref<2x18x18x128xf32, #tpu.memory_space<vmem>>, vector<2x16x16x128xf32>
    %16 = vector.shape_cast %15 : vector<2x16x16x128xf32> to vector<512x128xf32>
    %17 = arith.truncf %16 : vector<512x128xf32> to vector<512x128xbf16>
    %c0_18 = arith.constant 0 : index
    %c1_19 = arith.constant 1 : index
    %c2_20 = arith.constant 2 : index
    %c0_21 = arith.constant 0 : index
    %18 = vector.load %arg6[%c0_18, %c1_19, %c2_20, %c0_21] : memref<2x18x18x128xf32, #tpu.memory_space<vmem>>, vector<2x16x16x128xf32>
    %19 = vector.shape_cast %18 : vector<2x16x16x128xf32> to vector<512x128xf32>
    %20 = arith.truncf %19 : vector<512x128xf32> to vector<512x128xbf16>
    %c0_22 = arith.constant 0 : index
    %c2_23 = arith.constant 2 : index
    %c0_24 = arith.constant 0 : index
    %c0_25 = arith.constant 0 : index
    %21 = vector.load %arg6[%c0_22, %c2_23, %c0_24, %c0_25] : memref<2x18x18x128xf32, #tpu.memory_space<vmem>>, vector<2x16x16x128xf32>
    %22 = vector.shape_cast %21 : vector<2x16x16x128xf32> to vector<512x128xf32>
    %23 = arith.truncf %22 : vector<512x128xf32> to vector<512x128xbf16>
    %c0_26 = arith.constant 0 : index
    %c2_27 = arith.constant 2 : index
    %c1_28 = arith.constant 1 : index
    %c0_29 = arith.constant 0 : index
    %24 = vector.load %arg6[%c0_26, %c2_27, %c1_28, %c0_29] : memref<2x18x18x128xf32, #tpu.memory_space<vmem>>, vector<2x16x16x128xf32>
    %25 = vector.shape_cast %24 : vector<2x16x16x128xf32> to vector<512x128xf32>
    %26 = arith.truncf %25 : vector<512x128xf32> to vector<512x128xbf16>
    %c0_30 = arith.constant 0 : index
    %c2_31 = arith.constant 2 : index
    %c2_32 = arith.constant 2 : index
    %c0_33 = arith.constant 0 : index
    %27 = vector.load %arg6[%c0_30, %c2_31, %c2_32, %c0_33] : memref<2x18x18x128xf32, #tpu.memory_space<vmem>>, vector<2x16x16x128xf32>
    %28 = vector.shape_cast %27 : vector<2x16x16x128xf32> to vector<512x128xf32>
    %29 = arith.truncf %28 : vector<512x128xf32> to vector<512x128xbf16>
    %30 = tpu.concatenate %5, %8, %11, %14, %17, %20, %23, %26, %29 in 1 : vector<512x128xbf16>, vector<512x128xbf16>, vector<512x128xbf16>, vector<512x128xbf16>, vector<512x128xbf16>, vector<512x128xbf16>, vector<512x128xbf16>, vector<512x128xbf16>, vector<512x128xbf16> -> vector<512x1152xbf16>
    %c0_34 = arith.constant 0 : index
    %c0_35 = arith.constant 0 : index
    %c0_36 = arith.constant 0 : index
    %31 = vector.load %arg2[%c0_34, %c0_35, %c0_36] : memref<1x1152x128xbf16, #tpu.memory_space<vmem>>, vector<1x1152x128xbf16>
    %32 = vector.shape_cast %31 : vector<1x1152x128xbf16> to vector<1152x128xbf16>
    %cst = arith.constant dense<0.000000e+00> : vector<512x128xf32>
    %33 = tpu.matmul %30, %32, %cst {dimension_numbers = #tpu.dot_dimension_numbers<[1], [0], [0], [1], [0, 0, 1, 1], [], []>} : vector<512x1152xbf16>, vector<1152x128xbf16>, vector<512x128xf32> -> vector<512x128xf32>
    %cst_37 = arith.constant 0.000000e+00 : f32
    %34 = vector.broadcast %cst_37 : f32 to vector<512x128xf32>
    %35 = arith.maximumf %33, %34 : vector<512x128xf32>
    %c0_i32_38 = arith.constant 0 : i32
    %36 = arith.cmpi sgt, %arg0, %c0_i32_38 : i32
    %c2_i32 = arith.constant 2 : i32
    %c0_i32_39 = arith.constant 0 : i32
    %37 = arith.cmpi eq, %c2_i32, %c0_i32_39 : i32
    %c1_i32 = arith.constant 1 : i32
    %38 = arith.select %37, %c1_i32, %c2_i32 : i32
    %39 = arith.remsi %arg0, %38 : i32
    %c0_i32_40 = arith.constant 0 : i32
    %40 = arith.cmpi ne, %39, %c0_i32_40 : i32
    %c0_i32_41 = arith.constant 0 : i32
    %41 = arith.cmpi slt, %39, %c0_i32_41 : i32
    %c0_i32_42 = arith.constant 0 : i32
    %42 = arith.cmpi slt, %38, %c0_i32_42 : i32
    %43 = arith.xori %41, %42 : i1
    %44 = arith.andi %43, %40 : i1
    %45 = arith.addi %39, %38 : i32
    %46 = arith.select %44, %45, %39 : i32
    %c0_i32_43 = arith.constant 0 : i32
    %47 = arith.cmpi eq, %46, %c0_i32_43 : i32
    %48 = arith.andi %36, %47 : i1
    %c0_44 = arith.constant 0 : index
    %c0_45 = arith.constant 0 : index
    %49 = vector.load %arg7[%c0_44, %c0_45] : memref<512x128xf32, #tpu.memory_space<vmem>>, vector<512x128xf32>
    %cst_46 = arith.constant 0.000000e+00 : f32
    %50 = vector.broadcast %cst_46 : f32 to vector<512x128xf32>
    %51 = arith.select %48, %49, %50 : vector<512x128xf32>
    %52 = arith.addf %35, %51 : vector<512x128xf32>
    %53 = arith.extui %48 : i1 to i32
    %c0_i32_47 = arith.constant 0 : i32
    %54 = arith.cmpi ne, %53, %c0_i32_47 : i32
    scf.if %54 {
      %c0_53 = arith.constant 0 : index
      %c0_54 = arith.constant 0 : index
      %64 = vector.load %arg7[%c0_53, %c0_54] : memref<512x128xf32, #tpu.memory_space<vmem>>, vector<512x128xf32>
      tpu.vector_store %arg7[%c0_53, %c0_54], %52 {strides = array<i32>} : memref<512x128xf32, #tpu.memory_space<vmem>>, vector<512x128xf32>,
    } else {
    }
    %c0_i32_48 = arith.constant 0 : i32
    %55 = arith.cmpi eq, %arg0, %c0_i32_48 : i32
    %56 = arith.extui %55 : i1 to i32
    %c0_i32_49 = arith.constant 0 : i32
    %57 = arith.cmpi ne, %56, %c0_i32_49 : i32
    scf.if %57 {
      %c0_53 = arith.constant 0 : index
      %c0_54 = arith.constant 0 : index
      %64 = vector.load %arg7[%c0_53, %c0_54] : memref<512x128xf32, #tpu.memory_space<vmem>>, vector<512x128xf32>
      tpu.vector_store %arg7[%c0_53, %c0_54], %35 {strides = array<i32>} : memref<512x128xf32, #tpu.memory_space<vmem>>, vector<512x128xf32>,
      %65 = vector.shape_cast %35 : vector<512x128xf32> to vector<2x16x16x128xf32>
      %c0_55 = arith.constant 0 : index
      %c1_56 = arith.constant 1 : index
      %c1_57 = arith.constant 1 : index
      %c0_58 = arith.constant 0 : index
      %66 = vector.load %arg6[%c0_55, %c1_56, %c1_57, %c0_58] : memref<2x18x18x128xf32, #tpu.memory_space<vmem>>, vector<2x16x16x128xf32>
      tpu.vector_store %arg6[%c0_55, %c1_56, %c1_57, %c0_58], %65 {strides = array<i32>} : memref<2x18x18x128xf32, #tpu.memory_space<vmem>>, vector<2x16x16x128xf32>,
    } else {
    }
    %c0_i32_50 = arith.constant 0 : i32
    %58 = arith.cmpi sgt, %arg0, %c0_i32_50 : i32
    %59 = arith.extui %58 : i1 to i32
    %c0_i32_51 = arith.constant 0 : i32
    %60 = arith.cmpi ne, %59, %c0_i32_51 : i32
    scf.if %60 {
      %cst_53 = arith.constant dense<0.000000e+00> : vector<128xf32>
      %64 = vector.multi_reduction <add>, %52, %cst_53 [0] : vector<512x128xf32> to vector<128xf32>
      %65 = vector.shape_cast %64 : vector<128xf32> to vector<1x128xf32>
      %cst_54 = arith.constant 0.001953125 : f32
      %66 = vector.broadcast %cst_54 : f32 to vector<1x128xf32>
      %67 = arith.mulf %65, %66 : vector<1x128xf32>
      %68 = vector.broadcast %67 : vector<1x128xf32> to vector<512x128xf32>
      %69 = arith.subf %52, %68 : vector<512x128xf32>
      %70 = arith.mulf %69, %69 : vector<512x128xf32>
      %cst_55 = arith.constant dense<0.000000e+00> : vector<128xf32>
      %71 = vector.multi_reduction <add>, %70, %cst_55 [0] : vector<512x128xf32> to vector<128xf32>
      %72 = vector.shape_cast %71 : vector<128xf32> to vector<1x128xf32>
      %cst_56 = arith.constant 0.001953125 : f32
      %73 = vector.broadcast %cst_56 : f32 to vector<1x128xf32>
      %74 = arith.mulf %72, %73 : vector<1x128xf32>
      %cst_57 = arith.constant 9.99999974E-6 : f32
      %75 = vector.broadcast %cst_57 : f32 to vector<1x128xf32>
      %76 = arith.addf %74, %75 : vector<1x128xf32>
      %77 = math.rsqrt %76 : vector<1x128xf32>
      %78 = vector.broadcast %77 : vector<1x128xf32> to vector<512x128xf32>
      %79 = arith.mulf %69, %78 : vector<512x128xf32>
      %80 = vector.shape_cast %79 : vector<512x128xf32> to vector<2x16x16x128xf32>
      %c0_58 = arith.constant 0 : index
      %c1_59 = arith.constant 1 : index
      %c1_60 = arith.constant 1 : index
      %c0_61 = arith.constant 0 : index
      %81 = vector.load %arg6[%c0_58, %c1_59, %c1_60, %c0_61] : memref<2x18x18x128xf32, #tpu.memory_space<vmem>>, vector<2x16x16x128xf32>
      tpu.vector_store %arg6[%c0_58, %c1_59, %c1_60, %c0_61], %80 {strides = array<i32>} : memref<2x18x18x128xf32, #tpu.memory_space<vmem>>, vector<2x16x16x128xf32>,
    } else {
    }
    %c9_i32 = arith.constant 9 : i32
    %61 = arith.cmpi eq, %arg0, %c9_i32 : i32
    %62 = arith.extui %61 : i1 to i32
    %c0_i32_52 = arith.constant 0 : i32
    %63 = arith.cmpi ne, %62, %c0_i32_52 : i32
    scf.if %63 {
      %c0_53 = arith.constant 0 : index
      %c1_54 = arith.constant 1 : index
      %c1_55 = arith.constant 1 : index
      %c0_56 = arith.constant 0 : index
      %64 = vector.load %arg6[%c0_53, %c1_54, %c1_55, %c0_56] : memref<2x18x18x128xf32, #tpu.memory_space<vmem>>, vector<2x16x16x128xf32>
      %65 = vector.shape_cast %64 : vector<2x16x16x128xf32> to vector<2x256x128xf32>
      %cst_57 = arith.constant dense<0.000000e+00> : vector<2x128xf32>
      %66 = vector.multi_reduction <add>, %65, %cst_57 [1] : vector<2x256x128xf32> to vector<2x128xf32>
      %cst_58 = arith.constant 3.906250e-03 : f32
      %67 = vector.broadcast %cst_58 : f32 to vector<2x128xf32>
      %68 = arith.mulf %66, %67 : vector<2x128xf32>
      %c0_59 = arith.constant 0 : index
      %c0_60 = arith.constant 0 : index
      %69 = vector.load %arg3[%c0_59, %c0_60] : memref<128x128xf32, #tpu.memory_space<vmem>>, vector<128x128xf32>
      %cst_61 = arith.constant dense<0.000000e+00> : vector<2x128xf32>
      %70 = tpu.matmul %68, %69, %cst_61 {dimension_numbers = #tpu.dot_dimension_numbers<[1], [0], [0], [1], [0, 0, 1, 1], [], []>} : vector<2x128xf32>, vector<128x128xf32>, vector<2x128xf32> -> vector<2x128xf32>
      %c0_62 = arith.constant 0 : index
      %c0_63 = arith.constant 0 : index
      %71 = vector.load %arg4[%c0_62, %c0_63] : memref<1x128xf32, #tpu.memory_space<vmem>>, vector<1x128xf32>
      %72 = vector.broadcast %71 : vector<1x128xf32> to vector<2x128xf32>
      %73 = arith.addf %70, %72 : vector<2x128xf32>
      %c0_64 = arith.constant 0 : index
      %c0_65 = arith.constant 0 : index
      %74 = vector.load %arg5[%c0_64, %c0_65] : memref<2x128xf32, #tpu.memory_space<vmem>>, vector<2x128xf32>
      tpu.vector_store %arg5[%c0_64, %c0_65], %73 {strides = array<i32>} : memref<2x128xf32, #tpu.memory_space<vmem>>, vector<2x128xf32>,
    } else {
    }
    return
  }
  func.func @transform_0(%arg0: i32) -> (i32, i32, i32, i32) {
    %c0_i32 = arith.constant 0 : i32
    %c0_i32_0 = arith.constant 0 : i32
    %c0_i32_1 = arith.constant 0 : i32
    %c0_i32_2 = arith.constant 0 : i32
    %c0_i32_3 = arith.constant 0 : i32
    return %c0_i32, %c0_i32_0, %c0_i32_1, %c0_i32_2 : i32, i32, i32, i32
  }
  func.func @transform_1(%arg0: i32) -> (i32, i32, i32) {
    %c0_i32 = arith.constant 0 : i32
    %c0_i32_0 = arith.constant 0 : i32
    %c0_i32_1 = arith.constant 0 : i32
    return %arg0, %c0_i32, %c0_i32_0 : i32, i32, i32
  }
  func.func @transform_2(%arg0: i32) -> (i32, i32) {
    %c0_i32 = arith.constant 0 : i32
    %c0_i32_0 = arith.constant 0 : i32
    %c0_i32_1 = arith.constant 0 : i32
    return %c0_i32, %c0_i32_0 : i32, i32
  }
  func.func @transform_3(%arg0: i32) -> (i32, i32) {
    %c0_i32 = arith.constant 0 : i32
    %c0_i32_0 = arith.constant 0 : i32
    %c0_i32_1 = arith.constant 0 : i32
    return %c0_i32, %c0_i32_0 : i32, i32
  }
  func.func @transform_4(%arg0: i32) -> (i32, i32) {
    %c0_i32 = arith.constant 0 : i32
    %c0_i32_0 = arith.constant 0 : i32
    %c0_i32_1 = arith.constant 0 : i32
    return %c0_i32, %c0_i32_0 : i32, i32
  }
}

</mosaic_0001>

<bundles_post_ra>
// kernel: res_model_forward.1
= control target key start
LH: loop header
LB: loop body
LE: loop exit
PB: predicated region body
PF: predicated region fallthrough
CT: control target
= control target key end

     0   :  { %9 = vsyncpa [#allocation5], 0  ;;  %s5164_s15 = smov 0   ;;  %s8067_s0 = inlined_call_operand.vmem [shape: f32[2,18,18,128], index: 0, kind: input, shape index: {}]   ;;  %s8068_s1 = inlined_call_operand.vmem [shape: bf16[10,1152,128], index: 1, kind: input, shape index: {}]   ;;  %s8069_s2 = inlined_call_operand.vmem [shape: f32[128,128], index: 2, kind: input, shape index: {}]   ;;  %s8070_s3 = inlined_call_operand.vmem [shape: f32[1,128], index: 3, kind: input, shape index: {}]   ;;  %s8071_s4 = inlined_call_operand.hbm [shape: f32[2,128], index: 4, kind: output, shape index: {}]  }
   0x1 LB: > { %s5170_s16 = sadd.s32 4294967295, %s5132_s15   ;;  %p4521_p0 = scmp.ge.s32.totalorder %s5132_s15, 1  ;;  %s5132_s15 = sphi %s5164_s15, %s15_s15  }
   0x2   : > { %p158_p1 = scmp.lt.s32.totalorder %s5132_s15, 11 }
   0x4   : > { %p159_p2 = pnand %p4521_p0, %p158_p1 }
   0x6   : > { %162 = sbr.rel (%p159_p2) target bundleno = 1691 (0x69b), region = 36 }
   0xb   : > { %p179_p3 = scmp.lt.s32.totalorder %s5170_s16, 9  ;;  %p4523_p4 = scmp.ne.s32.totalorder %s5170_s16, 0 }
   0xd   : > { %s180_s17 = scalar_select %p179_p3, %s5170_s16, 9 }
   0xe   : > { %188 = sbr.rel (%p4523_p4) target bundleno = 106 (0x6a), region = 40 }
   0xf   : > { %s4812_s18 = smul.u32 576, %s180_s17 }
  0x11   : > { %s5179_s21 = scalar_lea.vmem %s8068_s1, %s4812_s18 }
  0x13   : > { %v189_v0 = vld [vmem:[%s8067_s0] sm:$0xff]  ;;  %v190_v1 = vld [vmem:[%s8067_s0 + $0x8] sm:$0xff]  ;;  %v191_v2 = vld [vmem:[%s8067_s0 + $0x10] sm:$0x3]  ;;  %v5134_v6 = vmov 0.0  }
  0x14   : > { %297 = vst [vmem:[#allocation2] sm:$0xff] %v189_v0  ;;  %298 = vst [vmem:[#allocation2 + $0x8] sm:$0xff] %v190_v1  ;;  %v5196_v3 = vld [vmem:[%s8067_s0 + $0x18] sm:$0xff]  ;;  %v5201_v4 = vld [vmem:[%s8067_s0 + $0x20] sm:$0xff] }
  0x15   : > { %299 = vst [vmem:[#allocation2 + $0x10] sm:$0x3] %v191_v2  ;;  %v5206_v5 = vld [vmem:[%s8067_s0 + $0x28] sm:$0x3]  ;;  %405 = vst [vmem:[#allocation3 + $0xb0] sm:$0xff] %v5134_v6  ;;  %v195_v7 = vld [vmem:[%s8067_s0 + $0x30] sm:$0xff] }
  0x16   : > { %406 = vst [vmem:[#allocation3 + $0x1b0] sm:$0xff] %v5134_v6  ;;  %407 = vst [vmem:[#allocation3 + $0xd8] sm:$0xff] %v5134_v6  ;;  %v196_v8 = vld [vmem:[%s8067_s0 + $0x38] sm:$0xff]  ;;  %v197_v9 = vld [vmem:[%s8067_s0 + $0x40] sm:$0x3] }
  0x17   : > { %408 = vst [vmem:[#allocation3 + $0x18] sm:$0xff] %v5134_v6  ;;  %409 = vst [vmem:[#allocation3 + $0x50] sm:$0xff] %v5134_v6  ;;  %v198_v10 = vld [vmem:[%s8067_s0 + $0x48] sm:$0xff]  ;;  %v199_v11 = vld [vmem:[%s8067_s0 + $0x50] sm:$0xff] }
  0x18   : > { %410 = vst [vmem:[#allocation3 + $0x168] sm:$0xff] %v5134_v6  ;;  %411 = vst [vmem:[#allocation3 + $0x130] sm:$0xff] %v5134_v6  ;;  %v200_v12 = vld [vmem:[%s8067_s0 + $0x58] sm:$0x3]  ;;  %v201_v13 = vld [vmem:[%s8067_s0 + $0x60] sm:$0xff] }
  0x19   : > { %412 = vst [vmem:[#allocation3 + $0x48] sm:$0xff] %v5134_v6  ;;  %413 = vst [vmem:[#allocation3 + $0x180] sm:$0xff] %v5134_v6  ;;  %v202_v14 = vld [vmem:[%s8067_s0 + $0x68] sm:$0xff]  ;;  %v203_v15 = vld [vmem:[%s8067_s0 + $0x70] sm:$0x3] }
  0x1a   : > { %414 = vst [vmem:[#allocation3 + $0x110] sm:$0xff] %v5134_v6  ;;  %415 = vst [vmem:[#allocation3 + $0x118] sm:$0xff] %v5134_v6  ;;  %v204_v16 = vld [vmem:[%s8067_s0 + $0x78] sm:$0xff]  ;;  %v205_v17 = vld [vmem:[%s8067_s0 + $0x80] sm:$0xff] }
  0x1b   : > { %416 = vst [vmem:[#allocation3 + $0x98] sm:$0xff] %v5134_v6  ;;  %417 = vst [vmem:[#allocation3 + $0x120] sm:$0xff] %v5134_v6  ;;  %v206_v18 = vld [vmem:[%s8067_s0 + $0x88] sm:$0x3]  ;;  %v207_v19 = vld [vmem:[%s8067_s0 + $0x90] sm:$0xff] }
  0x1c   : > { %418 = vst [vmem:[#allocation3 + $0x150] sm:$0xff] %v5134_v6  ;;  %419 = vst [vmem:[#allocation3 + $0x108] sm:$0xff] %v5134_v6  ;;  %v208_v20 = vld [vmem:[%s8067_s0 + $0x98] sm:$0xff]  ;;  %v209_v21 = vld [vmem:[%s8067_s0 + $0xa0] sm:$0x3] }
  0x1d   : > { %420 = vst [vmem:[#allocation3 + $0x60] sm:$0xff] %v5134_v6  ;;  %421 = vst [vmem:[#allocation3 + $0xe0] sm:$0xff] %v5134_v6  ;;  %v210_v22 = vld [vmem:[%s8067_s0 + $0xa8] sm:$0xff]  ;;  %v211_v23 = vld [vmem:[%s8067_s0 + $0xb0] sm:$0xff] }
  0x1e   : > { %422 = vst [vmem:[#allocation3 + $0x188] sm:$0xff] %v5134_v6  ;;  %423 = vst [vmem:[#allocation3 + $0x138] sm:$0xff] %v5134_v6  ;;  %v212_v24 = vld [vmem:[%s8067_s0 + $0xb8] sm:$0x3]  ;;  %v213_v25 = vld [vmem:[%s8067_s0 + $0xc0] sm:$0xff] }
  0x1f   : > { %424 = vst [vmem:[#allocation3 + $0x140] sm:$0xff] %v5134_v6  ;;  %425 = vst [vmem:[#allocation3 + $0x80] sm:$0xff] %v5134_v6  ;;  %v214_v26 = vld [vmem:[%s8067_s0 + $0xc8] sm:$0xff]  ;;  %v215_v27 = vld [vmem:[%s8067_s0 + $0xd0] sm:$0x3] }
  0x20   : > { %426 = vst [vmem:[#allocation3 + $0x1a8] sm:$0xff] %v5134_v6  ;;  %427 = vst [vmem:[#allocation3 + $0x1b8] sm:$0xff] %v5134_v6  ;;  %v216_v28 = vld [vmem:[%s8067_s0 + $0xd8] sm:$0xff]  ;;  %v217_v29 = vld [vmem:[%s8067_s0 + $0xe0] sm:$0xff] }
  0x21   : > { %428 = vst [vmem:[#allocation3 + $0x28] sm:$0xff] %v5134_v6  ;;  %429 = vst [vmem:[#allocation3 + $0x1e8] sm:$0xff] %v5134_v6  ;;  %v218_v30 = vld [vmem:[%s8067_s0 + $0xe8] sm:$0x3]  ;;  %v219_v31 = vld [vmem:[%s8067_s0 + $0xf0] sm:$0xff] }
  0x22   : > { %430 = vst [vmem:[#allocation3 + $0xf8] sm:$0xff] %v5134_v6  ;;  %431 = vst [vmem:[#allocation3 + $0x160] sm:$0xff] %v5134_v6  ;;  %v220_v32 = vld [vmem:[%s8067_s0 + $0xf8] sm:$0xff]  ;;  %v221_v33 = vld [vmem:[%s8067_s0 + $0x100] sm:$0x3] }
  0x23   : > { %432 = vst [vmem:[#allocation3 + $0x30] sm:$0xff] %v5134_v6  ;;  %433 = vst [vmem:[#allocation3 + $0x1e0] sm:$0xff] %v5134_v6  ;;  %v222_v34 = vld [vmem:[%s8067_s0 + $0x108] sm:$0xff]  ;;  %v223_v35 = vld [vmem:[%s8067_s0 + $0x110] sm:$0xff] }
  0x24   : > { %434 = vst [vmem:[#allocation3] sm:$0xff] %v5134_v6  ;;  %435 = vst [vmem:[#allocation3 + $0xf0] sm:$0xff] %v5134_v6  ;;  %v224_v36 = vld [vmem:[%s8067_s0 + $0x118] sm:$0x3]  ;;  %v225_v37 = vld [vmem:[%s8067_s0 + $0x120] sm:$0xff] }
  0x25   : > { %436 = vst [vmem:[#allocation3 + $0x8] sm:$0xff] %v5134_v6  ;;  %437 = vst [vmem:[#allocation3 + $0x148] sm:$0xff] %v5134_v6  ;;  %v226_v38 = vld [vmem:[%s8067_s0 + $0x128] sm:$0xff]  ;;  %v227_v39 = vld [vmem:[%s8067_s0 + $0x130] sm:$0x3] }
  0x26   : > { %438 = vst [vmem:[#allocation3 + $0x1d0] sm:$0xff] %v5134_v6  ;;  %439 = vst [vmem:[#allocation3 + $0x100] sm:$0xff] %v5134_v6  ;;  %v228_v40 = vld [vmem:[%s8067_s0 + $0x138] sm:$0xff]  ;;  %v229_v41 = vld [vmem:[%s8067_s0 + $0x140] sm:$0xff] }
  0x27   : > { %440 = vst [vmem:[#allocation3 + $0xc8] sm:$0xff] %v5134_v6  ;;  %441 = vst [vmem:[#allocation3 + $0x40] sm:$0xff] %v5134_v6  ;;  %v230_v42 = vld [vmem:[%s8067_s0 + $0x148] sm:$0x3]  ;;  %v231_v43 = vld [vmem:[%s8067_s0 + $0x150] sm:$0xff] }
  0x28   : > { %442 = vst [vmem:[#allocation3 + $0x1f8] sm:$0xff] %v5134_v6  ;;  %443 = vst [vmem:[#allocation3 + $0x20] sm:$0xff] %v5134_v6  ;;  %v232_v44 = vld [vmem:[%s8067_s0 + $0x158] sm:$0xff]  ;;  %v233_v45 = vld [vmem:[%s8067_s0 + $0x160] sm:$0x3] }
  0x29   : > { %444 = vst [vmem:[#allocation3 + $0x128] sm:$0xff] %v5134_v6  ;;  %445 = vst [vmem:[#allocation3 + $0x1a0] sm:$0xff] %v5134_v6  ;;  %v234_v46 = vld [vmem:[%s8067_s0 + $0x168] sm:$0xff]  ;;  %v235_v47 = vld [vmem:[%s8067_s0 + $0x170] sm:$0xff] }
  0x2a   : > { %446 = vst [vmem:[#allocation3 + $0x1f0] sm:$0xff] %v5134_v6  ;;  %447 = vst [vmem:[#allocation3 + $0xe8] sm:$0xff] %v5134_v6  ;;  %v236_v48 = vld [vmem:[%s8067_s0 + $0x178] sm:$0x3]  ;;  %v237_v49 = vld [vmem:[%s8067_s0 + $0x180] sm:$0xff] }
  0x2b   : > { %448 = vst [vmem:[#allocation3 + $0x78] sm:$0xff] %v5134_v6  ;;  %449 = vst [vmem:[#allocation3 + $0x70] sm:$0xff] %v5134_v6  ;;  %v238_v50 = vld [vmem:[%s8067_s0 + $0x188] sm:$0xff]  ;;  %v239_v51 = vld [vmem:[%s8067_s0 + $0x190] sm:$0x3] }
  0x2c   : > { %450 = vst [vmem:[#allocation3 + $0x90] sm:$0xff] %v5134_v6  ;;  %451 = vst [vmem:[#allocation3 + $0x1d8] sm:$0xff] %v5134_v6  ;;  %v240_v52 = vld [vmem:[%s8067_s0 + $0x198] sm:$0xff]  ;;  %v241_v53 = vld [vmem:[%s8067_s0 + $0x1a0] sm:$0xff] }
  0x2d   : > { %452 = vst [vmem:[#allocation3 + $0xd0] sm:$0xff] %v5134_v6  ;;  %453 = vst [vmem:[#allocation3 + $0xb8] sm:$0xff] %v5134_v6  ;;  %v242_v54 = vld [vmem:[%s8067_s0 + $0x1a8] sm:$0x3]  ;;  %v243_v55 = vld [vmem:[%s8067_s0 + $0x1b0] sm:$0xff] }
  0x2e   : > { %454 = vst [vmem:[#allocation3 + $0x88] sm:$0xff] %v5134_v6  ;;  %455 = vst [vmem:[#allocation3 + $0xa8] sm:$0xff] %v5134_v6  ;;  %v244_v56 = vld [vmem:[%s8067_s0 + $0x1b8] sm:$0xff]  ;;  %v245_v57 = vld [vmem:[%s8067_s0 + $0x1c0] sm:$0x3] }
  0x2f   : > { %456 = vst [vmem:[#allocation3 + $0x1c8] sm:$0xff] %v5134_v6  ;;  %457 = vst [vmem:[#allocation3 + $0x170] sm:$0xff] %v5134_v6  ;;  %v246_v58 = vld [vmem:[%s8067_s0 + $0x1c8] sm:$0xff]  ;;  %v247_v59 = vld [vmem:[%s8067_s0 + $0x1d0] sm:$0xff] }
  0x30   : > { %458 = vst [vmem:[#allocation3 + $0x178] sm:$0xff] %v5134_v6  ;;  %459 = vst [vmem:[#allocation3 + $0x68] sm:$0xff] %v5134_v6  ;;  %v248_v60 = vld [vmem:[%s8067_s0 + $0x1d8] sm:$0x3]  ;;  %v249_v61 = vld [vmem:[%s8067_s0 + $0x1e0] sm:$0xff] }
  0x31   : > { %460 = vst [vmem:[#allocation3 + $0x190] sm:$0xff] %v5134_v6  ;;  %461 = vst [vmem:[#allocation3 + $0x198] sm:$0xff] %v5134_v6  ;;  %v250_v62 = vld [vmem:[%s8067_s0 + $0x1e8] sm:$0xff]  ;;  %v251_v63 = vld [vmem:[%s8067_s0 + $0x1f0] sm:$0x3] }
  0x32   : > { %462 = vst [vmem:[#allocation3 + $0x38] sm:$0xff] %v5134_v6  ;;  %463 = vst [vmem:[#allocation3 + $0xc0] sm:$0xff] %v5134_v6  ;;  %v252_v0 = vld [vmem:[%s8067_s0 + $0x1f8] sm:$0xff]  ;;  %v253_v1 = vld [vmem:[%s8067_s0 + $0x200] sm:$0xff] }
  0x33   : > { %464 = vst [vmem:[#allocation3 + $0x1c0] sm:$0xff] %v5134_v6  ;;  %465 = vst [vmem:[#allocation3 + $0x158] sm:$0xff] %v5134_v6  ;;  %v254_v2 = vld [vmem:[%s8067_s0 + $0x208] sm:$0x3] }
  0x34   : > { %466 = vst [vmem:[#allocation3 + $0x10] sm:$0xff] %v5134_v6  ;;  %467 = vst [vmem:[#allocation3 + $0x58] sm:$0xff] %v5134_v6 }
  0x35   : > { %468 = vst [vmem:[#allocation3 + $0xa0] sm:$0xff] %v5134_v6  ;;  %300 = vst [vmem:[#allocation2 + $0x18] sm:$0xff] %v5196_v3  ;;  %v255_v3 = vld [vmem:[%s8067_s0 + $0x210] sm:$0xff]  ;;  %v258_v6 = vld [vmem:[%s8067_s0 + $0x228] sm:$0xff] }
  0x36   : > { %301 = vst [vmem:[#allocation2 + $0x20] sm:$0xff] %v5201_v4  ;;  %302 = vst [vmem:[#allocation2 + $0x28] sm:$0x3] %v5206_v5  ;;  %v256_v4 = vld [vmem:[%s8067_s0 + $0x218] sm:$0xff]  ;;  %v257_v5 = vld [vmem:[%s8067_s0 + $0x220] sm:$0x3] }
  0x37   : > { %303 = vst [vmem:[#allocation2 + $0x30] sm:$0xff] %v195_v7  ;;  %304 = vst [vmem:[#allocation2 + $0x38] sm:$0xff] %v196_v8  ;;  %v259_v7 = vld [vmem:[%s8067_s0 + $0x230] sm:$0xff]  ;;  %v260_v8 = vld [vmem:[%s8067_s0 + $0x238] sm:$0x3] }
  0x38   : > { %305 = vst [vmem:[#allocation2 + $0x40] sm:$0x3] %v197_v9  ;;  %306 = vst [vmem:[#allocation2 + $0x48] sm:$0xff] %v198_v10  ;;  %v261_v9 = vld [vmem:[%s8067_s0 + $0x240] sm:$0xff]  ;;  %v262_v10 = vld [vmem:[%s8067_s0 + $0x248] sm:$0xff] }
  0x39   : > { %307 = vst [vmem:[#allocation2 + $0x50] sm:$0xff] %v199_v11  ;;  %308 = vst [vmem:[#allocation2 + $0x58] sm:$0x3] %v200_v12  ;;  %v263_v11 = vld [vmem:[%s8067_s0 + $0x250] sm:$0x3]  ;;  %v264_v12 = vld [vmem:[%s8067_s0 + $0x258] sm:$0xff] }
  0x3a   : > { %309 = vst [vmem:[#allocation2 + $0x60] sm:$0xff] %v201_v13  ;;  %310 = vst [vmem:[#allocation2 + $0x68] sm:$0xff] %v202_v14  ;;  %v265_v13 = vld [vmem:[%s8067_s0 + $0x260] sm:$0xff]  ;;  %v266_v14 = vld [vmem:[%s8067_s0 + $0x268] sm:$0x3] }
  0x3b   : > { %311 = vst [vmem:[#allocation2 + $0x70] sm:$0x3] %v203_v15  ;;  %312 = vst [vmem:[#allocation2 + $0x78] sm:$0xff] %v204_v16  ;;  %v267_v15 = vld [vmem:[%s8067_s0 + $0x270] sm:$0xff]  ;;  %v268_v16 = vld [vmem:[%s8067_s0 + $0x278] sm:$0xff] }
  0x3c   : > { %313 = vst [vmem:[#allocation2 + $0x80] sm:$0xff] %v205_v17  ;;  %314 = vst [vmem:[#allocation2 + $0x88] sm:$0x3] %v206_v18  ;;  %v269_v17 = vld [vmem:[%s8067_s0 + $0x280] sm:$0x3]  ;;  %v270_v18 = vld [vmem:[%s8067_s0 + $0x288] sm:$0xff] }
  0x3d   : > { %315 = vst [vmem:[#allocation2 + $0x90] sm:$0xff] %v207_v19  ;;  %316 = vst [vmem:[#allocation2 + $0x98] sm:$0xff] %v208_v20  ;;  %v271_v19 = vld [vmem:[%s8067_s0 + $0x290] sm:$0xff]  ;;  %v272_v20 = vld [vmem:[%s8067_s0 + $0x298] sm:$0x3] }
  0x3e   : > { %317 = vst [vmem:[#allocation2 + $0xa0] sm:$0x3] %v209_v21  ;;  %318 = vst [vmem:[#allocation2 + $0xa8] sm:$0xff] %v210_v22  ;;  %v273_v21 = vld [vmem:[%s8067_s0 + $0x2a0] sm:$0xff]  ;;  %v274_v22 = vld [vmem:[%s8067_s0 + $0x2a8] sm:$0xff] }
  0x3f   : > { %319 = vst [vmem:[#allocation2 + $0xb0] sm:$0xff] %v211_v23  ;;  %320 = vst [vmem:[#allocation2 + $0xb8] sm:$0x3] %v212_v24  ;;  %v275_v23 = vld [vmem:[%s8067_s0 + $0x2b0] sm:$0x3]  ;;  %v276_v24 = vld [vmem:[%s8067_s0 + $0x2b8] sm:$0xff] }
  0x40   : > { %321 = vst [vmem:[#allocation2 + $0xc0] sm:$0xff] %v213_v25  ;;  %322 = vst [vmem:[#allocation2 + $0xc8] sm:$0xff] %v214_v26  ;;  %v277_v25 = vld [vmem:[%s8067_s0 + $0x2c0] sm:$0xff]  ;;  %v278_v26 = vld [vmem:[%s8067_s0 + $0x2c8] sm:$0x3] }
  0x41   : > { %323 = vst [vmem:[#allocation2 + $0xd0] sm:$0x3] %v215_v27  ;;  %324 = vst [vmem:[#allocation2 + $0xd8] sm:$0xff] %v216_v28  ;;  %v279_v27 = vld [vmem:[%s8067_s0 + $0x2d0] sm:$0xff]  ;;  %v280_v28 = vld [vmem:[%s8067_s0 + $0x2d8] sm:$0xff] }
  0x42   : > { %325 = vst [vmem:[#allocation2 + $0xe0] sm:$0xff] %v217_v29  ;;  %326 = vst [vmem:[#allocation2 + $0xe8] sm:$0x3] %v218_v30  ;;  %v281_v29 = vld [vmem:[%s8067_s0 + $0x2e0] sm:$0x3]  ;;  %v282_v30 = vld [vmem:[%s8067_s0 + $0x2e8] sm:$0xff] }
  0x43   : > { %327 = vst [vmem:[#allocation2 + $0xf0] sm:$0xff] %v219_v31  ;;  %328 = vst [vmem:[#allocation2 + $0xf8] sm:$0xff] %v220_v32  ;;  %v283_v31 = vld [vmem:[%s8067_s0 + $0x2f0] sm:$0xff]  ;;  %v284_v32 = vld [vmem:[%s8067_s0 + $0x2f8] sm:$0x3] }
  0x44   : > { %329 = vst [vmem:[#allocation2 + $0x100] sm:$0x3] %v221_v33  ;;  %330 = vst [vmem:[#allocation2 + $0x108] sm:$0xff] %v222_v34  ;;  %v285_v33 = vld [vmem:[%s8067_s0 + $0x300] sm:$0xff]  ;;  %v286_v34 = vld [vmem:[%s8067_s0 + $0x308] sm:$0xff] }
  0x45   : > { %331 = vst [vmem:[#allocation2 + $0x110] sm:$0xff] %v223_v35  ;;  %332 = vst [vmem:[#allocation2 + $0x118] sm:$0x3] %v224_v36  ;;  %v287_v35 = vld [vmem:[%s8067_s0 + $0x310] sm:$0x3]  ;;  %v288_v36 = vld [vmem:[%s8067_s0 + $0x318] sm:$0xff] }
  0x46   : > { %333 = vst [vmem:[#allocation2 + $0x120] sm:$0xff] %v225_v37  ;;  %334 = vst [vmem:[#allocation2 + $0x128] sm:$0xff] %v226_v38  ;;  %v289_v37 = vld [vmem:[%s8067_s0 + $0x320] sm:$0xff]  ;;  %v290_v38 = vld [vmem:[%s8067_s0 + $0x328] sm:$0x3] }
  0x47   : > { %335 = vst [vmem:[#allocation2 + $0x130] sm:$0x3] %v227_v39  ;;  %336 = vst [vmem:[#allocation2 + $0x138] sm:$0xff] %v228_v40  ;;  %v291_v39 = vld [vmem:[%s8067_s0 + $0x330] sm:$0xff]  ;;  %v292_v40 = vld [vmem:[%s8067_s0 + $0x338] sm:$0xff] }
  0x48   : > { %337 = vst [vmem:[#allocation2 + $0x140] sm:$0xff] %v229_v41  ;;  %338 = vst [vmem:[#allocation2 + $0x148] sm:$0x3] %v230_v42  ;;  %v293_v41 = vld [vmem:[%s8067_s0 + $0x340] sm:$0x3]  ;;  %v294_v42 = vld [vmem:[%s8067_s0 + $0x348] sm:$0xff] }
  0x49   : > { %339 = vst [vmem:[#allocation2 + $0x150] sm:$0xff] %v231_v43  ;;  %340 = vst [vmem:[#allocation2 + $0x158] sm:$0xff] %v232_v44  ;;  %v295_v43 = vld [vmem:[%s8067_s0 + $0x350] sm:$0xff]  ;;  %v296_v44 = vld [vmem:[%s8067_s0 + $0x358] sm:$0x3] }
  0x4a   : > { %341 = vst [vmem:[#allocation2 + $0x160] sm:$0x3] %v233_v45  ;;  %342 = vst [vmem:[#allocation2 + $0x168] sm:$0xff] %v234_v46 }
  0x4b   : > { %343 = vst [vmem:[#allocation2 + $0x170] sm:$0xff] %v235_v47  ;;  %344 = vst [vmem:[#allocation2 + $0x178] sm:$0x3] %v236_v48 }
  0x4c   : > { %345 = vst [vmem:[#allocation2 + $0x180] sm:$0xff] %v237_v49  ;;  %346 = vst [vmem:[#allocation2 + $0x188] sm:$0xff] %v238_v50 }
  0x4d   : > { %347 = vst [vmem:[#allocation2 + $0x190] sm:$0x3] %v239_v51  ;;  %348 = vst [vmem:[#allocation2 + $0x198] sm:$0xff] %v240_v52 }
  0x4e   : > { %349 = vst [vmem:[#allocation2 + $0x1a0] sm:$0xff] %v241_v53  ;;  %350 = vst [vmem:[#allocation2 + $0x1a8] sm:$0x3] %v242_v54 }
  0x4f   : > { %351 = vst [vmem:[#allocation2 + $0x1b0] sm:$0xff] %v243_v55  ;;  %352 = vst [vmem:[#allocation2 + $0x1b8] sm:$0xff] %v244_v56 }
  0x50   : > { %353 = vst [vmem:[#allocation2 + $0x1c0] sm:$0x3] %v245_v57  ;;  %354 = vst [vmem:[#allocation2 + $0x1c8] sm:$0xff] %v246_v58 }
  0x51   : > { %355 = vst [vmem:[#allocation2 + $0x1d0] sm:$0xff] %v247_v59  ;;  %356 = vst [vmem:[#allocation2 + $0x1d8] sm:$0x3] %v248_v60 }
  0x52   : > { %357 = vst [vmem:[#allocation2 + $0x1e0] sm:$0xff] %v249_v61  ;;  %358 = vst [vmem:[#allocation2 + $0x1e8] sm:$0xff] %v250_v62 }
  0x53   : > { %359 = vst [vmem:[#allocation2 + $0x1f0] sm:$0x3] %v251_v63  ;;  %360 = vst [vmem:[#allocation2 + $0x1f8] sm:$0xff] %v252_v0 }
  0x54   : > { %361 = vst [vmem:[#allocation2 + $0x200] sm:$0xff] %v253_v1  ;;  %362 = vst [vmem:[#allocation2 + $0x208] sm:$0x3] %v254_v2 }
  0x55   : > { %363 = vst [vmem:[#allocation2 + $0x210] sm:$0xff] %v255_v3  ;;  %364 = vst [vmem:[#allocation2 + $0x218] sm:$0xff] %v256_v4 }
  0x56   : > { %365 = vst [vmem:[#allocation2 + $0x220] sm:$0x3] %v257_v5  ;;  %366 = vst [vmem:[#allocation2 + $0x228] sm:$0xff] %v258_v6 }
  0x57   : > { %367 = vst [vmem:[#allocation2 + $0x230] sm:$0xff] %v259_v7  ;;  %368 = vst [vmem:[#allocation2 + $0x238] sm:$0x3] %v260_v8 }
  0x58   : > { %369 = vst [vmem:[#allocation2 + $0x240] sm:$0xff] %v261_v9  ;;  %370 = vst [vmem:[#allocation2 + $0x248] sm:$0xff] %v262_v10 }
  0x59   : > { %371 = vst [vmem:[#allocation2 + $0x250] sm:$0x3] %v263_v11  ;;  %372 = vst [vmem:[#allocation2 + $0x258] sm:$0xff] %v264_v12 }
  0x5a   : > { %373 = vst [vmem:[#allocation2 + $0x260] sm:$0xff] %v265_v13  ;;  %374 = vst [vmem:[#allocation2 + $0x268] sm:$0x3] %v266_v14 }
  0x5b   : > { %375 = vst [vmem:[#allocation2 + $0x270] sm:$0xff] %v267_v15  ;;  %376 = vst [vmem:[#allocation2 + $0x278] sm:$0xff] %v268_v16 }
  0x5c   : > { %377 = vst [vmem:[#allocation2 + $0x280] sm:$0x3] %v269_v17  ;;  %378 = vst [vmem:[#allocation2 + $0x288] sm:$0xff] %v270_v18 }
  0x5d   : > { %379 = vst [vmem:[#allocation2 + $0x290] sm:$0xff] %v271_v19  ;;  %380 = vst [vmem:[#allocation2 + $0x298] sm:$0x3] %v272_v20 }
  0x5e   : > { %381 = vst [vmem:[#allocation2 + $0x2a0] sm:$0xff] %v273_v21  ;;  %382 = vst [vmem:[#allocation2 + $0x2a8] sm:$0xff] %v274_v22 }
  0x5f   : > { %383 = vst [vmem:[#allocation2 + $0x2b0] sm:$0x3] %v275_v23  ;;  %384 = vst [vmem:[#allocation2 + $0x2b8] sm:$0xff] %v276_v24 }
  0x60   : > { %385 = vst [vmem:[#allocation2 + $0x2c0] sm:$0xff] %v277_v25  ;;  %386 = vst [vmem:[#allocation2 + $0x2c8] sm:$0x3] %v278_v26 }
  0x61   : > { %387 = vst [vmem:[#allocation2 + $0x2d0] sm:$0xff] %v279_v27  ;;  %388 = vst [vmem:[#allocation2 + $0x2d8] sm:$0xff] %v280_v28 }
  0x62   : > { %389 = vst [vmem:[#allocation2 + $0x2e0] sm:$0x3] %v281_v29  ;;  %390 = vst [vmem:[#allocation2 + $0x2e8] sm:$0xff] %v282_v30 }
  0x63   : > { %391 = vst [vmem:[#allocation2 + $0x2f0] sm:$0xff] %v283_v31  ;;  %392 = vst [vmem:[#allocation2 + $0x2f8] sm:$0x3] %v284_v32 }
  0x64   : > { %393 = vst [vmem:[#allocation2 + $0x300] sm:$0xff] %v285_v33  ;;  %394 = vst [vmem:[#allocation2 + $0x308] sm:$0xff] %v286_v34 }
  0x65   : > { %395 = vst [vmem:[#allocation2 + $0x310] sm:$0x3] %v287_v35  ;;  %396 = vst [vmem:[#allocation2 + $0x318] sm:$0xff] %v288_v36 }
  0x66   : > { %397 = vst [vmem:[#allocation2 + $0x320] sm:$0xff] %v289_v37  ;;  %398 = vst [vmem:[#allocation2 + $0x328] sm:$0x3] %v290_v38 }
  0x67   : > { %399 = vst [vmem:[#allocation2 + $0x330] sm:$0xff] %v291_v39  ;;  %400 = vst [vmem:[#allocation2 + $0x338] sm:$0xff] %v292_v40 }
  0x68   : > { %401 = vst [vmem:[#allocation2 + $0x340] sm:$0x3] %v293_v41  ;;  %402 = vst [vmem:[#allocation2 + $0x348] sm:$0xff] %v294_v42 }
  0x69   : > { %403 = vst [vmem:[#allocation2 + $0x350] sm:$0xff] %v295_v43  ;;  %404 = vst [vmem:[#allocation2 + $0x358] sm:$0x3] %v296_v44 }
  0x6a PF: > { %v4832_v45 = vld [vmem:[%s5179_s21 + $0x38] sm:$0xff]   ;;  %v5135_v46 = vmov 0   ;;  %v4833_v47 = vld [vmem:[%s5179_s21 + $0x30] sm:$0xff]   ;;  %v4834_v48 = vld [vmem:[%s5179_s21 + $0x28] sm:$0xff]   ;;  %p3421_p5 = scmp.lt.s32.totalorder %s5170_s16, 0  ;;  %p3420_p7 = scmp.gt.s32.totalorder %s5170_s16, 0 }
  0x6b   : > { %1911 = vmatprep.subr.bf16.mxu0 %v5135_v46  ;;  %4780 = vmatprep.subr.bf16.mxu1 %v5135_v46  ;;  %v4835_v49 = vld [vmem:[%s5179_s21 + $0x20] sm:$0xff]   ;;  %v4836_v50 = vld [vmem:[%s5179_s21 + $0x18] sm:$0xff]   ;;  %v566_v52 = vld [vmem:[#allocation2 + $0x9] sm:$0xff] }
  0x6c   : > { %1912 = vmatpush1.bf16.msra.mxu0 %v4832_v45  ;;  %4796 = vmatpush1.bf16.msra.mxu1 %v4832_v45  ;;  %v565_v51 = vld [vmem:[#allocation2 + $0x1] sm:$0xff]  ;;  %v613_v53 = vld [vmem:[#allocation2 + $0x271] sm:$0xff]  ;;  %v614_v55 = vld [vmem:[#allocation2 + $0x279] sm:$0xff] }
  0x6d   : > { %1913 = vmatprep.subr.bf16.mxu0 %v5135_v46  ;;  %4781 = vmatprep.subr.bf16.mxu1 %v5135_v46  ;;  %v629_v54 = vpack.c.bf16 %v566_v52, %v565_v51  ;;  %v4837_v56 = vld [vmem:[%s5179_s21 + $0x10] sm:$0xff]   ;;  %v653_v57 = vpack.c.bf16 %v614_v55, %v613_v53  ;;  %v4838_v58 = vld [vmem:[%s5179_s21 + $0x8] sm:$0xff]   ;;  %v4839_v59 = vld [vmem:[%s5179_s21] sm:$0xff]  }
  0x6e   : > { %v4840_v60 = vld [vmem:[%s5179_s21 + $0x78] sm:$0xff]   ;;  %v4841_v61 = vld [vmem:[%s5179_s21 + $0x70] sm:$0xff]   ;;  %v4842_v62 = vld [vmem:[%s5179_s21 + $0x68] sm:$0xff]  }
  0x6f   : > { %1943 = vmatprep.mubr.bf16.mxu0 %v629_v54  ;;  %2135 = vmatprep.mubr.bf16.mxu1 %v653_v57  ;;  %v4843_v63 = vld [vmem:[%s5179_s21 + $0x60] sm:$0xff]   ;;  %v4844_v0 = vld [vmem:[%s5179_s21 + $0x58] sm:$0xff]   ;;  %v4845_v1 = vld [vmem:[%s5179_s21 + $0x50] sm:$0xff]  }
  0x70   : > { %1914 = vmatpush1.bf16.msra.mxu0 %v4833_v47  ;;  %4797 = vmatpush1.bf16.msra.mxu1 %v4833_v47  ;;  %v4846_v2 = vld [vmem:[%s5179_s21 + $0x48] sm:$0xff]   ;;  %v4847_v3 = vld [vmem:[%s5179_s21 + $0x40] sm:$0xff]   ;;  %v517_v6 = vld [vmem:[#allocation2 + $0x270] sm:$0xff] }
  0x71   : > { %1915 = vmatprep.subr.bf16.mxu0 %v5135_v46  ;;  %4782 = vmatprep.subr.bf16.mxu1 %v5135_v46  ;;  %v469_v4 = vld [vmem:[#allocation2] sm:$0xff]  ;;  %v470_v5 = vld [vmem:[#allocation2 + $0x8] sm:$0xff]  ;;  %v518_v7 = vld [vmem:[#allocation2 + $0x278] sm:$0xff] }
  0x72   : > { %v567_v8 = vld [vmem:[#allocation2 + $0x19] sm:$0xff]  ;;  %v568_v9 = vld [vmem:[#allocation2 + $0x21] sm:$0xff]  ;;  %v615_v10 = vld [vmem:[#allocation2 + $0x289] sm:$0xff]  ;;  %v533_v11 = vpack.c.bf16 %v470_v5, %v469_v4  ;;  %v557_v12 = vpack.c.bf16 %v518_v7, %v517_v6 }
  0x73   : > { %v616_v13 = vld [vmem:[#allocation2 + $0x291] sm:$0xff]  ;;  %v630_v16 = vpack.c.bf16 %v568_v9, %v567_v8  ;;  %v472_v20 = vld [vmem:[#allocation2 + $0x20] sm:$0xff]  ;;  %v519_v21 = vld [vmem:[#allocation2 + $0x288] sm:$0xff] }
  0x74   : > { %1916 = vmatpush1.bf16.msra.mxu0 %v4834_v48  ;;  %4798 = vmatpush1.bf16.msra.mxu1 %v4834_v48  ;;  %v4848_v14 = vld [vmem:[%s5179_s21 + $0xb8] sm:$0xff]   ;;  %v4850_v17 = vld [vmem:[%s5179_s21 + $0xb0] sm:$0xff]   ;;  %v654_v18 = vpack.c.bf16 %v616_v13, %v615_v10  ;;  %v617_v26 = vld [vmem:[#allocation2 + $0x2a1] sm:$0xff] }
  0x75   : > { %1917 = vmatprep.subr.bf16.mxu0 %v5135_v46  ;;  %4783 = vmatprep.subr.bf16.mxu1 %v5135_v46  ;;  %v4849_v15 = vld [vmem:[%s5179_s21 + $0x138] sm:$0xff]   ;;  %v520_v22 = vld [vmem:[#allocation2 + $0x290] sm:$0xff]  ;;  %v4851_v30 = vld [vmem:[%s5179_s21 + $0xa8] sm:$0xff]  }
  0x76   : > { %v471_v19 = vld [vmem:[#allocation2 + $0x18] sm:$0xff]  ;;  %v4853_v23 = vld [vmem:[%s5179_s21 + $0x130] sm:$0xff]   ;;  %v558_v29 = vpack.c.bf16 %v520_v22, %v519_v21  ;;  %v4852_v33 = vld [vmem:[%s5179_s21 + $0xa0] sm:$0xff]  }
  0x77   : > { %v569_v24 = vld [vmem:[#allocation2 + $0x31] sm:$0xff]  ;;  %v570_v25 = vld [vmem:[#allocation2 + $0x39] sm:$0xff]  ;;  %v618_v27 = vld [vmem:[#allocation2 + $0x2a9] sm:$0xff]  ;;  %v5637_v28 = vpack.c.bf16 %v472_v20, %v471_v19 }
  0x78   : > { %1918 = vmatpush1.bf16.msra.mxu0 %v4835_v49  ;;  %4799 = vmatpush1.bf16.msra.mxu1 %v4835_v49  ;;  %v631_v31 = vpack.c.bf16 %v570_v25, %v569_v24  ;;  %v655_v32 = vpack.c.bf16 %v618_v27, %v617_v26  ;;  %v473_v34 = vld [vmem:[#allocation2 + $0x30] sm:$0xff]  ;;  %v474_v35 = vld [vmem:[#allocation2 + $0x38] sm:$0xff]  ;;  %v4857_v36 = vld [vmem:[%s5179_s21 + $0x128] sm:$0xff]  }
  0x79   : > { %1919 = vmatprep.subr.bf16.mxu0 %v5135_v46  ;;  %4784 = vmatprep.subr.bf16.mxu1 %v5135_v46  ;;  %v521_v37 = vld [vmem:[#allocation2 + $0x2a0] sm:$0xff]  ;;  %v522_v38 = vld [vmem:[#allocation2 + $0x2a8] sm:$0xff]  ;;  %v572_v40 = vld [vmem:[#allocation2 + $0x51] sm:$0xff]  ;;  %v5647_v44 = vpack.c.bf16 %v474_v35, %v473_v34 }
  0x7a   : > { %v571_v39 = vld [vmem:[#allocation2 + $0x49] sm:$0xff]  ;;  %v619_v41 = vld [vmem:[#allocation2 + $0x2b9] sm:$0xff]  ;;  %v620_v42 = vld [vmem:[#allocation2 + $0x2c1] sm:$0xff]  ;;  %v559_v45 = vpack.c.bf16 %v522_v38, %v521_v37 }
  0x7b   : > { %v4861_v43 = vld [vmem:[%s5179_s21 + $0x120] sm:$0xff]   ;;  %v4854_v47 = vld [vmem:[%s5179_s21 + $0x98] sm:$0xff]   ;;  %v632_v48 = vpack.c.bf16 %v572_v40, %v571_v39  ;;  %v656_v49 = vpack.c.bf16 %v620_v42, %v619_v41  ;;  %v475_v51 = vld [vmem:[#allocation2 + $0x48] sm:$0xff] }
  0x7c   : > { %1920 = vmatpush1.bf16.msra.mxu0 %v4836_v50  ;;  %4800 = vmatpush1.bf16.msra.mxu1 %v4836_v50  ;;  %v4855_v50 = vld [vmem:[%s5179_s21 + $0x90] sm:$0xff]   ;;  %v4865_v53 = vld [vmem:[%s5179_s21 + $0x118] sm:$0xff]   ;;  %v524_v55 = vld [vmem:[#allocation2 + $0x2c0] sm:$0xff] }
  0x7d   : > { %1921 = vmatprep.subr.bf16.mxu0 %v5135_v46  ;;  %4785 = vmatprep.subr.bf16.mxu1 %v5135_v46  ;;  %v476_v52 = vld [vmem:[#allocation2 + $0x50] sm:$0xff]  ;;  %v523_v54 = vld [vmem:[#allocation2 + $0x2b8] sm:$0xff]  ;;  %v478_v4 = vld [vmem:[#allocation2 + $0x68] sm:$0xff] }
  0x7e   : > { %v574_v57 = vld [vmem:[#allocation2 + $0x69] sm:$0xff]  ;;  %v526_v6 = vld [vmem:[#allocation2 + $0x2d8] sm:$0xff]  ;;  %v576_v8 = vld [vmem:[#allocation2 + $0x81] sm:$0xff] }
  0x7f   : > { %v525_v5 = vld [vmem:[#allocation2 + $0x2d0] sm:$0xff]  ;;  %v575_v7 = vld [vmem:[#allocation2 + $0x79] sm:$0xff]  ;;  %v527_v21 = vld [vmem:[#allocation2 + $0x2e8] sm:$0xff] }
  0x80   : > { %1922 = vmatpush1.bf16.msra.mxu0 %v4837_v56  ;;  %4801 = vmatpush1.bf16.msra.mxu1 %v4837_v56  ;;  %v573_v56 = vld [vmem:[#allocation2 + $0x61] sm:$0xff]  ;;  %v623_v9 = vld [vmem:[#allocation2 + $0x2e9] sm:$0xff]  ;;  %v624_v10 = vld [vmem:[#allocation2 + $0x2f1] sm:$0xff]  ;;  %v561_v13 = vpack.c.bf16 %v526_v6, %v525_v5 }
  0x81   : > { %1923 = vmatprep.subr.bf16.mxu0 %v5135_v46  ;;  %4786 = vmatprep.subr.bf16.mxu1 %v5135_v46  ;;  %v480_v19 = vld [vmem:[#allocation2 + $0x80] sm:$0xff]  ;;  %v528_v22 = vld [vmem:[#allocation2 + $0x2f0] sm:$0xff]  ;;  %v530_v38 = vld [vmem:[#allocation2 + $0x308] sm:$0xff] }
  0x82   : > { %v4873_v20 = vld [vmem:[%s5179_s21 + $0x100] sm:$0xff]   ;;  %v626_v26 = vld [vmem:[#allocation2 + $0x309] sm:$0xff]  ;;  %v580_v40 = vld [vmem:[#allocation2 + $0xb1] sm:$0xff] }
  0x83   : > { %v578_v24 = vld [vmem:[#allocation2 + $0x99] sm:$0xff]  ;;  %v625_v25 = vld [vmem:[#allocation2 + $0x301] sm:$0xff]  ;;  %v481_v35 = vld [vmem:[#allocation2 + $0x90] sm:$0xff] }
  0x84   : > { %1924 = vmatpush1.bf16.msra.mxu0 %v4838_v58  ;;  %4802 = vmatpush1.bf16.msra.mxu1 %v4838_v58  ;;  %v621_v58 = vld [vmem:[#allocation2 + $0x2d1] sm:$0xff]  ;;  %v4863_v34 = vld [vmem:[%s5179_s21 + $0xe0] sm:$0xff]   ;;  %v579_v39 = vld [vmem:[#allocation2 + $0xa9] sm:$0xff] }
  0x85   : > { %1925 = vmatprep.subr.bf16.mxu0 %v5135_v46  ;;  %4787 = vmatprep.subr.bf16.mxu1 %v5135_v46  ;;  %v529_v37 = vld [vmem:[#allocation2 + $0x300] sm:$0xff]  ;;  %v662_v5 = vld [vmem:[#allocation2 + $0xa] sm:$0xff] }
  0x86   : > { %v627_v41 = vld [vmem:[#allocation2 + $0x319] sm:$0xff]  ;;  %v628_v42 = vld [vmem:[#allocation2 + $0x321] sm:$0xff] }
  0x87   : > { %v583_v6 = vld [vmem:[#allocation2 + $0xd9] sm:$0xff] }
  0x88   : > { %1926 = vmatpush1.bf16.msra.mxu0 %v4839_v59  ;;  %4803 = vmatpush1.bf16.msra.mxu1 %v4839_v59  ;;  %v622_v59 = vld [vmem:[#allocation2 + $0x2d9] sm:$0xff] }
  0x89   : > { %1927 = vmatprep.subr.bf16.mxu0 %v5135_v46  ;;  %4788 = vmatprep.subr.bf16.mxu1 %v5135_v46 }
  0x8c   : > { %1928 = vmatpush2.bf16.msra.mxu0 %v4840_v60  ;;  %4804 = vmatpush2.bf16.msra.mxu1 %v4840_v60  ;;  %v5657_v60 = vpack.c.bf16 %v476_v52, %v475_v51  ;;  %v4866_v51 = vld [vmem:[%s5179_s21 + $0xd0] sm:$0xff]   ;;  %v483_v52 = vld [vmem:[#allocation2 + $0xa8] sm:$0xff] }
  0x8d   : > { %1929 = vmatprep.subr.bf16.mxu0 %v5135_v46  ;;  %4789 = vmatprep.subr.bf16.mxu1 %v5135_v46 }
  0x90   : > { %1930 = vmatpush2.bf16.msra.mxu0 %v4841_v61  ;;  %4805 = vmatpush2.bf16.msra.mxu1 %v4841_v61  ;;  %v560_v61 = vpack.c.bf16 %v524_v55, %v523_v54  ;;  %v484_v54 = vld [vmem:[#allocation2 + $0xb0] sm:$0xff]  ;;  %v531_v55 = vld [vmem:[#allocation2 + $0x318] sm:$0xff] }
  0x91   : > { %1931 = vmatprep.subr.bf16.mxu0 %v5135_v46  ;;  %4790 = vmatprep.subr.bf16.mxu1 %v5135_v46 }
  0x94   : > { %1932 = vmatpush2.bf16.msra.mxu0 %v4842_v62  ;;  %4806 = vmatpush2.bf16.msra.mxu1 %v4842_v62  ;;  %v4856_v62 = vld [vmem:[%s5179_s21 + $0x88] sm:$0xff]  }
  0x95   : > { %1933 = vmatprep.subr.bf16.mxu0 %v5135_v46  ;;  %4791 = vmatprep.subr.bf16.mxu1 %v5135_v46 }
  0x98   : > { %1934 = vmatpush2.bf16.msra.mxu0 %v4843_v63  ;;  %4807 = vmatpush2.bf16.msra.mxu1 %v4843_v63  ;;  %v633_v63 = vpack.c.bf16 %v574_v57, %v573_v56  ;;  %v532_v56 = vld [vmem:[#allocation2 + $0x320] sm:$0xff] }
  0x99   : > { %1935 = vmatprep.subr.bf16.mxu0 %v5135_v46  ;;  %4792 = vmatprep.subr.bf16.mxu1 %v5135_v46  ;;  %v581_v57 = vld [vmem:[#allocation2 + $0xc1] sm:$0xff] }
  0x9c   : > { %1936 = vmatpush2.bf16.msra.mxu0 %v4844_v0  ;;  %4808 = vmatpush2.bf16.msra.mxu1 %v4844_v0  ;;  %v657_v0 = vpack.c.bf16 %v622_v59, %v621_v58  ;;  %v582_v58 = vld [vmem:[#allocation2 + $0xc9] sm:$0xff]  ;;  %v5697_v59 = vpack.c.bf16 %v484_v54, %v483_v52 }
  0x9d   : > { %1937 = vmatprep.subr.bf16.mxu0 %v5135_v46  ;;  %4793 = vmatprep.subr.bf16.mxu1 %v5135_v46  ;;  %v4884_v52 = vld [vmem:[%s5179_s21 + $0x188] sm:$0xff]  }
  0x9e   : > { %v669_v54 = vld [vmem:[#allocation2 + $0x62] sm:$0xff] }
  0xa0   : > { %1938 = vmatpush2.bf16.msra.mxu0 %v4845_v1  ;;  %4809 = vmatpush2.bf16.msra.mxu1 %v4845_v1  ;;  %v4869_v1 = vld [vmem:[%s5179_s21 + $0x110] sm:$0xff]  }
  0xa1   : > { %1939 = vmatprep.subr.bf16.mxu0 %v5135_v46  ;;  %4794 = vmatprep.subr.bf16.mxu1 %v5135_v46 }
  0xa4   : > { %1940 = vmatpush2.bf16.msra.mxu0 %v4846_v2  ;;  %4810 = vmatpush2.bf16.msra.mxu1 %v4846_v2  ;;  %v4858_v2 = vld [vmem:[%s5179_s21 + $0x80] sm:$0xff]  }
  0xa5   : > { %1941 = vmatprep.subr.bf16.mxu0 %v5135_v46  ;;  %4795 = vmatprep.subr.bf16.mxu1 %v5135_v46 }
  0xa8   : > { %1942 = vmatpush2.bf16.msra.mxu0 %v4847_v3  ;;  %4811 = vmatpush2.bf16.msra.mxu1 %v4847_v3  ;;  %v477_v3 = vld [vmem:[#allocation2 + $0x60] sm:$0xff] }
  0xa9   : > { %2200 = vmatprep.subr.bf16.mxu1 %v5135_v46  ;;  %2489 = vmatprep.subr.bf16.mxu0 %v5135_v46 }
  0xab   : > { %1944 = vmatmul.mubr.bf16.vlgmr.msra.gmra.mxu0 %v533_v11  ;;  %2136 = vmatmul.mubr.bf16.vlgmr.msra.gmra.mxu1 %v557_v12  ;;  %v4871_v11 = vld [vmem:[%s5179_s21 + $0x108] sm:$0xff]   ;;  %v5667_v12 = vpack.c.bf16 %v478_v4, %v477_v3 }
  0xac   : > { %2201 = vmatpush1.bf16.msra.mxu1 %v4848_v14  ;;  %2490 = vmatpush1.bf16.msra.mxu0 %v4849_v15  ;;  %v4859_v14 = vld [vmem:[%s5179_s21 + $0xf8] sm:$0xff]   ;;  %v634_v15 = vpack.c.bf16 %v576_v8, %v575_v7  ;;  %v486_v3 = vld [vmem:[#allocation2 + $0xc8] sm:$0xff] }
  0xad   : > { %2202 = vmatprep.subr.bf16.mxu1 %v5135_v46  ;;  %1951 = vmatprep.mubr.bf16.mxu0 %v630_v16  ;;  %v658_v16 = vpack.c.bf16 %v624_v10, %v623_v9  ;;  %v661_v4 = vld [vmem:[#allocation2 + $0x2] sm:$0xff]  ;;  %v4881_v8 = vld [vmem:[%s5179_s21 + $0x158] sm:$0xff]  }
  0xae   : > { %2143 = vmatprep.mubr.bf16.mxu1 %v654_v18  ;;  %2491 = vmatprep.subr.bf16.mxu0 %v5135_v46  ;;  %v479_v18 = vld [vmem:[#allocation2 + $0x78] sm:$0xff]  ;;  %v584_v7 = vld [vmem:[#allocation2 + $0xe1] sm:$0xff]  ;;  %v725_v10 = vpack.c.bf16 %v662_v5, %v661_v4 }
  0xaf   : > { %v5677_v27 = vpack.c.bf16 %v480_v19, %v479_v18  ;;  %v4872_v18 = vld [vmem:[%s5179_s21 + $0x1b0] sm:$0xff]   ;;  %v594_v5 = vld [vmem:[#allocation2 + $0x159] sm:$0xff] }
  0xb0   : > { %2203 = vmatpush1.bf16.msra.mxu1 %v4850_v17  ;;  %2492 = vmatpush1.bf16.msra.mxu0 %v4853_v23  ;;  %v4860_v17 = vld [vmem:[%s5179_s21 + $0xf0] sm:$0xff]  }
  0xb1   : > { %2204 = vmatprep.subr.bf16.mxu1 %v5135_v46  ;;  %2493 = vmatprep.subr.bf16.mxu0 %v5135_v46  ;;  %v577_v23 = vld [vmem:[#allocation2 + $0x91] sm:$0xff] }
  0xb2   : > { %v585_v19 = vld [vmem:[#allocation2 + $0xf1] sm:$0xff] }
  0xb3   : > { %1952 = vmatmul.mubr.bf16.gmra.mxu0 %v5637_v28  ;;  %2144 = vmatmul.mubr.bf16.gmra.mxu1 %v558_v29  ;;  %v562_v29 = vpack.c.bf16 %v528_v22, %v527_v21  ;;  %v593_v4 = vld [vmem:[#allocation2 + $0x151] sm:$0xff] }
  0xb4   : > { %2205 = vmatpush1.bf16.msra.mxu1 %v4851_v30  ;;  %1959 = vmatprep.mubr.bf16.mxu0 %v631_v31  ;;  %v4862_v30 = vld [vmem:[%s5179_s21 + $0xe8] sm:$0xff]   ;;  %v635_v31 = vpack.c.bf16 %v578_v24, %v577_v23 }
  0xb5   : > { %2206 = vmatprep.subr.bf16.mxu1 %v5135_v46  ;;  %2151 = vmatprep.mubr.bf16.mxu1 %v655_v32  ;;  %v4874_v32 = vld [vmem:[%s5179_s21 + $0x178] sm:$0xff]   ;;  %v4885_v24 = vld [vmem:[%s5179_s21 + $0x148] sm:$0xff]  }
  0xb6   : > { %2494 = vmatpush1.bf16.msra.mxu0 %v4857_v36  ;;  %v482_v36 = vld [vmem:[#allocation2 + $0x98] sm:$0xff] }
  0xb7   : > { %2495 = vmatprep.subr.bf16.mxu0 %v5135_v46 }
  0xb8   : > { %2207 = vmatpush1.bf16.msra.mxu1 %v4852_v33  ;;  %v659_v33 = vpack.c.bf16 %v626_v26, %v625_v25  ;;  %v489_v25 = vld [vmem:[#allocation2 + $0xf0] sm:$0xff]  ;;  %v490_v26 = vld [vmem:[#allocation2 + $0xf8] sm:$0xff] }
  0xb9   : > { %2208 = vmatprep.subr.bf16.mxu1 %v5135_v46 }
  0xba   : > { %2496 = vmatpush1.bf16.msra.mxu0 %v4861_v43  ;;  %v4876_v43 = vld [vmem:[%s5179_s21 + $0x170] sm:$0xff]  }
  0xbb   : > { %1960 = vmatmul.mubr.bf16.gmra.mxu0 %v5647_v44  ;;  %2152 = vmatmul.mubr.bf16.gmra.mxu1 %v559_v45  ;;  %v5687_v45 = vpack.c.bf16 %v482_v36, %v481_v35  ;;  %v5735_v35 = vld [vmem:[%s5179_s21 + $0x238] sm:$0xff]   ;;  %v5737_v36 = vpack.c.bf16 %v490_v26, %v489_v25 }
  0xbc   : > { %2209 = vmatpush1.bf16.msra.mxu1 %v4854_v47  ;;  %1967 = vmatprep.mubr.bf16.mxu0 %v632_v48  ;;  %v563_v47 = vpack.c.bf16 %v530_v38, %v529_v37  ;;  %v4864_v48 = vld [vmem:[%s5179_s21 + $0xd8] sm:$0xff]  }
  0xbd   : > { %2210 = vmatprep.subr.bf16.mxu1 %v5135_v46  ;;  %2159 = vmatprep.mubr.bf16.mxu1 %v656_v49  ;;  %v636_v49 = vpack.c.bf16 %v580_v40, %v579_v39  ;;  %v4879_v38 = vld [vmem:[%s5179_s21 + $0x198] sm:$0xff]   ;;  %v491_v39 = vld [vmem:[#allocation2 + $0x108] sm:$0xff]  ;;  %v492_v40 = vld [vmem:[#allocation2 + $0x110] sm:$0xff] }
  0xbe   : > { %2497 = vmatprep.subr.bf16.mxu0 %v5135_v46  ;;  %v597_v25 = vld [vmem:[#allocation2 + $0x1b1] sm:$0xff]  ;;  %v598_v26 = vld [vmem:[#allocation2 + $0x1b9] sm:$0xff] }
  0xbf   : > { %2498 = vmatpush1.bf16.msra.mxu0 %v4865_v53  ;;  %v4878_v53 = vld [vmem:[%s5179_s21 + $0x168] sm:$0xff]  }
  0xc0   : > { %2211 = vmatpush1.bf16.msra.mxu1 %v4855_v50  ;;  %2499 = vmatprep.subr.bf16.mxu0 %v5135_v46  ;;  %v660_v50 = vpack.c.bf16 %v628_v42, %v627_v41  ;;  %v667_v41 = vld [vmem:[#allocation2 + $0x4a] sm:$0xff]  ;;  %v668_v42 = vld [vmem:[#allocation2 + $0x52] sm:$0xff] }
  0xc1   : > { %2212 = vmatprep.subr.bf16.mxu1 %v5135_v46 }
  0xc3   : > { %1968 = vmatmul.mubr.bf16.gmra.mxu0 %v5657_v60  ;;  %2160 = vmatmul.mubr.bf16.gmra.mxu1 %v560_v61  ;;  %v564_v61 = vpack.c.bf16 %v532_v56, %v531_v55  ;;  %v670_v55 = vld [vmem:[#allocation2 + $0x6a] sm:$0xff]  ;;  %v591_v56 = vld [vmem:[#allocation2 + $0x139] sm:$0xff] }
  0xc4   : > { %2213 = vmatpush1.bf16.msra.mxu1 %v4856_v62  ;;  %1975 = vmatprep.mubr.bf16.mxu0 %v633_v63  ;;  %v4867_v62 = vld [vmem:[%s5179_s21 + $0xc8] sm:$0xff]   ;;  %v637_v63 = vpack.c.bf16 %v582_v58, %v581_v57  ;;  %v4886_v58 = vld [vmem:[%s5179_s21 + $0x180] sm:$0xff]  }
  0xc5   : > { %2214 = vmatprep.subr.bf16.mxu1 %v5135_v46  ;;  %2167 = vmatprep.mubr.bf16.mxu1 %v657_v0  ;;  %v4880_v0 = vld [vmem:[%s5179_s21 + $0x160] sm:$0xff]  }
  0xc6   : > { %2500 = vmatpush1.bf16.msra.mxu0 %v4869_v1  ;;  %v4868_v1 = vld [vmem:[%s5179_s21 + $0xc0] sm:$0xff]  }
  0xc7   : > { %2501 = vmatprep.subr.bf16.mxu0 %v5135_v46  ;;  %v592_v57 = vld [vmem:[#allocation2 + $0x141] sm:$0xff] }
  0xc8   : > { %2215 = vmatpush1.bf16.msra.mxu1 %v4858_v2  ;;  %v485_v2 = vld [vmem:[#allocation2 + $0xc0] sm:$0xff] }
  0xc9   : > { %2216 = vmatprep.subr.bf16.mxu1 %v5135_v46  ;;  %v5708_v9 = vpack.c.bf16 %v486_v3, %v485_v2  ;;  %v671_v2 = vld [vmem:[#allocation2 + $0x7a] sm:$0xff]  ;;  %v672_v3 = vld [vmem:[#allocation2 + $0x82] sm:$0xff] }
  0xca   : > { %2502 = vmatpush1.bf16.msra.mxu0 %v4871_v11  ;;  %v4870_v11 = vld [vmem:[%s5179_s21 + $0x1b8] sm:$0xff]  }
  0xcb   : > { %1976 = vmatmul.mubr.bf16.gmra.mxu0 %v5667_v12  ;;  %2168 = vmatmul.mubr.bf16.gmra.mxu1 %v561_v13  ;;  %v638_v13 = vpack.c.bf16 %v584_v7, %v583_v6  ;;  %v4890_v6 = vld [vmem:[%s5179_s21 + $0x1f0] sm:$0xff]  }
  0xcc   : > { %2217 = vmatpush2.bf16.msra.mxu1 %v4859_v14  ;;  %1983 = vmatprep.mubr.bf16.mxu0 %v634_v15  ;;  %v488_v14 = vld [vmem:[#allocation2 + $0xe0] sm:$0xff]  ;;  %v4883_v15 = vld [vmem:[%s5179_s21 + $0x150] sm:$0xff]  }
  0xcd   : > { %2218 = vmatprep.subr.bf16.mxu1 %v5135_v46  ;;  %2175 = vmatprep.mubr.bf16.mxu1 %v658_v16  ;;  %v663_v16 = vld [vmem:[#allocation2 + $0x1a] sm:$0xff] }
  0xce   : > { %2503 = vmatprep.subr.bf16.mxu0 %v5135_v46 }
  0xcf   : > { %2504 = vmatpush1.bf16.msra.mxu0 %v4873_v20  ;;  %v586_v20 = vld [vmem:[#allocation2 + $0xf9] sm:$0xff] }
  0xd0   : > { %2219 = vmatpush2.bf16.msra.mxu1 %v4860_v17  ;;  %2505 = vmatprep.subr.bf16.mxu0 %v5135_v46  ;;  %v664_v17 = vld [vmem:[#allocation2 + $0x22] sm:$0xff]  ;;  %v639_v23 = vpack.c.bf16 %v586_v20, %v585_v19 }
  0xd1   : > { %2220 = vmatprep.subr.bf16.mxu1 %v5135_v46  ;;  %v5721_v22 = vpack.c.bf16 %v664_v17, %v663_v16  ;;  %v596_v16 = vld [vmem:[#allocation2 + $0x171] sm:$0xff]  ;;  %v499_v20 = vld [vmem:[#allocation2 + $0x168] sm:$0xff] }
  0xd3   : > { %1984 = vmatmul.mubr.bf16.gmra.mxu0 %v5677_v27  ;;  %2176 = vmatmul.mubr.bf16.gmra.mxu1 %v562_v29  ;;  %v665_v29 = vld [vmem:[#allocation2 + $0x32] sm:$0xff] }
  0xd4   : > { %2221 = vmatpush2.bf16.msra.mxu1 %v4862_v30  ;;  %1991 = vmatprep.mubr.bf16.mxu0 %v635_v31  ;;  %v666_v30 = vld [vmem:[#allocation2 + $0x3a] sm:$0xff]  ;;  %v587_v31 = vld [vmem:[#allocation2 + $0x109] sm:$0xff] }
  0xd5   : > { %2222 = vmatprep.subr.bf16.mxu1 %v5135_v46  ;;  %2183 = vmatprep.mubr.bf16.mxu1 %v659_v33  ;;  %v4877_v33 = vld [vmem:[%s5179_s21 + $0x1a0] sm:$0xff]   ;;  %v5739_v37 = vpack.c.bf16 %v666_v30, %v665_v29 }
  0xd6   : > { %2506 = vmatpush2.bf16.msra.mxu0 %v4874_v32  ;;  %v588_v32 = vld [vmem:[#allocation2 + $0x111] sm:$0xff] }
  0xd7   : > { %2507 = vmatprep.subr.bf16.mxu0 %v5135_v46 }
  0xd8   : > { %2223 = vmatpush2.bf16.msra.mxu1 %v4863_v34  ;;  %v4887_v34 = vld [vmem:[%s5179_s21 + $0x140] sm:$0xff]  }
  0xd9   : > { %2224 = vmatprep.subr.bf16.mxu1 %v5135_v46 }
  0xda   : > { %2508 = vmatpush2.bf16.msra.mxu0 %v4876_v43  ;;  %v589_v43 = vld [vmem:[#allocation2 + $0x121] sm:$0xff] }
  0xdb   : > { %1992 = vmatmul.mubr.bf16.gmra.mxu0 %v5687_v45  ;;  %2184 = vmatmul.mubr.bf16.gmra.mxu1 %v563_v47  ;;  %v590_v47 = vld [vmem:[#allocation2 + $0x129] sm:$0xff] }
  0xdc   : > { %2225 = vmatpush2.bf16.msra.mxu1 %v4864_v48  ;;  %1999 = vmatprep.mubr.bf16.mxu0 %v636_v49  ;;  %v4882_v48 = vld [vmem:[%s5179_s21 + $0x190] sm:$0xff]   ;;  %v5749_v49 = vpack.c.bf16 %v492_v40, %v491_v39 }
  0xdd   : > { %2226 = vmatprep.subr.bf16.mxu1 %v5135_v46  ;;  %2191 = vmatprep.mubr.bf16.mxu1 %v660_v50  ;;  %v5751_v50 = vpack.c.bf16 %v668_v42, %v667_v41  ;;  %v503_v42 = vld [vmem:[#allocation2 + $0x1c8] sm:$0xff] }
  0xde   : > { %2509 = vmatprep.subr.bf16.mxu0 %v5135_v46 }
  0xdf   : > { %2510 = vmatpush2.bf16.msra.mxu0 %v4878_v53  ;;  %v494_v53 = vld [vmem:[#allocation2 + $0x128] sm:$0xff] }
  0xe0   : > { %2227 = vmatpush2.bf16.msra.mxu1 %v4866_v51  ;;  %2511 = vmatprep.subr.bf16.mxu0 %v5135_v46  ;;  %v641_v51 = vpack.c.bf16 %v590_v47, %v589_v43  ;;  %v504_v43 = vld [vmem:[#allocation2 + $0x1d0] sm:$0xff]  ;;  %v679_v47 = vld [vmem:[#allocation2 + $0xda] sm:$0xff] }
  0xe1   : > { %2228 = vmatprep.subr.bf16.mxu1 %v5135_v46 }
  0xe3   : > { %2000 = vmatmul.mubr.bf16.gmra.mxu0 %v5697_v59  ;;  %2192 = vmatmul.mubr.bf16.gmra.mxu1 %v564_v61 }
  0xe4   : > { %2229 = vmatpush2.bf16.msra.mxu1 %v4867_v62  ;;  %2007 = vmatprep.mubr.bf16.mxu0 %v637_v63  ;;  %v5762_v62 = vpack.c.bf16 %v670_v55, %v669_v54  ;;  %v642_v63 = vpack.c.bf16 %v592_v57, %v591_v56  ;;  %v505_v55 = vld [vmem:[#allocation2 + $0x1e0] sm:$0xff]  ;;  %v681_v56 = vld [vmem:[#allocation2 + $0xf2] sm:$0xff] }
  0xe5   : > { %2230 = vmatprep.subr.bf16.mxu1 %v5135_v46  ;;  %2232 = vmatprep.mubr.bf16.mxu1 %v5637_v28  ;;  %v487_v28 = vld [vmem:[#allocation2 + $0xd8] sm:$0xff] }
  0xe6   : > { %2512 = vmatpush2.bf16.msra.mxu0 %v4880_v0  ;;  %v5719_v21 = vpack.c.bf16 %v488_v14, %v487_v28  ;;  %v4889_v0 = vld [vmem:[%s5179_s21 + $0x1f8] sm:$0xff]  }
  0xe7   : > { %2513 = vmatprep.subr.bf16.mxu0 %v5135_v46  ;;  %v673_v28 = vld [vmem:[#allocation2 + $0x92] sm:$0xff]  ;;  %v674_v14 = vld [vmem:[#allocation2 + $0x9a] sm:$0xff] }
  0xe8   : > { %2231 = vmatpush2.bf16.msra.mxu1 %v4868_v1  ;;  %v496_v1 = vld [vmem:[#allocation2 + $0x140] sm:$0xff] }
  0xe9   : > { %2778 = vmatprep.subr.bf16.mxu1 %v5135_v46  ;;  %v682_v57 = vld [vmem:[#allocation2 + $0xfa] sm:$0xff] }
  0xea   : > { %2514 = vmatpush2.bf16.msra.mxu0 %v4881_v8  ;;  %v5773_v8 = vpack.c.bf16 %v672_v3, %v671_v2  ;;  %v507_v2 = vld [vmem:[#allocation2 + $0x1f8] sm:$0xff]  ;;  %v508_v3 = vld [vmem:[#allocation2 + $0x200] sm:$0xff] }
  0xeb   : > { %2008 = vmatmul.mubr.bf16.gmra.mxu0 %v5708_v9  ;;  %2233 = vmatmul.mubr.bf16.vlgmr.msra.gmra.mxu1 %v725_v10  ;;  %v643_v10 = vpack.c.bf16 %v594_v5, %v593_v4  ;;  %v684_v4 = vld [vmem:[#allocation2 + $0x112] sm:$0xff] }
  0xec   : > { %2779 = vmatpush1.bf16.msra.mxu1 %v4870_v11  ;;  %2015 = vmatprep.mubr.bf16.mxu0 %v638_v13  ;;  %v4892_v11 = vld [vmem:[%s5179_s21 + $0x1e8] sm:$0xff]   ;;  %v498_v13 = vld [vmem:[#allocation2 + $0x158] sm:$0xff]  ;;  %v4896_v5 = vld [vmem:[%s5179_s21 + $0x1d0] sm:$0xff]  }
  0xed   : > { %2240 = vmatprep.mubr.bf16.mxu1 %v5647_v44  ;;  %2780 = vmatprep.subr.bf16.mxu1 %v5135_v46  ;;  %v4875_v44 = vld [vmem:[%s5179_s21 + $0x1a8] sm:$0xff]  }
  0xee   : > { %2515 = vmatprep.subr.bf16.mxu0 %v5135_v46 }
  0xef   : > { %2516 = vmatpush2.bf16.msra.mxu0 %v4883_v15  ;;  %v595_v15 = vld [vmem:[#allocation2 + $0x169] sm:$0xff] }
  0xf0   : > { %2781 = vmatpush1.bf16.msra.mxu1 %v4872_v18  ;;  %2517 = vmatprep.subr.bf16.mxu0 %v5135_v46  ;;  %v5783_v18 = vpack.c.bf16 %v674_v14, %v673_v28  ;;  %v644_v19 = vpack.c.bf16 %v596_v16, %v595_v15  ;;  %v509_v28 = vld [vmem:[#allocation2 + $0x210] sm:$0xff]  ;;  %v685_v14 = vld [vmem:[#allocation2 + $0x122] sm:$0xff] }
  0xf1   : > { %2782 = vmatprep.subr.bf16.mxu1 %v5135_v46  ;;  %v686_v15 = vld [vmem:[#allocation2 + $0x12a] sm:$0xff] }
  0xf2   : > { %v607_v16 = vld [vmem:[#allocation2 + $0x229] sm:$0xff] }
  0xf3   : > { %2016 = vmatmul.mubr.bf16.gmra.mxu0 %v5719_v21  ;;  %2241 = vmatmul.mubr.bf16.gmra.mxu1 %v5721_v22 }
  0xf4   : > { %2023 = vmatprep.mubr.bf16.mxu0 %v639_v23  ;;  %2248 = vmatprep.mubr.bf16.mxu1 %v5657_v60  ;;  %v640_v60 = vpack.c.bf16 %v588_v32, %v587_v31  ;;  %v4893_v23 = vld [vmem:[%s5179_s21 + $0x1e0] sm:$0xff]   ;;  %v645_v31 = vpack.c.bf16 %v598_v26, %v597_v25  ;;  %v501_v32 = vld [vmem:[#allocation2 + $0x1b0] sm:$0xff]  ;;  %v4898_v26 = vld [vmem:[%s5179_s21 + $0x1c8] sm:$0xff]  }
  0xf5   : > { %2783 = vmatpush1.bf16.msra.mxu1 %v4875_v44  ;;  %2518 = vmatpush2.bf16.msra.mxu0 %v4885_v24  ;;  %v675_v44 = vld [vmem:[#allocation2 + $0xaa] sm:$0xff]  ;;  %v676_v24 = vld [vmem:[#allocation2 + $0xb2] sm:$0xff]  ;;  %v688_v25 = vld [vmem:[#allocation2 + $0x142] sm:$0xff] }
  0xf6   : > { %2784 = vmatprep.subr.bf16.mxu1 %v5135_v46  ;;  %2519 = vmatprep.subr.bf16.mxu0 %v5135_v46  ;;  %v5792_v30 = vpack.c.bf16 %v676_v24, %v675_v44  ;;  %v511_v44 = vld [vmem:[#allocation2 + $0x228] sm:$0xff]  ;;  %v512_v24 = vld [vmem:[#allocation2 + $0x230] sm:$0xff] }
  0xf9   : > { %2785 = vmatpush1.bf16.msra.mxu1 %v4877_v33  ;;  %2520 = vmatpush2.bf16.msra.mxu0 %v4887_v34  ;;  %v677_v33 = vld [vmem:[#allocation2 + $0xc2] sm:$0xff]  ;;  %v678_v34 = vld [vmem:[#allocation2 + $0xca] sm:$0xff] }
  0xfa   : > { %2786 = vmatprep.subr.bf16.mxu1 %v5135_v46  ;;  %4665 = vmatprep.subr.bf16.mxu0 %v5735_v35  ;;  %v5797_v40 = vpack.c.bf16 %v678_v34, %v677_v33 }
  0xfb   : > { %2024 = vmatmul.mubr.bf16.gmra.mxu0 %v5737_v36  ;;  %2249 = vmatmul.mubr.bf16.gmra.mxu1 %v5739_v37 }
  0xfc   : > { %2031 = vmatprep.mubr.bf16.mxu0 %v640_v60  ;;  %2256 = vmatprep.mubr.bf16.mxu1 %v5667_v12  ;;  %v493_v12 = vld [vmem:[#allocation2 + $0x120] sm:$0xff]  ;;  %v599_v60 = vld [vmem:[#allocation2 + $0x1c9] sm:$0xff] }
  0xfd   : > { %2787 = vmatpush1.bf16.msra.mxu1 %v4879_v38  ;;  %v5760_v61 = vpack.c.bf16 %v494_v53, %v493_v12  ;;  %v600_v38 = vld [vmem:[#allocation2 + $0x1d1] sm:$0xff]  ;;  %v5802_v12 = vpack.c.bf16 %v504_v43, %v503_v42  ;;  %v612_v42 = vld [vmem:[#allocation2 + $0x261] sm:$0xff] }
  0xfe   : > { %2788 = vmatprep.subr.bf16.mxu1 %v5135_v46  ;;  %v646_v41 = vpack.c.bf16 %v600_v38, %v599_v60  ;;  %v513_v60 = vld [vmem:[#allocation2 + $0x240] sm:$0xff]  ;;  %v514_v38 = vld [vmem:[#allocation2 + $0x248] sm:$0xff] }
  0xff   : > { %v788_v43 = vld [vmem:[#allocation2 + $0x180] sm:$0xff] }
 0x101   : > { %2789 = vmatpush1.bf16.msra.mxu1 %v4882_v48  ;;  %v4895_v48 = vld [vmem:[%s5179_s21 + $0x1d8] sm:$0xff]  }
 0x102   : > { %2790 = vmatprep.subr.bf16.mxu1 %v5135_v46 }
 0x103   : > { %2032 = vmatmul.mubr.bf16.gmra.mxu0 %v5749_v49  ;;  %2257 = vmatmul.mubr.bf16.gmra.mxu1 %v5751_v50 }
 0x104   : > { %2039 = vmatprep.mubr.bf16.mxu0 %v641_v51  ;;  %2264 = vmatprep.mubr.bf16.mxu1 %v5677_v27  ;;  %v495_v27 = vld [vmem:[#allocation2 + $0x138] sm:$0xff]  ;;  %v601_v51 = vld [vmem:[#allocation2 + $0x1e1] sm:$0xff] }
 0x105   : > { %2791 = vmatpush1.bf16.msra.mxu1 %v4884_v52  ;;  %v5771_v7 = vpack.c.bf16 %v496_v1, %v495_v27  ;;  %v602_v52 = vld [vmem:[#allocation2 + $0x1e9] sm:$0xff]  ;;  %v5812_v27 = vpack.c.bf16 %v682_v57, %v681_v56 }
 0x106   : > { %2792 = vmatprep.subr.bf16.mxu1 %v5135_v46  ;;  %v647_v54 = vpack.c.bf16 %v602_v52, %v601_v51  ;;  %v515_v52 = vld [vmem:[#allocation2 + $0x258] sm:$0xff] }
 0x109   : > { %2793 = vmatpush1.bf16.msra.mxu1 %v4886_v58  ;;  %v603_v58 = vld [vmem:[#allocation2 + $0x1f9] sm:$0xff] }
 0x10a   : > { %2794 = vmatprep.subr.bf16.mxu1 %v5135_v46 }
 0x10b   : > { %2040 = vmatmul.mubr.bf16.gmra.mxu0 %v5760_v61  ;;  %2265 = vmatmul.mubr.bf16.gmra.mxu1 %v5762_v62 }
 0x10c   : > { %2047 = vmatprep.mubr.bf16.mxu0 %v642_v63  ;;  %2272 = vmatprep.mubr.bf16.mxu1 %v5687_v45  ;;  %v497_v45 = vld [vmem:[#allocation2 + $0x150] sm:$0xff]  ;;  %v604_v63 = vld [vmem:[#allocation2 + $0x201] sm:$0xff] }
 0x10d   : > { %2795 = vmatpush2.bf16.msra.mxu1 %v4889_v0  ;;  %v5781_v17 = vpack.c.bf16 %v498_v13, %v497_v45  ;;  %v648_v1 = vpack.c.bf16 %v604_v63, %v603_v58  ;;  %v693_v58 = vld [vmem:[#allocation2 + $0x1b2] sm:$0xff]  ;;  %v694_v63 = vld [vmem:[#allocation2 + $0x1ba] sm:$0xff] }
 0x10e   : > { %2796 = vmatprep.subr.bf16.mxu1 %v5135_v46 }
 0x111   : > { %2797 = vmatpush2.bf16.msra.mxu1 %v4890_v6  ;;  %v605_v6 = vld [vmem:[#allocation2 + $0x211] sm:$0xff] }
 0x112   : > { %2798 = vmatprep.subr.bf16.mxu1 %v5135_v46 }
 0x113   : > { %2048 = vmatmul.mubr.bf16.gmra.mxu0 %v5771_v7  ;;  %2273 = vmatmul.mubr.bf16.gmra.mxu1 %v5773_v8 }
 0x114   : > { %2055 = vmatprep.mubr.bf16.mxu0 %v643_v10  ;;  %2280 = vmatprep.mubr.bf16.mxu1 %v5697_v59  ;;  %v500_v59 = vld [vmem:[#allocation2 + $0x170] sm:$0xff]  ;;  %v606_v10 = vld [vmem:[#allocation2 + $0x219] sm:$0xff] }
 0x115   : > { %2799 = vmatpush2.bf16.msra.mxu1 %v4892_v11  ;;  %v5790_v29 = vpack.c.bf16 %v500_v59, %v499_v20  ;;  %v5818_v11 = vpack.c.bf16 %v508_v3, %v507_v2  ;;  %v649_v13 = vpack.c.bf16 %v606_v10, %v605_v6  ;;  %v855_v2 = vld [vmem:[#allocation2 + $0x21] sm:$0xff]  ;;  %v741_v3 = vpack.c.bf16 %v694_v63, %v693_v58  ;;  %v695_v10 = vld [vmem:[#allocation2 + $0x1ca] sm:$0xff] }
 0x116   : > { %2800 = vmatprep.subr.bf16.mxu1 %v5135_v46 }
 0x119   : > { %2801 = vmatpush2.bf16.msra.mxu1 %v4893_v23  ;;  %v5828_v23 = vpack.c.bf16 %v686_v15, %v685_v14  ;;  %v4894_v14 = vld [vmem:[%s5179_s21 + $0x228] sm:$0xff]  }
 0x11a   : > { %2802 = vmatprep.subr.bf16.mxu1 %v5135_v46 }
 0x11b   : > { %2056 = vmatmul.mubr.bf16.gmra.mxu0 %v5781_v17  ;;  %2281 = vmatmul.mubr.bf16.gmra.mxu1 %v5783_v18 }
 0x11c   : > { %2063 = vmatprep.mubr.bf16.mxu0 %v644_v19  ;;  %2288 = vmatprep.mubr.bf16.mxu1 %v5708_v9  ;;  %v502_v9 = vld [vmem:[#allocation2 + $0x1b8] sm:$0xff] }
 0x11d   : > { %v549_v39 = vpack.c.bf16 %v502_v9, %v501_v32  ;;  %2803 = vmatpush2.bf16.msra.mxu1 %v4895_v48  ;;  %v608_v19 = vld [vmem:[#allocation2 + $0x231] sm:$0xff]  ;;  %v610_v32 = vld [vmem:[#allocation2 + $0x249] sm:$0xff]  ;;  %v5834_v9 = vpack.c.bf16 %v512_v24, %v511_v44  ;;  %v4897_v44 = vld [vmem:[%s5179_s21 + $0x220] sm:$0xff]  }
 0x11e   : > { %2804 = vmatprep.subr.bf16.mxu1 %v5135_v46  ;;  %v650_v59 = vpack.c.bf16 %v608_v19, %v607_v16 }
 0x121   : > { %2805 = vmatpush2.bf16.msra.mxu1 %v4896_v5 }
 0x122   : > { %2806 = vmatprep.subr.bf16.mxu1 %v5135_v46 }
 0x123   : > { %2064 = vmatmul.mubr.bf16.gmra.mxu0 %v5790_v29  ;;  %2289 = vmatmul.mubr.bf16.gmra.mxu1 %v5792_v30 }
 0x124   : > { %2071 = vmatprep.mubr.bf16.mxu0 %v645_v31  ;;  %2296 = vmatprep.mubr.bf16.mxu1 %v5719_v21  ;;  %v680_v21 = vld [vmem:[#allocation2 + $0xe2] sm:$0xff] }
 0x125   : > { %v5804_v53 = vpack.c.bf16 %v680_v21, %v679_v47  ;;  %v609_v31 = vld [vmem:[#allocation2 + $0x241] sm:$0xff]  ;;  %2807 = vmatpush2.bf16.msra.mxu1 %v4898_v26  ;;  %v5842_v21 = vpack.c.bf16 %v514_v38, %v513_v60  ;;  %v858_v26 = vld [vmem:[#allocation2 + $0x49] sm:$0xff]  ;;  %v4900_v60 = vld [vmem:[%s5179_s21 + $0x218] sm:$0xff]  }
 0x126   : > { %2808 = vmatprep.subr.bf16.mxu1 %v5135_v46  ;;  %v651_v34 = vpack.c.bf16 %v610_v32, %v609_v31  ;;  %v789_v47 = vld [vmem:[#allocation2 + $0x188] sm:$0xff]  ;;  %v859_v31 = vld [vmem:[#allocation2 + $0x51] sm:$0xff] }
 0x127   : > { %v837_v51 = vpack.c.bf16 %v789_v47, %v788_v43  ;;  %v699_v47 = vld [vmem:[#allocation2 + $0x1fa] sm:$0xff] }
 0x12b   : > { %2072 = vmatmul.mubr.bf16.gmra.mxu0 %v549_v39  ;;  %2297 = vmatmul.mubr.bf16.gmra.mxu1 %v5797_v40  ;;  %v690_v39 = vld [vmem:[#allocation2 + $0x15a] sm:$0xff] }
 0x12c   : > { %2079 = vmatprep.mubr.bf16.mxu0 %v646_v41  ;;  %2304 = vmatprep.mubr.bf16.mxu1 %v5737_v36  ;;  %v506_v36 = vld [vmem:[#allocation2 + $0x1e8] sm:$0xff]  ;;  %v611_v41 = vld [vmem:[#allocation2 + $0x259] sm:$0xff] }
 0x12d   : > { %v5810_v0 = vpack.c.bf16 %v506_v36, %v505_v55  ;;  %v652_v48 = vpack.c.bf16 %v612_v42, %v611_v41  ;;  %v692_v55 = vld [vmem:[#allocation2 + $0x172] sm:$0xff]  ;;  %v4899_v36 = vld [vmem:[%s5179_s21 + $0x1c0] sm:$0xff]   ;;  %v5890_v41 = vpack.c.bf16 %v859_v31, %v858_v26 }
 0x12e   : > { %2809 = vmatpush2.bf16.msra.mxu1 %v4899_v36  ;;  %v865_v26 = vld [vmem:[#allocation2 + $0x99] sm:$0xff]  ;;  %v4901_v31 = vld [vmem:[%s5179_s21 + $0x210] sm:$0xff]  }
 0x133   : > { %2080 = vmatmul.mubr.bf16.gmra.mxu0 %v5802_v12  ;;  %2305 = vmatmul.mubr.bf16.gmra.mxu1 %v5804_v53 }
 0x134   : > { %2087 = vmatprep.mubr.bf16.mxu0 %v647_v54  ;;  %2312 = vmatprep.mubr.bf16.mxu1 %v5749_v49  ;;  %v683_v49 = vld [vmem:[#allocation2 + $0x10a] sm:$0xff]  ;;  %v516_v54 = vld [vmem:[#allocation2 + $0x260] sm:$0xff] }
 0x135   : > { %v5820_v45 = vpack.c.bf16 %v684_v4, %v683_v49  ;;  %v5849_v56 = vpack.c.bf16 %v516_v54, %v515_v52  ;;  %v4891_v4 = vld [vmem:[%s5179_s21 + $0x230] sm:$0xff]  }
 0x136   : > { %v861_v52 = vld [vmem:[#allocation2 + $0x69] sm:$0xff] }
 0x13b   : > { %2088 = vmatmul.mubr.bf16.gmra.mxu0 %v5810_v0  ;;  %2313 = vmatmul.mubr.bf16.gmra.mxu1 %v5812_v27 }
 0x13c   : > { %2095 = vmatprep.mubr.bf16.mxu0 %v648_v1  ;;  %2320 = vmatprep.mubr.bf16.mxu1 %v5760_v61  ;;  %v510_v61 = vld [vmem:[#allocation2 + $0x218] sm:$0xff] }
 0x13d   : > { %v5826_v20 = vpack.c.bf16 %v510_v61, %v509_v28  ;;  %v854_v1 = vld [vmem:[#allocation2 + $0x19] sm:$0xff] }
 0x13e   : > { %v918_v49 = vpack.c.bf16 %v855_v2, %v854_v1 }
 0x143   : > { %2096 = vmatmul.mubr.bf16.gmra.mxu0 %v5818_v11  ;;  %2321 = vmatmul.mubr.bf16.gmra.mxu1 %v5820_v45 }
 0x144   : > { %2103 = vmatprep.mubr.bf16.mxu0 %v649_v13  ;;  %2328 = vmatprep.mubr.bf16.mxu1 %v5771_v7  ;;  %v687_v7 = vld [vmem:[#allocation2 + $0x13a] sm:$0xff] }
 0x145   : > { %v5836_v33 = vpack.c.bf16 %v688_v25, %v687_v7  ;;  %v857_v13 = vld [vmem:[#allocation2 + $0x39] sm:$0xff]  ;;  %v698_v25 = vld [vmem:[#allocation2 + $0x1ea] sm:$0xff] }
 0x14b   : > { %2104 = vmatmul.mubr.bf16.gmra.mxu0 %v5826_v20  ;;  %2329 = vmatmul.mubr.bf16.gmra.mxu1 %v5828_v23 }
 0x14c   : > { %2111 = vmatprep.mubr.bf16.mxu0 %v650_v59  ;;  %2336 = vmatprep.mubr.bf16.mxu1 %v5781_v17  ;;  %v689_v17 = vld [vmem:[#allocation2 + $0x152] sm:$0xff] }
 0x14d   : > { %v5844_v46 = vpack.c.bf16 %v690_v39, %v689_v17 }
 0x153   : > { %2112 = vmatmul.mubr.bf16.gmra.mxu0 %v5834_v9  ;;  %2337 = vmatmul.mubr.bf16.gmra.mxu1 %v5836_v33 }
 0x154   : > { %2119 = vmatprep.mubr.bf16.mxu0 %v651_v34  ;;  %2344 = vmatprep.mubr.bf16.mxu1 %v5790_v29  ;;  %v691_v29 = vld [vmem:[#allocation2 + $0x16a] sm:$0xff] }
 0x155   : > { %v5851_v57 = vpack.c.bf16 %v692_v55, %v691_v29 }
 0x15b   : > { %2120 = vmatmul.mubr.bf16.gmra.mxu0 %v5842_v21  ;;  %2345 = vmatmul.mubr.bf16.gmra.mxu1 %v5844_v46 }
 0x15c   : > { %2127 = vmatprep.mubr.bf16.mxu0 %v652_v48  ;;  %2352 = vmatprep.mubr.bf16.mxu1 %v837_v51  ;;  %v700_v48 = vld [vmem:[#allocation2 + $0x202] sm:$0xff] }
 0x15d   : > { %v860_v51 = vld [vmem:[#allocation2 + $0x61] sm:$0xff]  ;;  %v5904_v58 = vpack.c.bf16 %v700_v48, %v699_v47 }
 0x15e   : > { %v5906_v63 = vpack.c.bf16 %v861_v52, %v860_v51  ;;  %v705_v52 = vld [vmem:[#allocation2 + $0x242] sm:$0xff] }
 0x163   : > { %2128 = vmatmul.mubr.bf16.gmra.mxu0 %v5849_v56  ;;  %2353 = vmatmul.mubr.bf16.gmra.mxu1 %v5851_v57 }
 0x164   : > { %2360 = vmatprep.mubr.bf16.mxu1 %v5802_v12  ;;  %2521 = vmatprep.mubr.bf16.mxu0 %v5721_v22  ;;  %v696_v12 = vld [vmem:[#allocation2 + $0x1d2] sm:$0xff] }
 0x165   : > { %v856_v22 = vld [vmem:[#allocation2 + $0x31] sm:$0xff]  ;;  %v5870_v19 = vpack.c.bf16 %v696_v12, %v695_v10  ;;  %v863_v10 = vld [vmem:[#allocation2 + $0x81] sm:$0xff] }
 0x166   : > { %v5872_v59 = vpack.c.bf16 %v857_v13, %v856_v22 }
 0x16b   : > { %v5858_v5 = vpop.f32.mrf.mxu0  ;;  %v5860_v6 = vpop.f32.mrf.mxu1  ;;  %2361 = vmatmul.mubr.bf16.gmra.mxu1 %v741_v3  ;;  %2522 = vmatmul.mubr.bf16.vlgmr.msra.gmra.mxu0 %v918_v49  ;;  %v702_v49 = vld [vmem:[#allocation2 + $0x21a] sm:$0xff] }
 0x16c   : > { %8325 = vst [vmem:[#allocation7_spill] sm:$0xff] %v5860_v6  ;;  %4666 = vmatpush3.bf16.msra.mxu0 %v5735_v35  ;;  %2368 = vmatprep.mubr.bf16.mxu1 %v5810_v0 }
 0x16d   : > { %v1947_v28 = vpop.f32.mrf.mxu0  ;;  %v2139_v61 = vpop.f32.mrf.mxu1  ;;  %2529 = vmatprep.mubr.bf16.mxu0 %v5739_v37  ;;  %4667 = vmatprep.subr.bf16.mxu0 %v4891_v4  ;;  %v697_v37 = vld [vmem:[#allocation2 + $0x1e2] sm:$0xff] }
 0x16e   : > { %v5888_v39 = vpack.c.bf16 %v698_v25, %v697_v37  ;;  %v704_v37 = vld [vmem:[#allocation2 + $0x232] sm:$0xff] }
 0x16f   : > { %v5866_v15 = vpop.f32.mrf.mxu0  ;;  %v5868_v16 = vpop.f32.mrf.mxu1  ;;  %v864_v25 = vld [vmem:[#allocation2 + $0x91] sm:$0xff] }
 0x170   : > { %8326 = vst [vmem:[#allocation8_spill] sm:$0xff] %v5868_v16  ;;  %4668 = vmatpush3.bf16.msra.mxu0 %v4891_v4  ;;  %v862_v4 = vld [vmem:[#allocation2 + $0x79] sm:$0xff]  ;;  %v5939_v47 = vpack.c.bf16 %v865_v26, %v864_v25  ;;  %v708_v26 = vld [vmem:[#allocation2 + $0x262] sm:$0xff] }
 0x171   : > { %v1950_v35 = vpop.f32.mrf.mxu0  ;;  %v2142_v0 = vpop.f32.mrf.mxu1  ;;  %4669 = vmatprep.subr.bf16.mxu0 %v4894_v14  ;;  %v707_v25 = vld [vmem:[#allocation2 + $0x25a] sm:$0xff] }
 0x173   : > { %v5875_v24 = vpop.f32.mrf.mxu0  ;;  %v5877_v7 = vpop.f32.mrf.mxu1  ;;  %2369 = vmatmul.mubr.bf16.gmra.mxu1 %v5870_v19  ;;  %2530 = vmatmul.mubr.bf16.gmra.mxu0 %v5872_v59 }
 0x174   : > { %8327 = vst [vmem:[#allocation9_spill] sm:$0xff] %v5877_v7  ;;  %2376 = vmatprep.mubr.bf16.mxu1 %v5818_v11  ;;  %2537 = vmatprep.mubr.bf16.mxu0 %v5751_v50 }
 0x175   : > { %v1955_v32 = vpop.f32.mrf.mxu0  ;;  %v2147_v34 = vpop.f32.mrf.mxu1  ;;  %4670 = vmatpush3.bf16.msra.mxu0 %v4894_v14  ;;  %v5922_v14 = vpack.c.bf16 %v863_v10, %v862_v4  ;;  %v805_v4 = vld [vmem:[#allocation2 + $0x278] sm:$0xff] }
 0x176   : > { %4671 = vmatprep.subr.bf16.mxu0 %v4897_v44 }
 0x177   : > { %v5884_v38 = vpop.f32.mrf.mxu0  ;;  %v5886_v17 = vpop.f32.mrf.mxu1 }
 0x178   : > { %8328 = vst [vmem:[#allocation10_spill] sm:$0xff] %v5886_v17 }
 0x179   : > { %v1958_v42 = vpop.f32.mrf.mxu0  ;;  %v2150_v11 = vpop.f32.mrf.mxu1  ;;  %4672 = vmatpush3.bf16.msra.mxu0 %v4897_v44 }
 0x17a   : > { %4673 = vmatprep.subr.bf16.mxu0 %v4900_v60 }
 0x17b   : > { %v5892_v50 = vpop.f32.mrf.mxu0  ;;  %v5894_v43 = vpop.f32.mrf.mxu1  ;;  %2377 = vmatmul.mubr.bf16.gmra.mxu1 %v5888_v39  ;;  %2538 = vmatmul.mubr.bf16.gmra.mxu0 %v5890_v41 }
 0x17c   : > { %8329 = vst [vmem:[#allocation11_spill] sm:$0xff] %v5894_v43  ;;  %2384 = vmatprep.mubr.bf16.mxu1 %v5826_v20  ;;  %2545 = vmatprep.mubr.bf16.mxu0 %v5762_v62  ;;  %v701_v62 = vld [vmem:[#allocation2 + $0x212] sm:$0xff] }
 0x17d   : > { %v1963_v54 = vpop.f32.mrf.mxu0  ;;  %v2155_v29 = vpop.f32.mrf.mxu1  ;;  %4674 = vmatpush3.bf16.msra.mxu0 %v4900_v60  ;;  %v5920_v61 = vpack.c.bf16 %v702_v49, %v701_v62  ;;  %v804_v49 = vld [vmem:[#allocation2 + $0x270] sm:$0xff] }
 0x17e   : > { %4675 = vmatprep.subr.bf16.mxu0 %v4901_v31  ;;  %v706_v54 = vld [vmem:[#allocation2 + $0x24a] sm:$0xff] }
 0x17f   : > { %v5900_v55 = vpop.f32.mrf.mxu0  ;;  %v5902_v36 = vpop.f32.mrf.mxu1  ;;  %v866_v29 = vld [vmem:[#allocation2 + $0xa9] sm:$0xff] }
 0x180   : > { %8330 = vst [vmem:[#allocation12_spill] sm:$0xff] %v5902_v36 }
 0x181   : > { %v1966_v1 = vpop.f32.mrf.mxu0  ;;  %v2158_v2 = vpop.f32.mrf.mxu1  ;;  %4676 = vmatpush3.bf16.msra.mxu0 %v4901_v31  ;;  %v868_v31 = vld [vmem:[#allocation2 + $0xc1] sm:$0xff] }
 0x182   : > { %v867_v1 = vld [vmem:[#allocation2 + $0xb1] sm:$0xff] }
 0x183   : > { %v5908_v3 = vpop.f32.mrf.mxu0  ;;  %v5910_v20 = vpop.f32.mrf.mxu1  ;;  %2385 = vmatmul.mubr.bf16.gmra.mxu1 %v5904_v58  ;;  %2546 = vmatmul.mubr.bf16.gmra.mxu0 %v5906_v63 }
 0x184   : > { %8331 = vst [vmem:[#allocation13_spill] sm:$0xff] %v5910_v20  ;;  %2392 = vmatprep.mubr.bf16.mxu1 %v5834_v9  ;;  %2553 = vmatprep.mubr.bf16.mxu0 %v5773_v8  ;;  %v703_v8 = vld [vmem:[#allocation2 + $0x22a] sm:$0xff] }
 0x185   : > { %v1971_v12 = vpop.f32.mrf.mxu0  ;;  %v2163_v22 = vpop.f32.mrf.mxu1  ;;  %v5937_v11 = vpack.c.bf16 %v704_v37, %v703_v8 }
 0x186   : > { %v5953_v22 = vpack.c.bf16 %v706_v54, %v705_v52  ;;  %v807_v52 = vld [vmem:[#allocation2 + $0x290] sm:$0xff] }
 0x187   : > { %v5916_v13 = vpop.f32.mrf.mxu0  ;;  %v5918_v28 = vpop.f32.mrf.mxu1 }
 0x188   : > { %8332 = vst [vmem:[#allocation14_spill] sm:$0xff] %v5918_v28 }
 0x189   : > { %v1974_v35 = vpop.f32.mrf.mxu0  ;;  %v2166_v0 = vpop.f32.mrf.mxu1 }
 0x18a   : > { %v5955_v35 = vpack.c.bf16 %v867_v1, %v866_v29  ;;  %v845_v0 = vpack.c.bf16 %v805_v4, %v804_v49  ;;  %v5968_v1 = vpack.c.bf16 %v708_v26, %v707_v25  ;;  %v870_v25 = vld [vmem:[#allocation2 + $0xd9] sm:$0xff]  ;;  %v871_v26 = vld [vmem:[#allocation2 + $0xe1] sm:$0xff] }
 0x18b   : > { %v5924_v44 = vpop.f32.mrf.mxu0  ;;  %v5926_v9 = vpop.f32.mrf.mxu1  ;;  %2393 = vmatmul.mubr.bf16.gmra.mxu1 %v5920_v61  ;;  %2554 = vmatmul.mubr.bf16.gmra.mxu0 %v5922_v14 }
 0x18c   : > { %8333 = vst [vmem:[#allocation15_spill] sm:$0xff] %v5926_v9  ;;  %2400 = vmatprep.mubr.bf16.mxu1 %v5842_v21  ;;  %2561 = vmatprep.mubr.bf16.mxu0 %v5783_v18 }
 0x18d   : > { %v1979_v32 = vpop.f32.mrf.mxu0  ;;  %v2171_v34 = vpop.f32.mrf.mxu1 }
 0x18e   : > { %v869_v32 = vld [vmem:[#allocation2 + $0xc9] sm:$0xff] }
 0x18f   : > { %v5933_v60 = vpop.f32.mrf.mxu0  ;;  %v5935_v42 = vpop.f32.mrf.mxu1 }
 0x190   : > { %8334 = vst [vmem:[#allocation16_spill] sm:$0xff] %v5935_v42 }
 0x191   : > { %v1982_v48 = vpop.f32.mrf.mxu0  ;;  %v2174_v51 = vpop.f32.mrf.mxu1 }
 0x192   : > { %v806_v51 = vld [vmem:[#allocation2 + $0x288] sm:$0xff] }
 0x193   : > { %v5941_v21 = vpop.f32.mrf.mxu0  ;;  %v5943_v18 = vpop.f32.mrf.mxu1  ;;  %2401 = vmatmul.mubr.bf16.gmra.mxu1 %v5937_v11  ;;  %2562 = vmatmul.mubr.bf16.gmra.mxu0 %v5939_v47 }
 0x194   : > { %8335 = vst [vmem:[#allocation17_spill] sm:$0xff] %v5943_v18  ;;  %2408 = vmatprep.mubr.bf16.mxu1 %v5849_v56  ;;  %2569 = vmatprep.mubr.bf16.mxu0 %v5792_v30 }
 0x195   : > { %v1987_v2 = vpop.f32.mrf.mxu0  ;;  %v2179_v62 = vpop.f32.mrf.mxu1 }
 0x196   : > { %v5970_v2 = vpack.c.bf16 %v869_v32, %v868_v31  ;;  %v846_v62 = vpack.c.bf16 %v807_v52, %v806_v51 }
 0x197   : > { %v5949_v10 = vpop.f32.mrf.mxu0  ;;  %v5951_v12 = vpop.f32.mrf.mxu1 }
 0x198   : > { %8336 = vst [vmem:[#allocation18_spill] sm:$0xff] %v5951_v12 }
 0x199   : > { %v1990_v8 = vpop.f32.mrf.mxu0  ;;  %v2182_v56 = vpop.f32.mrf.mxu1 }
 0x19a   : > { %v709_v8 = vld [vmem:[#allocation2 + $0x272] sm:$0xff]  ;;  %v710_v56 = vld [vmem:[#allocation2 + $0x27a] sm:$0xff] }
 0x19b   : > { %v5957_v37 = vpop.f32.mrf.mxu0  ;;  %v5959_v30 = vpop.f32.mrf.mxu1  ;;  %2409 = vmatmul.mubr.bf16.gmra.mxu1 %v5953_v22  ;;  %2570 = vmatmul.mubr.bf16.gmra.mxu0 %v5955_v35 }
 0x19c   : > { %8337 = vst [vmem:[#allocation19_spill] sm:$0xff] %v5959_v30  ;;  %2416 = vmatprep.mubr.bf16.mxu1 %v845_v0  ;;  %2577 = vmatprep.mubr.bf16.mxu0 %v5797_v40 }
 0x19d   : > { %v1995_v34 = vpop.f32.mrf.mxu0  ;;  %v2187_v48 = vpop.f32.mrf.mxu1 }
 0x19e   : > { %v808_v34 = vld [vmem:[#allocation2 + $0x2a0] sm:$0xff]  ;;  %v809_v48 = vld [vmem:[#allocation2 + $0x2a8] sm:$0xff] }
 0x19f   : > { %v5964_v54 = vpop.f32.mrf.mxu0  ;;  %v5966_v29 = vpop.f32.mrf.mxu1 }
 0x1a0   : > { %8338 = vst [vmem:[#allocation20_spill] sm:$0xff] %v5966_v29 }
 0x1a1   : > { %v1998_v49 = vpop.f32.mrf.mxu0  ;;  %v2190_v4 = vpop.f32.mrf.mxu1 }
 0x1a2   : > { %v5983_v49 = vpack.c.bf16 %v710_v56, %v709_v8  ;;  %v5985_v4 = vpack.c.bf16 %v871_v26, %v870_v25  ;;  %v872_v8 = vld [vmem:[#allocation2 + $0xf1] sm:$0xff]  ;;  %v873_v56 = vld [vmem:[#allocation2 + $0xf9] sm:$0xff]  ;;  %v4902_v25 = vld [vmem:[%s5179_s21 + $0x208] sm:$0xff]  }
 0x1a3   : > { %v5972_v0 = vpop.f32.mrf.mxu0  ;;  %v5974_v40 = vpop.f32.mrf.mxu1  ;;  %2417 = vmatmul.mubr.bf16.gmra.mxu1 %v5968_v1  ;;  %2578 = vmatmul.mubr.bf16.gmra.mxu0 %v5970_v2  ;;  %v6000_v42 = vpack.c.bf16 %v873_v56, %v872_v8 }
 0x1a4   : > { %8339 = vst [vmem:[#allocation21_spill] sm:$0xff] %v5974_v40  ;;  %2424 = vmatprep.mubr.bf16.mxu1 %v846_v62  ;;  %2585 = vmatprep.mubr.bf16.mxu0 %v5804_v53  ;;  %v847_v40 = vpack.c.bf16 %v809_v48, %v808_v34  ;;  %v810_v34 = vld [vmem:[#allocation2 + $0x2b8] sm:$0xff]  ;;  %v811_v48 = vld [vmem:[#allocation2 + $0x2c0] sm:$0xff] }
 0x1a5   : > { %v2003_v31 = vpop.f32.mrf.mxu0  ;;  %v2195_v32 = vpop.f32.mrf.mxu1  ;;  %4677 = vmatprep.subr.bf16.mxu0 %v4902_v25 }
 0x1a6   : > { %v711_v31 = vld [vmem:[#allocation2 + $0x28a] sm:$0xff]  ;;  %v712_v32 = vld [vmem:[#allocation2 + $0x292] sm:$0xff]  ;;  %4678 = vmatpush3.bf16.msra.mxu0 %v4902_v25 }
 0x1a7   : > { %v5979_v51 = vpop.f32.mrf.mxu0  ;;  %v5981_v52 = vpop.f32.mrf.mxu1  ;;  %v5998_v18 = vpack.c.bf16 %v712_v32, %v711_v31  ;;  %v714_v32 = vld [vmem:[#allocation2 + $0x2aa] sm:$0xff] }
 0x1a8   : > { %8340 = vst [vmem:[#allocation22_spill] sm:$0xff] %v5981_v52  ;;  %v812_v25 = vld [vmem:[#allocation2 + $0x2d0] sm:$0xff] }
 0x1a9   : > { %v2006_v62 = vpop.f32.mrf.mxu0  ;;  %v2198_v29 = vpop.f32.mrf.mxu1 }
 0x1ab   : > { %v5987_v53 = vpop.f32.mrf.mxu0  ;;  %v2234_v30 = vpop.f32.mrf.mxu1  ;;  %2425 = vmatmul.mubr.bf16.gmra.mxu1 %v5983_v49  ;;  %2586 = vmatmul.mubr.bf16.gmra.mxu0 %v5985_v4 }
 0x1ac   : > { %v5992_v12 = vadd.f32 %v2234_v30, %v5858_v5  ;;  %2432 = vmatprep.mubr.bf16.mxu1 %v847_v40  ;;  %2593 = vmatprep.mubr.bf16.mxu0 %v5812_v27  ;;  %v848_v27 = vpack.c.bf16 %v811_v48, %v810_v34  ;;  %v813_v34 = vld [vmem:[#allocation2 + $0x2d8] sm:$0xff] }
 0x1ad   : > { %v2011_v26 = vpop.f32.mrf.mxu0  ;;  %v2236_v29 = vpop.f32.mrf.mxu1 }
 0x1ae   : > { %v713_v29 = vld [vmem:[#allocation2 + $0x2a2] sm:$0xff] }
 0x1af   : > { %v5996_v62 = vpop.f32.mrf.mxu0  ;;  %v2237_v52 = vpop.f32.mrf.mxu1 }
 0x1b0   : > { %v6003_v5 = vadd.f32 %v2237_v52, %v5866_v15  ;;  %v874_v15 = vld [vmem:[#allocation2 + $0x109] sm:$0xff]  ;;  %v875_v52 = vld [vmem:[#allocation2 + $0x111] sm:$0xff] }
 0x1b1   : > { %v2014_v30 = vpop.f32.mrf.mxu0  ;;  %v2239_v40 = vpop.f32.mrf.mxu1  ;;  %v6017_v28 = vpack.c.bf16 %v875_v52, %v874_v15 }
 0x1b2   : > { %v6015_v40 = vpack.c.bf16 %v714_v32, %v713_v29  ;;  %v716_v29 = vld [vmem:[#allocation2 + $0x2c2] sm:$0xff] }
 0x1b3   : > { %v6005_v9 = vpop.f32.mrf.mxu0  ;;  %v2242_v26 = vpop.f32.mrf.mxu1  ;;  %2433 = vmatmul.mubr.bf16.gmra.mxu1 %v5998_v18  ;;  %2594 = vmatmul.mubr.bf16.gmra.mxu0 %v6000_v42  ;;  %v877_v32 = vld [vmem:[#allocation2 + $0x129] sm:$0xff] }
 0x1b4   : > { %v6010_v31 = vadd.f32 %v2242_v26, %v5875_v24  ;;  %2440 = vmatprep.mubr.bf16.mxu1 %v848_v27  ;;  %2601 = vmatprep.mubr.bf16.mxu0 %v5820_v45  ;;  %v849_v27 = vpack.c.bf16 %v813_v34, %v812_v25  ;;  %v814_v25 = vld [vmem:[#allocation2 + $0x2e8] sm:$0xff]  ;;  %v815_v34 = vld [vmem:[#allocation2 + $0x2f0] sm:$0xff] }
 0x1b5   : > { %v2019_v8 = vpop.f32.mrf.mxu0  ;;  %v2244_v56 = vpop.f32.mrf.mxu1 }
 0x1b6   : > { %v715_v8 = vld [vmem:[#allocation2 + $0x2ba] sm:$0xff] }
 0x1b7   : > { %v6013_v48 = vpop.f32.mrf.mxu0  ;;  %v2245_v30 = vpop.f32.mrf.mxu1 }
 0x1b8   : > { %v6020_v24 = vadd.f32 %v2245_v30, %v5884_v38  ;;  %v876_v38 = vld [vmem:[#allocation2 + $0x121] sm:$0xff] }
 0x1b9   : > { %v2022_v26 = vpop.f32.mrf.mxu0  ;;  %v2247_v45 = vpop.f32.mrf.mxu1  ;;  %v6034_v43 = vpack.c.bf16 %v877_v32, %v876_v38 }
 0x1ba   : > { %v6032_v45 = vpack.c.bf16 %v716_v29, %v715_v8  ;;  %v718_v8 = vld [vmem:[#allocation2 + $0x2da] sm:$0xff] }
 0x1bb   : > { %v6022_v20 = vpop.f32.mrf.mxu0  ;;  %v2250_v36 = vpop.f32.mrf.mxu1  ;;  %2441 = vmatmul.mubr.bf16.gmra.mxu1 %v6015_v40  ;;  %2602 = vmatmul.mubr.bf16.gmra.mxu0 %v6017_v28  ;;  %v879_v29 = vld [vmem:[#allocation2 + $0x141] sm:$0xff] }
 0x1bc   : > { %v6027_v56 = vadd.f32 %v2250_v36, %v5892_v50  ;;  %2448 = vmatprep.mubr.bf16.mxu1 %v849_v27  ;;  %2609 = vmatprep.mubr.bf16.mxu0 %v5828_v23  ;;  %v850_v36 = vpack.c.bf16 %v815_v34, %v814_v25  ;;  %v816_v25 = vld [vmem:[#allocation2 + $0x300] sm:$0xff]  ;;  %v817_v34 = vld [vmem:[#allocation2 + $0x308] sm:$0xff] }
 0x1bd   : > { %v2027_v15 = vpop.f32.mrf.mxu0  ;;  %v2252_v52 = vpop.f32.mrf.mxu1 }
 0x1be   : > { %v717_v15 = vld [vmem:[#allocation2 + $0x2d2] sm:$0xff] }
 0x1bf   : > { %v6030_v30 = vpop.f32.mrf.mxu0  ;;  %v2253_v26 = vpop.f32.mrf.mxu1 }
 0x1c0   : > { %v6037_v50 = vadd.f32 %v2253_v26, %v5900_v55  ;;  %v878_v55 = vld [vmem:[#allocation2 + $0x139] sm:$0xff] }
 0x1c1   : > { %v2030_v27 = vpop.f32.mrf.mxu0  ;;  %v2255_v23 = vpop.f32.mrf.mxu1  ;;  %v6051_v16 = vpack.c.bf16 %v879_v29, %v878_v55  ;;  %v4903_v55 = vld [vmem:[%s5179_s21 + $0x200] sm:$0xff]   ;;  %s3422_s21 = ssub.s32 0, %s5170_s16 }
 0x1c2   : > { %8341 = vst [vmem:[#allocation23_spill] sm:$0xff] %v6037_v50  ;;  %v6049_v23 = vpack.c.bf16 %v718_v8, %v717_v15  ;;  %v881_v8 = vld [vmem:[#allocation2 + $0x159] sm:$0xff]  ;;  %4679 = vmatprep.subr.bf16.mxu0 %v4903_v55  ;;  %s4596_s5 = smin.u32 %s5170_s16, %s3422_s21 }
 0x1c3   : > { %v6039_v17 = vpop.f32.mrf.mxu0  ;;  %v2258_v7 = vpop.f32.mrf.mxu1  ;;  %2449 = vmatmul.mubr.bf16.gmra.mxu1 %v6032_v45  ;;  %2610 = vmatmul.mubr.bf16.gmra.mxu0 %v6034_v43  ;;  %8343 = vst [vmem:[#allocation25_spill] sm:$0xff] %v6051_v16  ;;  %s3424_s6 = sand.u32 1, %s4596_s5  }
 0x1c4   : > { %v6044_v52 = vadd.f32 %v2258_v7, %v5908_v3  ;;  %2456 = vmatprep.mubr.bf16.mxu1 %v850_v36  ;;  %2617 = vmatprep.mubr.bf16.mxu0 %v5836_v33  ;;  %v851_v3 = vpack.c.bf16 %v817_v34, %v816_v25  ;;  %v818_v34 = vld [vmem:[#allocation2 + $0x318] sm:$0xff]  ;;  %s3425_s7 = ssub.s32 0, %s3424_s6 }
 0x1c5   : > { %v2035_v38 = vpop.f32.mrf.mxu0  ;;  %v2260_v32 = vpop.f32.mrf.mxu1  ;;  %4680 = vmatpush3.bf16.msra.mxu0 %v4903_v55  ;;  %s8792_s7 = smov (!%p3421_p5, %s3425_s7), %s3424_s6 }
 0x1c6   : > { %8342 = vst [vmem:[#allocation24_spill] sm:$0xff] %v6044_v52  ;;  %v719_v32 = vld [vmem:[#allocation2 + $0x2ea] sm:$0xff]  ;;  %v720_v52 = vld [vmem:[#allocation2 + $0x2f2] sm:$0xff]  ;;  %p4598_p6 = scmp.lt.s32.totalorder %s8792_s7, 0  ;;  %s3431_s8 = sadd.s32 2, %s8792_s7 }
 0x1c7   : > { %v6047_v26 = vpop.f32.mrf.mxu0  ;;  %v2261_v27 = vpop.f32.mrf.mxu1 }
 0x1c8   : > { %v6054_v7 = vadd.f32 %v2261_v27, %v5916_v13  ;;  %v880_v13 = vld [vmem:[#allocation2 + $0x151] sm:$0xff]  ;;  %v819_v27 = vld [vmem:[#allocation2 + $0x320] sm:$0xff]  ;;  %s8794_s8 = smov (!%p4598_p6, %s3431_s8), %s8792_s7 }
 0x1c9   : > { %v2038_v33 = vpop.f32.mrf.mxu0  ;;  %v2263_v36 = vpop.f32.mrf.mxu1  ;;  %v6069_v50 = vpack.c.bf16 %v881_v8, %v880_v13  ;;  %v820_v13 = vld [vmem:[#allocation2 + $0x330] sm:$0xff]  ;;  %p3433_p8 = scmp.eq.s32.totalorder %s8794_s8, 0 }
 0x1ca   : > { %8344 = vst [vmem:[#allocation26_spill] sm:$0xff] %v6054_v7  ;;  %v6067_v7 = vpack.c.bf16 %v720_v52, %v719_v32  ;;  %v883_v32 = vld [vmem:[#allocation2 + $0x171] sm:$0xff] }
 0x1cb   : > { %v6056_v6 = vpop.f32.mrf.mxu0  ;;  %v2266_v38 = vpop.f32.mrf.mxu1  ;;  %2457 = vmatmul.mubr.bf16.gmra.mxu1 %v6049_v23  ;;  %2618 = vmatmul.mubr.bf16.gmra.mxu0 %v6051_v16  ;;  %8347 = vst [vmem:[#allocation29_spill] sm:$0xff] %v6069_v50  ;;  %v722_v16 = vld [vmem:[#allocation2 + $0x30a] sm:$0xff]  ;;  %p6466_p9 = pnand %p3433_p8, %p3420_p7 }
 0x1cc   : > { %v6061_v15 = vadd.f32 %v2266_v38, %v5924_v44  ;;  %2464 = vmatprep.mubr.bf16.mxu1 %v851_v3  ;;  %2625 = vmatprep.mubr.bf16.mxu0 %v5844_v46  ;;  %8346 = vst [vmem:[#allocation28_spill] sm:$0xff] %v6067_v7  ;;  %v852_v46 = vpack.c.bf16 %v819_v27, %v818_v34  ;;  %v821_v34 = vld [vmem:[#allocation2 + $0x338] sm:$0xff]  ;;  %v980_v27 = vld [vmem:[#allocation2 + $0x182] sm:$0xff] }
 0x1cd   : > { %v2043_v29 = vpop.f32.mrf.mxu0  ;;  %v2268_v25 = vpop.f32.mrf.mxu1  ;;  %s4599_s10 = scalar_select %p6466_p9, 0, 1 }
 0x1ce   : > { %8345 = vst [vmem:[#allocation27_spill] sm:$0xff] %v6061_v15  ;;  %v721_v25 = vld [vmem:[#allocation2 + $0x302] sm:$0xff] }
 0x1cf   : > { %v6065_v33 = vpop.f32.mrf.mxu0  ;;  %v2269_v36 = vpop.f32.mrf.mxu1  ;;  %p4904_p10 = scmp.eq.s32.totalorder %s4599_s10, 1 }
 0x1d0   : > { %v6072_v44 = vadd.f32 %v2269_v36, %v5933_v60  ;;  %v882_v60 = vld [vmem:[#allocation2 + $0x169] sm:$0xff] }
 0x1d1   : > { %v2046_v3 = vpop.f32.mrf.mxu0  ;;  %v2271_v38 = vpop.f32.mrf.mxu1  ;;  %v981_v36 = vld [vmem:[#allocation2 + $0x18a] sm:$0xff]  ;;  %s6690_s11 = scalar_select %p4904_p10, 255, 0 }
 0x1d2   : > { %8348 = vst [vmem:[#allocation30_spill] sm:$0xff] %v6072_v44  ;;  %v6084_v44 = vpack.c.bf16 %v722_v16, %v721_v25  ;;  %v724_v25 = vld [vmem:[#allocation2 + $0x322] sm:$0xff] }
 0x1d3   : > { %v6074_v15 = vpop.f32.mrf.mxu0  ;;  %v2274_v29 = vpop.f32.mrf.mxu1  ;;  %2465 = vmatmul.mubr.bf16.gmra.mxu1 %v6067_v7  ;;  %2626 = vmatmul.mubr.bf16.gmra.mxu0 %v6069_v50  ;;  %v6086_v50 = vpack.c.bf16 %v883_v32, %v882_v60  ;;  %v885_v60 = vld [vmem:[#allocation2 + $0x189] sm:$0xff] }
 0x1d4   : > { %v6079_v52 = vadd.f32 %v2274_v29, %v5941_v21  ;;  %2472 = vmatprep.mubr.bf16.mxu1 %v852_v46  ;;  %2633 = vmatprep.mubr.bf16.mxu0 %v5851_v57  ;;  %v853_v46 = vpack.c.bf16 %v821_v34, %v820_v13  ;;  %v1029_v57 = vpack.c.bf16 %v981_v36, %v980_v27 }
 0x1d5   : > { %v2051_v8 = vpop.f32.mrf.mxu0  ;;  %v2276_v55 = vpop.f32.mrf.mxu1 }
 0x1d6   : > { %8349 = vst [vmem:[#allocation31_spill] sm:$0xff] %v6079_v52  ;;  %v723_v55 = vld [vmem:[#allocation2 + $0x31a] sm:$0xff] }
 0x1d7   : > { %v6082_v3 = vpop.f32.mrf.mxu0  ;;  %v2277_v38 = vpop.f32.mrf.mxu1  ;;  %v6100_v27 = vpack.c.bf16 %v724_v25, %v723_v55  ;;  %v887_v55 = vld [vmem:[#allocation2 + $0x1d1] sm:$0xff] }
 0x1d8   : > { %v6089_v21 = vadd.f32 %v2277_v38, %v5949_v10  ;;  %v884_v10 = vld [vmem:[#allocation2 + $0x181] sm:$0xff]  ;;  %v1048_v25 = vld [vmem:[#allocation2 + $0x38] sm:$0xff] }
 0x1d9   : > { %v2054_v29 = vpop.f32.mrf.mxu0  ;;  %v2279_v52 = vpop.f32.mrf.mxu1  ;;  %v6102_v36 = vpack.c.bf16 %v885_v60, %v884_v10 }
 0x1db   : > { %v6091_v7 = vpop.f32.mrf.mxu0  ;;  %v2282_v8 = vpop.f32.mrf.mxu1  ;;  %2473 = vmatmul.mubr.bf16.gmra.mxu1 %v6084_v44  ;;  %2634 = vmatmul.mubr.bf16.gmra.mxu0 %v6086_v50 }
 0x1dc   : > { %v6096_v16 = vadd.f32 %v2282_v8, %v5957_v37  ;;  %2480 = vmatprep.mubr.bf16.mxu1 %v853_v46  ;;  %2641 = vmatprep.mubr.bf16.mxu0 %v1029_v57  ;;  %v886_v57 = vld [vmem:[#allocation2 + $0x1c9] sm:$0xff] }
 0x1dd   : > { %v2059_v32 = vpop.f32.mrf.mxu0  ;;  %v2284_v13 = vpop.f32.mrf.mxu1 }
 0x1de   : > { %8350 = vst [vmem:[#allocation32_spill] sm:$0xff] %v6096_v16 }
 0x1df   : > { %v6098_v34 = vpop.f32.mrf.mxu0  ;;  %v2285_v52 = vpop.f32.mrf.mxu1 }
 0x1e0   : > { %v6105_v38 = vadd.f32 %v2285_v52, %v5964_v54  ;;  %v1047_v54 = vld [vmem:[#allocation2 + $0x30] sm:$0xff] }
 0x1e1   : > { %v2062_v29 = vpop.f32.mrf.mxu0  ;;  %v2287_v37 = vpop.f32.mrf.mxu1 }
 0x1e2   : > { %8351 = vst [vmem:[#allocation33_spill] sm:$0xff] %v6105_v38  ;;  %v934_v29 = vpack.c.bf16 %v887_v55, %v886_v57  ;;  %v1111_v37 = vpack.c.bf16 %v1048_v25, %v1047_v54  ;;  %v889_v57 = vld [vmem:[#allocation2 + $0x1e9] sm:$0xff] }
 0x1e3   : > { %v6107_v8 = vpop.f32.mrf.mxu0  ;;  %v2290_v46 = vpop.f32.mrf.mxu1  ;;  %2481 = vmatmul.mubr.bf16.gmra.mxu1 %v6100_v27  ;;  %2642 = vmatmul.mubr.bf16.gmra.mxu0 %v6102_v36  ;;  %v1049_v55 = vld [vmem:[#allocation2 + $0x48] sm:$0xff]  ;;  %v1050_v54 = vld [vmem:[#allocation2 + $0x50] sm:$0xff] }
 0x1e4   : > { %v6112_v32 = vadd.f32 %v2290_v46, %v5972_v0  ;;  %2649 = vmatprep.mubr.bf16.mxu0 %v5870_v19  ;;  %2810 = vmatprep.mubr.bf16.mxu1 %v5872_v59  ;;  %v888_v59 = vld [vmem:[#allocation2 + $0x1e1] sm:$0xff] }
 0x1e5   : > { %v2067_v10 = vpop.f32.mrf.mxu0  ;;  %v2292_v60 = vpop.f32.mrf.mxu1 }
 0x1e6   : > { %8352 = vst [vmem:[#allocation34_spill] sm:$0xff] %v6112_v32  ;;  %v6130_v60 = vpack.c.bf16 %v889_v57, %v888_v59  ;;  %v891_v59 = vld [vmem:[#allocation2 + $0x201] sm:$0xff] }
 0x1e7   : > { %v6116_v13 = vpop.f32.mrf.mxu0  ;;  %v2293_v52 = vpop.f32.mrf.mxu1  ;;  %v1051_v57 = vld [vmem:[#allocation2 + $0x60] sm:$0xff] }
 0x1e8   : > { %v6119_v38 = vadd.f32 %v2293_v52, %v5979_v51  ;;  %v1112_v52 = vpack.c.bf16 %v1050_v54, %v1049_v55 }
 0x1e9   : > { %v2070_v16 = vpop.f32.mrf.mxu0  ;;  %v2295_v0 = vpop.f32.mrf.mxu1 }
 0x1eb   : > { %v6121_v46 = vpop.f32.mrf.mxu0  ;;  %v2298_v19 = vpop.f32.mrf.mxu1  ;;  %2650 = vmatmul.mubr.bf16.gmra.mxu0 %v934_v29  ;;  %2811 = vmatmul.mubr.bf16.vlgmr.msra.gmra.mxu1 %v1111_v37 }
 0x1ec   : > { %v6124_v32 = vadd.f32 %v2298_v19, %v5987_v53  ;;  %2657 = vmatprep.mubr.bf16.mxu0 %v5888_v39  ;;  %2818 = vmatprep.mubr.bf16.mxu1 %v5890_v41  ;;  %v890_v41 = vld [vmem:[#allocation2 + $0x1f9] sm:$0xff] }
 0x1ed   : > { %v2075_v51 = vpop.f32.mrf.mxu0  ;;  %v2300_v25 = vpop.f32.mrf.mxu1 }
 0x1ef   : > { %v6128_v16 = vpop.f32.mrf.mxu0  ;;  %v2301_v10 = vpop.f32.mrf.mxu1 }
 0x1f0   : > { %v6133_v29 = vadd.f32 %v2301_v10, %v5996_v62  ;;  %v1052_v62 = vld [vmem:[#allocation2 + $0x68] sm:$0xff]  ;;  %v6145_v10 = vpack.c.bf16 %v891_v59, %v890_v41  ;;  %v893_v41 = vld [vmem:[#allocation2 + $0x219] sm:$0xff] }
 0x1f1   : > { %v2078_v53 = vpop.f32.mrf.mxu0  ;;  %v2303_v37 = vpop.f32.mrf.mxu1  ;;  %v1053_v59 = vld [vmem:[#allocation2 + $0x78] sm:$0xff] }
 0x1f2   : > { %v1113_v53 = vpack.c.bf16 %v1052_v62, %v1051_v57 }
 0x1f3   : > { %v6135_v0 = vpop.f32.mrf.mxu0  ;;  %v2306_v39 = vpop.f32.mrf.mxu1  ;;  %2658 = vmatmul.mubr.bf16.gmra.mxu0 %v6130_v60  ;;  %2819 = vmatmul.mubr.bf16.gmra.mxu1 %v1112_v52 }
 0x1f4   : > { %v6139_v19 = vadd.f32 %v2306_v39, %v6005_v9  ;;  %2665 = vmatprep.mubr.bf16.mxu0 %v5904_v58  ;;  %2826 = vmatprep.mubr.bf16.mxu1 %v5906_v63  ;;  %v892_v63 = vld [vmem:[#allocation2 + $0x211] sm:$0xff] }
 0x1f5   : > { %v2083_v55 = vpop.f32.mrf.mxu0  ;;  %v2308_v54 = vpop.f32.mrf.mxu1 }
 0x1f7   : > { %v6143_v51 = vpop.f32.mrf.mxu0  ;;  %v2309_v25 = vpop.f32.mrf.mxu1 }
 0x1f8   : > { %v6148_v52 = vadd.f32 %v2309_v25, %v6013_v48  ;;  %v1054_v48 = vld [vmem:[#allocation2 + $0x80] sm:$0xff] }
 0x1f9   : > { %v2086_v9 = vpop.f32.mrf.mxu0  ;;  %v2311_v37 = vpop.f32.mrf.mxu1 }
 0x1fa   : > { %v6160_v9 = vpack.c.bf16 %v893_v41, %v892_v63  ;;  %v1114_v37 = vpack.c.bf16 %v1054_v48, %v1053_v59  ;;  %v895_v63 = vld [vmem:[#allocation2 + $0x231] sm:$0xff] }
 0x1fb   : > { %v6150_v39 = vpop.f32.mrf.mxu0  ;;  %v2314_v58 = vpop.f32.mrf.mxu1  ;;  %2666 = vmatmul.mubr.bf16.gmra.mxu0 %v6145_v10  ;;  %2827 = vmatmul.mubr.bf16.gmra.mxu1 %v1113_v53  ;;  %v1055_v41 = vld [vmem:[#allocation2 + $0x90] sm:$0xff] }
 0x1fc   : > { %v6154_v55 = vadd.f32 %v2314_v58, %v6022_v20  ;;  %2673 = vmatprep.mubr.bf16.mxu0 %v5920_v61  ;;  %2834 = vmatprep.mubr.bf16.mxu1 %v5922_v14  ;;  %v894_v14 = vld [vmem:[#allocation2 + $0x229] sm:$0xff] }
 0x1fd   : > { %v2091_v57 = vpop.f32.mrf.mxu0  ;;  %v2316_v62 = vpop.f32.mrf.mxu1 }
 0x1fe   : > { %8353 = vst [vmem:[#allocation35_spill] sm:$0xff] %v6154_v55 }
 0x1ff   : > { %v6158_v54 = vpop.f32.mrf.mxu0  ;;  %v2317_v25 = vpop.f32.mrf.mxu1 }
 0x200   : > { %v6163_v53 = vadd.f32 %v2317_v25, %v6030_v30  ;;  %v1056_v30 = vld [vmem:[#allocation2 + $0x98] sm:$0xff] }
 0x201   : > { %v2094_v20 = vpop.f32.mrf.mxu0  ;;  %v2319_v58 = vpop.f32.mrf.mxu1 }
 0x202   : > { %v6175_v20 = vpack.c.bf16 %v895_v63, %v894_v14  ;;  %v1115_v58 = vpack.c.bf16 %v1056_v30, %v1055_v41  ;;  %v897_v14 = vld [vmem:[#allocation2 + $0x249] sm:$0xff] }
 0x203   : > { %v6165_v55 = vpop.f32.mrf.mxu0  ;;  %v2322_v61 = vpop.f32.mrf.mxu1  ;;  %2674 = vmatmul.mubr.bf16.gmra.mxu0 %v6160_v9  ;;  %2835 = vmatmul.mubr.bf16.gmra.mxu1 %v1114_v37  ;;  %v1057_v63 = vld [vmem:[#allocation2 + $0xa8] sm:$0xff] }
 0x204   : > { %v6169_v57 = vadd.f32 %v2322_v61, %v6039_v17  ;;  %2681 = vmatprep.mubr.bf16.mxu0 %v5937_v11  ;;  %2842 = vmatprep.mubr.bf16.mxu1 %v5939_v47  ;;  %v896_v47 = vld [vmem:[#allocation2 + $0x241] sm:$0xff] }
 0x205   : > { %v2099_v59 = vpop.f32.mrf.mxu0  ;;  %v2324_v48 = vpop.f32.mrf.mxu1 }
 0x206   : > { %8354 = vst [vmem:[#allocation36_spill] sm:$0xff] %v6169_v57 }
 0x207   : > { %v6173_v62 = vpop.f32.mrf.mxu0  ;;  %v2325_v25 = vpop.f32.mrf.mxu1 }
 0x208   : > { %v6178_v37 = vadd.f32 %v2325_v25, %v6047_v26  ;;  %v1058_v26 = vld [vmem:[#allocation2 + $0xb0] sm:$0xff] }
 0x209   : > { %v2102_v17 = vpop.f32.mrf.mxu0  ;;  %v2327_v61 = vpop.f32.mrf.mxu1 }
 0x20a   : > { %v6190_v17 = vpack.c.bf16 %v897_v14, %v896_v47  ;;  %v1116_v61 = vpack.c.bf16 %v1058_v26, %v1057_v63  ;;  %v899_v47 = vld [vmem:[#allocation2 + $0x261] sm:$0xff] }
 0x20b   : > { %v6180_v57 = vpop.f32.mrf.mxu0  ;;  %v2330_v11 = vpop.f32.mrf.mxu1  ;;  %2682 = vmatmul.mubr.bf16.gmra.mxu0 %v6175_v20  ;;  %2843 = vmatmul.mubr.bf16.gmra.mxu1 %v1115_v58  ;;  %v1059_v14 = vld [vmem:[#allocation2 + $0xc0] sm:$0xff] }
 0x20c   : > { %v6184_v59 = vadd.f32 %v2330_v11, %v6056_v6  ;;  %2689 = vmatprep.mubr.bf16.mxu0 %v5953_v22  ;;  %2850 = vmatprep.mubr.bf16.mxu1 %v5955_v35  ;;  %v898_v35 = vld [vmem:[#allocation2 + $0x259] sm:$0xff] }
 0x20d   : > { %v2107_v41 = vpop.f32.mrf.mxu0  ;;  %v2332_v30 = vpop.f32.mrf.mxu1 }
 0x20e   : > { %8355 = vst [vmem:[#allocation37_spill] sm:$0xff] %v6184_v59 }
 0x20f   : > { %v6188_v48 = vpop.f32.mrf.mxu0  ;;  %v2333_v25 = vpop.f32.mrf.mxu1 }
 0x210   : > { %v6193_v58 = vadd.f32 %v2333_v25, %v6065_v33  ;;  %v1060_v33 = vld [vmem:[#allocation2 + $0xc8] sm:$0xff] }
 0x211   : > { %v2110_v6 = vpop.f32.mrf.mxu0  ;;  %v2335_v11 = vpop.f32.mrf.mxu1 }
 0x212   : > { %v6205_v6 = vpack.c.bf16 %v899_v47, %v898_v35  ;;  %v1117_v11 = vpack.c.bf16 %v1060_v33, %v1059_v14  ;;  %v901_v35 = vld [vmem:[#allocation2 + $0x279] sm:$0xff] }
 0x213   : > { %v6195_v59 = vpop.f32.mrf.mxu0  ;;  %v2338_v22 = vpop.f32.mrf.mxu1  ;;  %2690 = vmatmul.mubr.bf16.gmra.mxu0 %v6190_v17  ;;  %2851 = vmatmul.mubr.bf16.gmra.mxu1 %v1116_v61  ;;  %v1061_v47 = vld [vmem:[#allocation2 + $0xd8] sm:$0xff] }
 0x214   : > { %v6199_v41 = vadd.f32 %v2338_v22, %v6074_v15  ;;  %2697 = vmatprep.mubr.bf16.mxu0 %v5968_v1  ;;  %2858 = vmatprep.mubr.bf16.mxu1 %v5970_v2  ;;  %v900_v2 = vld [vmem:[#allocation2 + $0x271] sm:$0xff] }
 0x215   : > { %v2115_v63 = vpop.f32.mrf.mxu0  ;;  %v2340_v26 = vpop.f32.mrf.mxu1 }
 0x216   : > { %8356 = vst [vmem:[#allocation38_spill] sm:$0xff] %v6199_v41 }
 0x217   : > { %v6203_v30 = vpop.f32.mrf.mxu0  ;;  %v2341_v25 = vpop.f32.mrf.mxu1 }
 0x218   : > { %v6208_v61 = vadd.f32 %v2341_v25, %v6082_v3  ;;  %v1062_v3 = vld [vmem:[#allocation2 + $0xe0] sm:$0xff] }
 0x219   : > { %v2118_v15 = vpop.f32.mrf.mxu0  ;;  %v2343_v22 = vpop.f32.mrf.mxu1 }
 0x21a   : > { %v6220_v15 = vpack.c.bf16 %v901_v35, %v900_v2  ;;  %v1118_v22 = vpack.c.bf16 %v1062_v3, %v1061_v47  ;;  %v903_v2 = vld [vmem:[#allocation2 + $0x291] sm:$0xff] }
 0x21b   : > { %v6210_v41 = vpop.f32.mrf.mxu0  ;;  %v2346_v1 = vpop.f32.mrf.mxu1  ;;  %2698 = vmatmul.mubr.bf16.gmra.mxu0 %v6205_v6  ;;  %2859 = vmatmul.mubr.bf16.gmra.mxu1 %v1117_v11  ;;  %v1063_v35 = vld [vmem:[#allocation2 + $0xf0] sm:$0xff] }
 0x21c   : > { %v6214_v63 = vadd.f32 %v2346_v1, %v6091_v7  ;;  %2705 = vmatprep.mubr.bf16.mxu0 %v5983_v49  ;;  %2866 = vmatprep.mubr.bf16.mxu1 %v5985_v4  ;;  %v902_v4 = vld [vmem:[#allocation2 + $0x289] sm:$0xff] }
 0x21d   : > { %v2123_v14 = vpop.f32.mrf.mxu0  ;;  %v2348_v33 = vpop.f32.mrf.mxu1 }
 0x21e   : > { %8357 = vst [vmem:[#allocation39_spill] sm:$0xff] %v6214_v63 }
 0x21f   : > { %v6218_v26 = vpop.f32.mrf.mxu0  ;;  %v2349_v25 = vpop.f32.mrf.mxu1 }
 0x220   : > { %v6223_v11 = vadd.f32 %v2349_v25, %v6098_v34  ;;  %v1064_v34 = vld [vmem:[#allocation2 + $0xf8] sm:$0xff] }
 0x221   : > { %v2126_v7 = vpop.f32.mrf.mxu0  ;;  %v2351_v1 = vpop.f32.mrf.mxu1 }
 0x222   : > { %v6235_v7 = vpack.c.bf16 %v903_v2, %v902_v4  ;;  %v1119_v1 = vpack.c.bf16 %v1064_v34, %v1063_v35  ;;  %v1065_v4 = vld [vmem:[#allocation2 + $0x108] sm:$0xff]  ;;  %v1066_v2 = vld [vmem:[#allocation2 + $0x110] sm:$0xff] }
 0x223   : > { %v6225_v63 = vpop.f32.mrf.mxu0  ;;  %v2354_v49 = vpop.f32.mrf.mxu1  ;;  %2706 = vmatmul.mubr.bf16.gmra.mxu0 %v6220_v15  ;;  %2867 = vmatmul.mubr.bf16.gmra.mxu1 %v1118_v22 }
 0x224   : > { %v6229_v14 = vadd.f32 %v2354_v49, %v6107_v8  ;;  %2713 = vmatprep.mubr.bf16.mxu0 %v5998_v18  ;;  %2874 = vmatprep.mubr.bf16.mxu1 %v6000_v42  ;;  %v904_v42 = vld [vmem:[#allocation2 + $0x2a1] sm:$0xff] }
 0x225   : > { %v2131_v47 = vpop.f32.mrf.mxu0  ;;  %v2356_v3 = vpop.f32.mrf.mxu1 }
 0x226   : > { %8358 = vst [vmem:[#allocation40_spill] sm:$0xff] %v6229_v14 }
 0x227   : > { %v6233_v33 = vpop.f32.mrf.mxu0  ;;  %v2357_v25 = vpop.f32.mrf.mxu1 }
 0x228   : > { %v6238_v22 = vadd.f32 %v2357_v25, %v6116_v13  ;;  %v905_v13 = vld [vmem:[#allocation2 + $0x2a9] sm:$0xff] }
 0x229   : > { %v2134_v8 = vpop.f32.mrf.mxu0  ;;  %v2359_v49 = vpop.f32.mrf.mxu1 }
 0x22a   : > { %v6249_v49 = vpack.c.bf16 %v905_v13, %v904_v42  ;;  %v1068_v13 = vld [vmem:[#allocation2 + $0x128] sm:$0xff] }
 0x22b   : > { %v2362_v14 = vpop.f32.mrf.mxu1  ;;  %v2523_v18 = vpop.f32.mrf.mxu0  ;;  %2714 = vmatmul.mubr.bf16.gmra.mxu0 %v6235_v7  ;;  %2875 = vmatmul.mubr.bf16.gmra.mxu1 %v1119_v1  ;;  %v1120_v1 = vpack.c.bf16 %v1066_v2, %v1065_v4 }
 0x22c   : > { %v6242_v47 = vadd.f32 %v2362_v14, %v6121_v46  ;;  %v6245_v3 = vadd.f32 %v2523_v18, %v5992_v12  ;;  %2721 = vmatprep.mubr.bf16.mxu0 %v6015_v40  ;;  %2882 = vmatprep.mubr.bf16.mxu1 %v6017_v28 }
 0x22d   : > { %v2364_v35 = vpop.f32.mrf.mxu1  ;;  %v2525_v34 = vpop.f32.mrf.mxu0 }
 0x22e   : > { %v906_v35 = vld [vmem:[#allocation2 + $0x2b9] sm:$0xff] }
 0x22f   : > { %v2365_v25 = vpop.f32.mrf.mxu1  ;;  %v2526_v8 = vpop.f32.mrf.mxu0 }
 0x230   : > { %v6252_v46 = vadd.f32 %v2365_v25, %v6128_v16  ;;  %v6255_v12 = vadd.f32 %v2526_v8, %v6003_v5  ;;  %v907_v5 = vld [vmem:[#allocation2 + $0x2c1] sm:$0xff] }
 0x231   : > { %v2367_v14 = vpop.f32.mrf.mxu1  ;;  %v2528_v40 = vpop.f32.mrf.mxu0  ;;  %v1067_v16 = vld [vmem:[#allocation2 + $0x120] sm:$0xff] }
 0x232   : > { %v6266_v14 = vpack.c.bf16 %v907_v5, %v906_v35  ;;  %v1069_v5 = vld [vmem:[#allocation2 + $0x138] sm:$0xff] }
 0x233   : > { %v2370_v18 = vpop.f32.mrf.mxu1  ;;  %v2531_v28 = vpop.f32.mrf.mxu0  ;;  %2722 = vmatmul.mubr.bf16.gmra.mxu0 %v6249_v49  ;;  %2883 = vmatmul.mubr.bf16.gmra.mxu1 %v1120_v1  ;;  %v1121_v1 = vpack.c.bf16 %v1068_v13, %v1067_v16  ;;  %v1070_v16 = vld [vmem:[#allocation2 + $0x140] sm:$0xff] }
 0x234   : > { %v6259_v34 = vadd.f32 %v2370_v18, %v6135_v0  ;;  %v6262_v42 = vadd.f32 %v2531_v28, %v6010_v31  ;;  %2729 = vmatprep.mubr.bf16.mxu0 %v6032_v45  ;;  %2890 = vmatprep.mubr.bf16.mxu1 %v6034_v43  ;;  %v908_v28 = vld [vmem:[#allocation2 + $0x2d1] sm:$0xff] }
 0x235   : > { %v2372_v4 = vpop.f32.mrf.mxu1  ;;  %v2533_v2 = vpop.f32.mrf.mxu0 }
 0x237   : > { %v2373_v25 = vpop.f32.mrf.mxu1  ;;  %v2534_v8 = vpop.f32.mrf.mxu0 }
 0x238   : > { %v6269_v0 = vadd.f32 %v2373_v25, %v6143_v51  ;;  %v6272_v31 = vadd.f32 %v2534_v8, %v6020_v24  ;;  %v8359_v51 = vld [vmem:[#allocation25_spill] sm:$0xff] }
 0x239   : > { %v2375_v40 = vpop.f32.mrf.mxu1  ;;  %v2536_v45 = vpop.f32.mrf.mxu0  ;;  %v909_v24 = vld [vmem:[#allocation2 + $0x2d9] sm:$0xff] }
 0x23a   : > { %v6283_v40 = vpack.c.bf16 %v909_v24, %v908_v28  ;;  %v8361_v45 = vld [vmem:[#allocation23_spill] sm:$0xff]  ;;  %v8363_v28 = vld [vmem:[#allocation24_spill] sm:$0xff] }
 0x23b   : > { %v2378_v18 = vpop.f32.mrf.mxu1  ;;  %v2539_v43 = vpop.f32.mrf.mxu0  ;;  %2730 = vmatmul.mubr.bf16.gmra.mxu0 %v6266_v14  ;;  %2891 = vmatmul.mubr.bf16.gmra.mxu1 %v1121_v1  ;;  %v1122_v1 = vpack.c.bf16 %v1070_v16, %v1069_v5  ;;  %v8365_v5 = vld [vmem:[#allocation28_spill] sm:$0xff] }
 0x23c   : > { %v6276_v4 = vadd.f32 %v2378_v18, %v6150_v39  ;;  %v6279_v35 = vadd.f32 %v2539_v43, %v6027_v56  ;;  %2737 = vmatprep.mubr.bf16.mxu0 %v6049_v23  ;;  %2898 = vmatprep.mubr.bf16.mxu1 %v8359_v51  ;;  %v911_v16 = vld [vmem:[#allocation2 + $0x2f1] sm:$0xff] }
 0x23d   : > { %v2380_v13 = vpop.f32.mrf.mxu1  ;;  %v2541_v2 = vpop.f32.mrf.mxu0 }
 0x23e   : > { %v910_v13 = vld [vmem:[#allocation2 + $0x2e9] sm:$0xff] }
 0x23f   : > { %v2381_v25 = vpop.f32.mrf.mxu1  ;;  %v2542_v8 = vpop.f32.mrf.mxu0 }
 0x240   : > { %v6286_v39 = vadd.f32 %v2381_v25, %v6158_v54  ;;  %v6289_v56 = vadd.f32 %v2542_v8, %v8361_v45  ;;  %v8366_v54 = vld [vmem:[#allocation29_spill] sm:$0xff] }
 0x241   : > { %v2383_v18 = vpop.f32.mrf.mxu1  ;;  %v2544_v23 = vpop.f32.mrf.mxu0  ;;  %v1071_v25 = vld [vmem:[#allocation2 + $0x150] sm:$0xff]  ;;  %v1072_v8 = vld [vmem:[#allocation2 + $0x158] sm:$0xff] }
 0x242   : > { %8360 = vst [vmem:[#allocation25_spill] sm:$0xff] %v6286_v39  ;;  %8362 = vst [vmem:[#allocation23_spill] sm:$0xff] %v6289_v56  ;;  %v6300_v39 = vpack.c.bf16 %v911_v16, %v910_v13  ;;  %v8369_v13 = vld [vmem:[#allocation27_spill] sm:$0xff] }
 0x243   : > { %v2386_v43 = vpop.f32.mrf.mxu1  ;;  %v2547_v51 = vpop.f32.mrf.mxu0  ;;  %2738 = vmatmul.mubr.bf16.gmra.mxu0 %v6283_v40  ;;  %2899 = vmatmul.mubr.bf16.gmra.mxu1 %v1122_v1  ;;  %v1123_v1 = vpack.c.bf16 %v1072_v8, %v1071_v25  ;;  %v1074_v25 = vld [vmem:[#allocation2 + $0x170] sm:$0xff] }
 0x244   : > { %v6293_v2 = vadd.f32 %v2386_v43, %v6165_v55  ;;  %v6296_v24 = vadd.f32 %v2547_v51, %v8363_v28  ;;  %2745 = vmatprep.mubr.bf16.mxu0 %v8365_v5  ;;  %2906 = vmatprep.mubr.bf16.mxu1 %v8366_v54  ;;  %v8367_v43 = vld [vmem:[#allocation26_spill] sm:$0xff] }
 0x245   : > { %v2388_v45 = vpop.f32.mrf.mxu1  ;;  %v2549_v18 = vpop.f32.mrf.mxu0 }
 0x246   : > { %8364 = vst [vmem:[#allocation24_spill] sm:$0xff] %v6296_v24  ;;  %v912_v45 = vld [vmem:[#allocation2 + $0x301] sm:$0xff] }
 0x247   : > { %v2389_v23 = vpop.f32.mrf.mxu1  ;;  %v2550_v56 = vpop.f32.mrf.mxu0 }
 0x248   : > { %v6303_v55 = vadd.f32 %v2389_v23, %v6173_v62  ;;  %v6306_v51 = vadd.f32 %v2550_v56, %v8367_v43  ;;  %v913_v62 = vld [vmem:[#allocation2 + $0x309] sm:$0xff] }
 0x249   : > { %v2391_v28 = vpop.f32.mrf.mxu1  ;;  %v2552_v5 = vpop.f32.mrf.mxu0  ;;  %v1073_v56 = vld [vmem:[#allocation2 + $0x168] sm:$0xff] }
 0x24a   : > { %v6317_v5 = vpack.c.bf16 %v913_v62, %v912_v45  ;;  %v8375_v45 = vld [vmem:[#allocation31_spill] sm:$0xff] }
 0x24b   : > { %v2394_v24 = vpop.f32.mrf.mxu1  ;;  %v2555_v54 = vpop.f32.mrf.mxu0  ;;  %2746 = vmatmul.mubr.bf16.gmra.mxu0 %v6300_v39  ;;  %2907 = vmatmul.mubr.bf16.gmra.mxu1 %v1123_v1  ;;  %v1124_v1 = vpack.c.bf16 %v1074_v25, %v1073_v56  ;;  %v1076_v56 = vld [vmem:[#allocation2 + $0x188] sm:$0xff]  ;;  %v1012_v25 = vld [vmem:[#allocation2 + $0x332] sm:$0xff] }
 0x24c   : > { %v6310_v18 = vadd.f32 %v2394_v24, %v6180_v57  ;;  %v6313_v16 = vadd.f32 %v2555_v54, %v8369_v13  ;;  %2753 = vmatprep.mubr.bf16.mxu0 %v6084_v44  ;;  %2914 = vmatprep.mubr.bf16.mxu1 %v6086_v50  ;;  %v8372_v24 = vld [vmem:[#allocation30_spill] sm:$0xff] }
 0x24d   : > { %v2396_v8 = vpop.f32.mrf.mxu1  ;;  %v2557_v23 = vpop.f32.mrf.mxu0 }
 0x24e   : > { %8368 = vst [vmem:[#allocation28_spill] sm:$0xff] %v6310_v18  ;;  %8370 = vst [vmem:[#allocation29_spill] sm:$0xff] %v6313_v16  ;;  %v914_v8 = vld [vmem:[#allocation2 + $0x319] sm:$0xff]  ;;  %v915_v23 = vld [vmem:[#allocation2 + $0x321] sm:$0xff] }
 0x24f   : > { %v2397_v43 = vpop.f32.mrf.mxu1  ;;  %v2558_v28 = vpop.f32.mrf.mxu0 }
 0x250   : > { %v6320_v57 = vadd.f32 %v2397_v43, %v6188_v48  ;;  %v6323_v54 = vadd.f32 %v2558_v28, %v8372_v24  ;;  %v1075_v48 = vld [vmem:[#allocation2 + $0x180] sm:$0xff] }
 0x251   : > { %v2399_v13 = vpop.f32.mrf.mxu1  ;;  %v2560_v44 = vpop.f32.mrf.mxu0  ;;  %v1013_v24 = vld [vmem:[#allocation2 + $0x33a] sm:$0xff] }
 0x252   : > { %8371 = vst [vmem:[#allocation26_spill] sm:$0xff] %v6320_v57  ;;  %8373 = vst [vmem:[#allocation27_spill] sm:$0xff] %v6323_v54  ;;  %v1173_v13 = vld [vmem:[#allocation2 + $0x199] sm:$0xff]  ;;  %v6334_v57 = vpack.c.bf16 %v915_v23, %v914_v8  ;;  %v8378_v23 = vld [vmem:[#allocation32_spill] sm:$0xff] }
 0x253   : > { %v2402_v16 = vpop.f32.mrf.mxu1  ;;  %v2563_v50 = vpop.f32.mrf.mxu0  ;;  %2754 = vmatmul.mubr.bf16.gmra.mxu0 %v6317_v5  ;;  %2915 = vmatmul.mubr.bf16.gmra.mxu1 %v1124_v1  ;;  %v1174_v1 = vld [vmem:[#allocation2 + $0x1a1] sm:$0xff] }
 0x254   : > { %v6327_v18 = vadd.f32 %v2402_v16, %v6195_v59  ;;  %v6330_v62 = vadd.f32 %v2563_v50, %v8375_v45  ;;  %2761 = vmatprep.mubr.bf16.mxu0 %v6100_v27  ;;  %2922 = vmatprep.mubr.bf16.mxu1 %v6102_v36  ;;  %v1125_v59 = vpack.c.bf16 %v1076_v56, %v1075_v48  ;;  %v1078_v48 = vld [vmem:[#allocation2 + $0x1a0] sm:$0xff] }
 0x255   : > { %v2404_v43 = vpop.f32.mrf.mxu1  ;;  %v2565_v28 = vpop.f32.mrf.mxu0  ;;  %v6342_v36 = vpack.c.bf16 %v1013_v24, %v1012_v25  ;;  %v1222_v50 = vpack.c.bf16 %v1174_v1, %v1173_v13  ;;  %v1239_v24 = vld [vmem:[#allocation2 + $0x32] sm:$0xff]  ;;  %v1240_v13 = vld [vmem:[#allocation2 + $0x3a] sm:$0xff] }
 0x256   : > { %8374 = vst [vmem:[#allocation30_spill] sm:$0xff] %v6327_v18  ;;  %8376 = vst [vmem:[#allocation31_spill] sm:$0xff] %v6330_v62  ;;  %v916_v18 = vld [vmem:[#allocation2 + $0x331] sm:$0xff] }
 0x257   : > { %v2405_v44 = vpop.f32.mrf.mxu1  ;;  %v2566_v54 = vpop.f32.mrf.mxu0  ;;  %8377 = vst [vmem:[#allocation41_spill] sm:$0xff] %v6342_v36 }
 0x258   : > { %v6337_v16 = vadd.f32 %v2405_v44, %v6203_v30  ;;  %v6340_v27 = vadd.f32 %v2566_v54, %v6089_v21  ;;  %v917_v21 = vld [vmem:[#allocation2 + $0x339] sm:$0xff] }
 0x259   : > { %v2407_v45 = vpop.f32.mrf.mxu1  ;;  %v2568_v43 = vpop.f32.mrf.mxu0  ;;  %v1077_v54 = vld [vmem:[#allocation2 + $0x198] sm:$0xff] }
 0x25a   : > { %v1126_v45 = vpack.c.bf16 %v1078_v48, %v1077_v54  ;;  %v1241_v54 = vld [vmem:[#allocation2 + $0x4a] sm:$0xff]  ;;  %v1242_v48 = vld [vmem:[#allocation2 + $0x52] sm:$0xff] }
 0x25b   : > { %v2410_v28 = vpop.f32.mrf.mxu1  ;;  %v2571_v62 = vpop.f32.mrf.mxu0  ;;  %2762 = vmatmul.mubr.bf16.gmra.mxu0 %v6334_v57  ;;  %2923 = vmatmul.mubr.bf16.gmra.mxu1 %v1125_v59  ;;  %v6352_v59 = vpack.c.bf16 %v917_v21, %v916_v18  ;;  %v8381_v18 = vld [vmem:[#allocation34_spill] sm:$0xff] }
 0x25c   : > { %v6346_v8 = vadd.f32 %v2410_v28, %v6210_v41  ;;  %v6349_v30 = vadd.f32 %v2571_v62, %v8378_v23  ;;  %2769 = vmatprep.mubr.bf16.mxu0 %v6342_v36  ;;  %2930 = vmatprep.mubr.bf16.mxu1 %v1222_v50  ;;  %v8380_v62 = vld [vmem:[#allocation33_spill] sm:$0xff]  ;;  %v1303_v28 = vpack.c.bf16 %v1240_v13, %v1239_v24 }
 0x25d   : > { %v2412_v56 = vpop.f32.mrf.mxu1  ;;  %v2573_v25 = vpop.f32.mrf.mxu0 }
 0x25e   : > { %8379 = vst [vmem:[#allocation32_spill] sm:$0xff] %v6349_v30  ;;  %v1079_v56 = vld [vmem:[#allocation2 + $0x1e0] sm:$0xff] }
 0x25f   : > { %v2413_v1 = vpop.f32.mrf.mxu1  ;;  %v2574_v44 = vpop.f32.mrf.mxu0 }
 0x260   : > { %v6355_v41 = vadd.f32 %v2413_v1, %v6218_v26  ;;  %v6358_v43 = vadd.f32 %v2574_v44, %v8380_v62  ;;  %v1080_v26 = vld [vmem:[#allocation2 + $0x1e8] sm:$0xff] }
 0x261   : > { %v2415_v50 = vpop.f32.mrf.mxu1  ;;  %v2576_v23 = vpop.f32.mrf.mxu0  ;;  %v1243_v1 = vld [vmem:[#allocation2 + $0x62] sm:$0xff]  ;;  %v1244_v44 = vld [vmem:[#allocation2 + $0x6a] sm:$0xff] }
 0x262   : > { %v1304_v23 = vpack.c.bf16 %v1242_v48, %v1241_v54  ;;  %v1247_v48 = vld [vmem:[#allocation2 + $0x92] sm:$0xff] }
 0x263   : > { %v2418_v36 = vpop.f32.mrf.mxu1  ;;  %v2579_v30 = vpop.f32.mrf.mxu0  ;;  %2770 = vmatmul.mubr.bf16.gmra.mxu0 %v6352_v59  ;;  %2931 = vmatmul.mubr.bf16.gmra.mxu1 %v1126_v45  ;;  %v1127_v45 = vpack.c.bf16 %v1080_v26, %v1079_v56  ;;  %v1245_v56 = vld [vmem:[#allocation2 + $0x7a] sm:$0xff]  ;;  %v1246_v26 = vld [vmem:[#allocation2 + $0x82] sm:$0xff] }
 0x264   : > { %v6362_v25 = vadd.f32 %v2418_v36, %v6225_v63  ;;  %v6365_v21 = vadd.f32 %v2579_v30, %v8381_v18  ;;  %2938 = vmatprep.mubr.bf16.mxu1 %v6130_v60  ;;  %4681 = vmatprep.mubr.bf16.mxu0 %v1303_v28  ;;  %v1305_v30 = vpack.c.bf16 %v1244_v44, %v1243_v1  ;;  %v1248_v1 = vld [vmem:[#allocation2 + $0x9a] sm:$0xff] }
 0x265   : > { %v2420_v24 = vpop.f32.mrf.mxu1  ;;  %v2581_v13 = vpop.f32.mrf.mxu0 }
 0x266   : > { %8382 = vst [vmem:[#allocation33_spill] sm:$0xff] %v6365_v21  ;;  %v1081_v24 = vld [vmem:[#allocation2 + $0x1f8] sm:$0xff] }
 0x267   : > { %v2421_v62 = vpop.f32.mrf.mxu1  ;;  %v2582_v50 = vpop.f32.mrf.mxu0 }
 0x268   : > { %v6369_v63 = vadd.f32 %v2421_v62, %v6233_v33  ;;  %v6372_v36 = vadd.f32 %v2582_v50, %v6119_v38  ;;  %v1082_v33 = vld [vmem:[#allocation2 + $0x200] sm:$0xff] }
 0x269   : > { %v2423_v60 = vpop.f32.mrf.mxu1  ;;  %v2584_v28 = vpop.f32.mrf.mxu0  ;;  %v1128_v50 = vpack.c.bf16 %v1082_v33, %v1081_v24  ;;  %v1084_v24 = vld [vmem:[#allocation2 + $0x218] sm:$0xff]  ;;  %v1249_v33 = vld [vmem:[#allocation2 + $0xaa] sm:$0xff] }
 0x26a   : > { %v1083_v28 = vld [vmem:[#allocation2 + $0x210] sm:$0xff] }
 0x26b   : > { %v6374_v18 = vpop.f32.mrf.mxu1  ;;  %v2587_v21 = vpop.f32.mrf.mxu0  ;;  %2939 = vmatmul.mubr.bf16.gmra.mxu1 %v1127_v45  ;;  %4682 = vmatmul.mubr.bf16.vlgmr.msra.gmra.mxu0 %v1304_v23  ;;  %v1306_v45 = vpack.c.bf16 %v1246_v26, %v1245_v56  ;;  %v1250_v56 = vld [vmem:[#allocation2 + $0xb2] sm:$0xff] }
 0x26c   : > { %v6377_v13 = vadd.f32 %v2587_v21, %v6124_v32  ;;  %2946 = vmatprep.mubr.bf16.mxu1 %v6145_v10  ;;  %4685 = vmatprep.mubr.bf16.mxu0 %v1305_v30  ;;  %v1307_v32 = vpack.c.bf16 %v1248_v1, %v1247_v48  ;;  %v1252_v48 = vld [vmem:[#allocation2 + $0xca] sm:$0xff] }
 0x26d   : > { %v2428_v38 = vpop.f32.mrf.mxu1  ;;  %v2589_v54 = vpop.f32.mrf.mxu0 }
 0x26e   : > { %v1251_v54 = vld [vmem:[#allocation2 + $0xc2] sm:$0xff] }
 0x26f   : > { %v6380_v44 = vpop.f32.mrf.mxu1  ;;  %v2590_v62 = vpop.f32.mrf.mxu0 }
 0x270   : > { %v6383_v23 = vadd.f32 %v2590_v62, %v6133_v29 }
 0x271   : > { %v2431_v21 = vpop.f32.mrf.mxu1  ;;  %v2592_v60 = vpop.f32.mrf.mxu0 }
 0x272   : > { %v1129_v21 = vpack.c.bf16 %v1084_v24, %v1083_v28  ;;  %v1086_v28 = vld [vmem:[#allocation2 + $0x230] sm:$0xff]  ;;  %v1253_v24 = vld [vmem:[#allocation2 + $0xda] sm:$0xff] }
 0x273   : > { %v6385_v10 = vpop.f32.mrf.mxu1  ;;  %v2595_v30 = vpop.f32.mrf.mxu0  ;;  %2947 = vmatmul.mubr.bf16.gmra.mxu1 %v1128_v50  ;;  %4686 = vmatmul.mubr.bf16.gmra.mxu0 %v1306_v45  ;;  %v1308_v50 = vpack.c.bf16 %v1250_v56, %v1249_v33  ;;  %v1254_v33 = vld [vmem:[#allocation2 + $0xe2] sm:$0xff] }
 0x274   : > { %v6388_v38 = vadd.f32 %v2595_v30, %v6139_v19  ;;  %2954 = vmatprep.mubr.bf16.mxu1 %v6160_v9  ;;  %4689 = vmatprep.mubr.bf16.mxu0 %v1307_v32  ;;  %v1309_v19 = vpack.c.bf16 %v1252_v48, %v1251_v54  ;;  %v1255_v54 = vld [vmem:[#allocation2 + $0xf2] sm:$0xff]  ;;  %v1256_v48 = vld [vmem:[#allocation2 + $0xfa] sm:$0xff] }
 0x275   : > { %v2436_v29 = vpop.f32.mrf.mxu1  ;;  %v2597_v26 = vpop.f32.mrf.mxu0 }
 0x276   : > { %8383 = vst [vmem:[#allocation34_spill] sm:$0xff] %v6388_v38  ;;  %v1085_v29 = vld [vmem:[#allocation2 + $0x228] sm:$0xff] }
 0x277   : > { %v6391_v1 = vpop.f32.mrf.mxu1  ;;  %v2598_v62 = vpop.f32.mrf.mxu0  ;;  %v8385_v26 = vld [vmem:[#allocation35_spill] sm:$0xff] }
 0x278   : > { %v6394_v45 = vadd.f32 %v2598_v62, %v6148_v52 }
 0x279   : > { %v2439_v60 = vpop.f32.mrf.mxu1  ;;  %v2600_v30 = vpop.f32.mrf.mxu0 }
 0x27a   : > { %v1130_v30 = vpack.c.bf16 %v1086_v28, %v1085_v29  ;;  %v1088_v29 = vld [vmem:[#allocation2 + $0x248] sm:$0xff] }
 0x27b   : > { %v6396_v9 = vpop.f32.mrf.mxu1  ;;  %v2603_v32 = vpop.f32.mrf.mxu0  ;;  %2955 = vmatmul.mubr.bf16.gmra.mxu1 %v1129_v21  ;;  %4690 = vmatmul.mubr.bf16.gmra.mxu0 %v1308_v50  ;;  %v1310_v21 = vpack.c.bf16 %v1254_v33, %v1253_v24  ;;  %v1257_v28 = vld [vmem:[#allocation2 + $0x10a] sm:$0xff]  ;;  %v1258_v24 = vld [vmem:[#allocation2 + $0x112] sm:$0xff] }
 0x27c   : > { %8384 = vst [vmem:[#allocation42_spill] sm:$0xff] %v6396_v9  ;;  %v6399_v38 = vadd.f32 %v2603_v32, %v8385_v26  ;;  %2962 = vmatprep.mubr.bf16.mxu1 %v6175_v20  ;;  %4693 = vmatprep.mubr.bf16.mxu0 %v1309_v19  ;;  %v1311_v32 = vpack.c.bf16 %v1256_v48, %v1255_v54  ;;  %v1259_v54 = vld [vmem:[#allocation2 + $0x122] sm:$0xff]  ;;  %v1260_v48 = vld [vmem:[#allocation2 + $0x12a] sm:$0xff] }
 0x27d   : > { %v2444_v52 = vpop.f32.mrf.mxu1  ;;  %v2605_v56 = vpop.f32.mrf.mxu0 }
 0x27e   : > { %8386 = vst [vmem:[#allocation35_spill] sm:$0xff] %v6399_v38  ;;  %v1087_v52 = vld [vmem:[#allocation2 + $0x240] sm:$0xff]  ;;  %v8388_v56 = vld [vmem:[#allocation36_spill] sm:$0xff] }
 0x27f   : > { %v6402_v62 = vpop.f32.mrf.mxu1  ;;  %v2606_v60 = vpop.f32.mrf.mxu0 }
 0x280   : > { %v6405_v50 = vadd.f32 %v2606_v60, %v6163_v53 }
 0x281   : > { %v2447_v26 = vpop.f32.mrf.mxu1  ;;  %v2608_v38 = vpop.f32.mrf.mxu0 }
 0x282   : > { %v1131_v26 = vpack.c.bf16 %v1088_v29, %v1087_v52  ;;  %v1090_v52 = vld [vmem:[#allocation2 + $0x260] sm:$0xff] }
 0x283   : > { %v6407_v20 = vpop.f32.mrf.mxu1  ;;  %v2611_v19 = vpop.f32.mrf.mxu0  ;;  %2963 = vmatmul.mubr.bf16.gmra.mxu1 %v1130_v30  ;;  %4694 = vmatmul.mubr.bf16.gmra.mxu0 %v1310_v21  ;;  %v1312_v30 = vpack.c.bf16 %v1258_v24, %v1257_v28  ;;  %v1261_v29 = vld [vmem:[#allocation2 + $0x13a] sm:$0xff]  ;;  %v1262_v28 = vld [vmem:[#allocation2 + $0x142] sm:$0xff] }
 0x284   : > { %8387 = vst [vmem:[#allocation43_spill] sm:$0xff] %v6407_v20  ;;  %v6410_v9 = vadd.f32 %v2611_v19, %v8388_v56  ;;  %2970 = vmatprep.mubr.bf16.mxu1 %v6190_v17  ;;  %4697 = vmatprep.mubr.bf16.mxu0 %v1311_v32  ;;  %v1313_v19 = vpack.c.bf16 %v1260_v48, %v1259_v54  ;;  %v1263_v54 = vld [vmem:[#allocation2 + $0x152] sm:$0xff]  ;;  %v1264_v48 = vld [vmem:[#allocation2 + $0x15a] sm:$0xff] }
 0x285   : > { %v2452_v53 = vpop.f32.mrf.mxu1  ;;  %v2613_v33 = vpop.f32.mrf.mxu0 }
 0x286   : > { %8389 = vst [vmem:[#allocation36_spill] sm:$0xff] %v6410_v9  ;;  %v1089_v53 = vld [vmem:[#allocation2 + $0x258] sm:$0xff] }
 0x287   : > { %v6413_v38 = vpop.f32.mrf.mxu1  ;;  %v2614_v60 = vpop.f32.mrf.mxu0  ;;  %v8391_v33 = vld [vmem:[#allocation37_spill] sm:$0xff] }
 0x288   : > { %v6416_v21 = vadd.f32 %v2614_v60, %v6178_v37 }
 0x289   : > { %v2455_v56 = vpop.f32.mrf.mxu1  ;;  %v2616_v9 = vpop.f32.mrf.mxu0 }
 0x28a   : > { %v1132_v56 = vpack.c.bf16 %v1090_v52, %v1089_v53  ;;  %v1092_v53 = vld [vmem:[#allocation2 + $0x278] sm:$0xff]  ;;  %v1265_v52 = vld [vmem:[#allocation2 + $0x16a] sm:$0xff] }
 0x28b   : > { %v6418_v17 = vpop.f32.mrf.mxu1  ;;  %v2619_v32 = vpop.f32.mrf.mxu0  ;;  %2971 = vmatmul.mubr.bf16.gmra.mxu1 %v1131_v26  ;;  %4698 = vmatmul.mubr.bf16.gmra.mxu0 %v1312_v30  ;;  %v1314_v26 = vpack.c.bf16 %v1262_v28, %v1261_v29  ;;  %v1266_v29 = vld [vmem:[#allocation2 + $0x172] sm:$0xff] }
 0x28c   : > { %8390 = vst [vmem:[#allocation44_spill] sm:$0xff] %v6418_v17  ;;  %v6421_v20 = vadd.f32 %v2619_v32, %v8391_v33  ;;  %2978 = vmatprep.mubr.bf16.mxu1 %v6205_v6  ;;  %4701 = vmatprep.mubr.bf16.mxu0 %v1313_v19  ;;  %v1315_v32 = vpack.c.bf16 %v1264_v48, %v1263_v54  ;;  %v1267_v54 = vld [vmem:[#allocation2 + $0x182] sm:$0xff] }
 0x28d   : > { %v2460_v37 = vpop.f32.mrf.mxu1  ;;  %v2621_v24 = vpop.f32.mrf.mxu0 }
 0x28e   : > { %8392 = vst [vmem:[#allocation37_spill] sm:$0xff] %v6421_v20  ;;  %v1091_v37 = vld [vmem:[#allocation2 + $0x270] sm:$0xff]  ;;  %v8393_v24 = vld [vmem:[#allocation38_spill] sm:$0xff] }
 0x28f   : > { %v6424_v9 = vpop.f32.mrf.mxu1  ;;  %v2622_v60 = vpop.f32.mrf.mxu0 }
 0x290   : > { %v6427_v30 = vadd.f32 %v2622_v60, %v6193_v58 }
 0x291   : > { %v2463_v33 = vpop.f32.mrf.mxu1  ;;  %v2624_v20 = vpop.f32.mrf.mxu0 }
 0x292   : > { %v1268_v20 = vld [vmem:[#allocation2 + $0x18a] sm:$0xff] }
 0x293   : > { %v6429_v6 = vpop.f32.mrf.mxu1  ;;  %v2627_v19 = vpop.f32.mrf.mxu0  ;;  %2979 = vmatmul.mubr.bf16.gmra.mxu1 %v1132_v56  ;;  %4702 = vmatmul.mubr.bf16.gmra.mxu0 %v1314_v26  ;;  %v1133_v56 = vpack.c.bf16 %v1092_v53, %v1091_v37  ;;  %v1316_v26 = vpack.c.bf16 %v1266_v29, %v1265_v52  ;;  %v1269_v37 = vld [vmem:[#allocation2 + $0x19a] sm:$0xff]  ;;  %v1270_v53 = vld [vmem:[#allocation2 + $0x1a2] sm:$0xff] }
 0x294   : > { %v6432_v17 = vadd.f32 %v2627_v19, %v8393_v24  ;;  %2986 = vmatprep.mubr.bf16.mxu1 %v6220_v15  ;;  %4705 = vmatprep.mubr.bf16.mxu0 %v1315_v32  ;;  %v1317_v19 = vpack.c.bf16 %v1268_v20, %v1267_v54  ;;  %v1271_v54 = vld [vmem:[#allocation2 + $0x1e2] sm:$0xff]  ;;  %v1272_v20 = vld [vmem:[#allocation2 + $0x1ea] sm:$0xff] }
 0x295   : > { %v2468_v58 = vpop.f32.mrf.mxu1  ;;  %v2629_v28 = vpop.f32.mrf.mxu0 }
 0x296   : > { %8394 = vst [vmem:[#allocation38_spill] sm:$0xff] %v6432_v17  ;;  %v1093_v58 = vld [vmem:[#allocation2 + $0x288] sm:$0xff] }
 0x297   : > { %v6435_v48 = vpop.f32.mrf.mxu1  ;;  %v2630_v60 = vpop.f32.mrf.mxu0  ;;  %v8396_v28 = vld [vmem:[#allocation39_spill] sm:$0xff] }
 0x298   : > { %8395 = vst [vmem:[#allocation45_spill] sm:$0xff] %v6435_v48  ;;  %v6438_v33 = vadd.f32 %v2630_v60, %v6208_v61  ;;  %v1094_v61 = vld [vmem:[#allocation2 + $0x290] sm:$0xff] }
 0x299   : > { %v2471_v15 = vpop.f32.mrf.mxu1  ;;  %v2632_v32 = vpop.f32.mrf.mxu0 }
 0x29b   : > { %v6440_v24 = vpop.f32.mrf.mxu1  ;;  %v2635_v17 = vpop.f32.mrf.mxu0  ;;  %2987 = vmatmul.mubr.bf16.gmra.mxu1 %v1133_v56  ;;  %4706 = vmatmul.mubr.bf16.gmra.mxu0 %v1316_v26  ;;  %v1134_v26 = vpack.c.bf16 %v1094_v61, %v1093_v58  ;;  %v1273_v61 = vld [vmem:[#allocation2 + $0x1fa] sm:$0xff] }
 0x29c   : > { %v6444_v48 = vadd.f32 %v2635_v17, %v8396_v28  ;;  %2994 = vmatprep.mubr.bf16.mxu1 %v6235_v7  ;;  %4709 = vmatprep.mubr.bf16.mxu0 %v1317_v19  ;;  %v1318_v17 = vpack.c.bf16 %v1270_v53, %v1269_v37  ;;  %v1319_v19 = vpack.c.bf16 %v1272_v20, %v1271_v54  ;;  %v1274_v37 = vld [vmem:[#allocation2 + $0x202] sm:$0xff]  ;;  %v1275_v20 = vld [vmem:[#allocation2 + $0x212] sm:$0xff] }
 0x29d   : > { %v2476_v52 = vpop.f32.mrf.mxu1  ;;  %v2637_v29 = vpop.f32.mrf.mxu0 }
 0x29e   : > { %v1095_v29 = vld [vmem:[#allocation2 + $0x2a0] sm:$0xff] }
 0x29f   : > { %v6449_v60 = vpop.f32.mrf.mxu1  ;;  %v2638_v56 = vpop.f32.mrf.mxu0 }
 0x2a0   : > { %8397 = vst [vmem:[#allocation39_spill] sm:$0xff] %v6449_v60  ;;  %v6452_v7 = vadd.f32 %v2638_v56, %v6223_v11  ;;  %v8398_v60 = vld [vmem:[#allocation40_spill] sm:$0xff]  ;;  %v1276_v56 = vld [vmem:[#allocation2 + $0x21a] sm:$0xff] }
 0x2a1   : > { %v2479_v15 = vpop.f32.mrf.mxu1  ;;  %v2640_v32 = vpop.f32.mrf.mxu0  ;;  %v1096_v11 = vld [vmem:[#allocation2 + $0x2a8] sm:$0xff] }
 0x2a2   : > { %v1320_v32 = vpack.c.bf16 %v1274_v37, %v1273_v61  ;;  %v1278_v61 = vld [vmem:[#allocation2 + $0x232] sm:$0xff] }
 0x2a3   : > { %v6454_v28 = vpop.f32.mrf.mxu1  ;;  %v2643_v52 = vpop.f32.mrf.mxu0  ;;  %2995 = vmatmul.mubr.bf16.gmra.mxu1 %v1134_v26  ;;  %4710 = vmatmul.mubr.bf16.gmra.mxu0 %v1318_v17  ;;  %v1135_v17 = vpack.c.bf16 %v1096_v11, %v1095_v29  ;;  %v1277_v11 = vld [vmem:[#allocation2 + $0x22a] sm:$0xff] }
 0x2a4   : > { %v6457_v58 = vadd.f32 %v2643_v52, %v8398_v60  ;;  %3002 = vmatprep.mubr.bf16.mxu1 %v6249_v49  ;;  %4713 = vmatprep.mubr.bf16.mxu0 %v1319_v19  ;;  %v1321_v52 = vpack.c.bf16 %v1276_v56, %v1275_v20  ;;  %v1279_v56 = vld [vmem:[#allocation2 + $0x242] sm:$0xff] }
 0x2a5   : > { %v2484_v53 = vpop.f32.mrf.mxu1  ;;  %v2645_v54 = vpop.f32.mrf.mxu0 }
 0x2a6   : > { %8399 = vst [vmem:[#allocation40_spill] sm:$0xff] %v6457_v58  ;;  %v1097_v58 = vld [vmem:[#allocation2 + $0x2b8] sm:$0xff] }
 0x2a7   : > { %v6461_v15 = vpop.f32.mrf.mxu1  ;;  %v2646_v26 = vpop.f32.mrf.mxu0 }
 0x2a8   : > { %8400 = vst [vmem:[#allocation46_spill] sm:$0xff] %v6461_v15  ;;  %v6464_v60 = vadd.f32 %v2646_v26, %v6238_v22  ;;  %v1098_v22 = vld [vmem:[#allocation2 + $0x2c0] sm:$0xff]  ;;  %v1280_v26 = vld [vmem:[#allocation2 + $0x24a] sm:$0xff] }
 0x2a9   : > { %v2487_v49 = vpop.f32.mrf.mxu1  ;;  %v2648_v19 = vpop.f32.mrf.mxu0 }
 0x2aa   : > { %v1136_v49 = vpack.c.bf16 %v1098_v22, %v1097_v58  ;;  %v1282_v22 = vld [vmem:[#allocation2 + $0x262] sm:$0xff] }
 0x2ab   : > { %v2651_v53 = vpop.f32.mrf.mxu0  ;;  %v2812_v54 = vpop.f32.mrf.mxu1  ;;  %3003 = vmatmul.mubr.bf16.gmra.mxu1 %v1135_v17  ;;  %4714 = vmatmul.mubr.bf16.gmra.mxu0 %v1320_v32 }
 0x2ac   : > { %v6471_v15 = vadd.f32 %v2651_v53, %v6242_v47  ;;  %v6474_v29 = vadd.f32 %v2812_v54, %v6245_v3  ;;  %3010 = vmatprep.mubr.bf16.mxu1 %v6266_v14  ;;  %4717 = vmatprep.mubr.bf16.mxu0 %v1321_v52  ;;  %v1322_v47 = vpack.c.bf16 %v1278_v61, %v1277_v11 }
 0x2ad   : > { %v2653_v37 = vpop.f32.mrf.mxu0  ;;  %v2814_v20 = vpop.f32.mrf.mxu1  ;;  %v1323_v14 = vpack.c.bf16 %v1280_v26, %v1279_v56  ;;  %v1283_v56 = vld [vmem:[#allocation2 + $0x272] sm:$0xff]  ;;  %v1284_v26 = vld [vmem:[#allocation2 + $0x27a] sm:$0xff] }
 0x2ae   : > { %8402 = vst [vmem:[#allocation47_spill] sm:$0xff] %v6474_v29  ;;  %v1099_v37 = vld [vmem:[#allocation2 + $0x2d0] sm:$0xff] }
 0x2af   : > { %v2654_v17 = vpop.f32.mrf.mxu0  ;;  %v2815_v32 = vpop.f32.mrf.mxu1 }
 0x2b0   : > { %v6480_v19 = vadd.f32 %v2654_v17, %v6252_v46  ;;  %v6483_v3 = vadd.f32 %v2815_v32, %v6255_v12  ;;  %v1100_v46 = vld [vmem:[#allocation2 + $0x2d8] sm:$0xff] }
 0x2b1   : > { %v2656_v52 = vpop.f32.mrf.mxu0  ;;  %v2817_v53 = vpop.f32.mrf.mxu1  ;;  %v1281_v12 = vld [vmem:[#allocation2 + $0x25a] sm:$0xff] }
 0x2b3   : > { %v2659_v54 = vpop.f32.mrf.mxu0  ;;  %v2820_v29 = vpop.f32.mrf.mxu1  ;;  %3011 = vmatmul.mubr.bf16.gmra.mxu1 %v1136_v49  ;;  %4718 = vmatmul.mubr.bf16.gmra.mxu0 %v1322_v47  ;;  %v1137_v49 = vpack.c.bf16 %v1100_v46, %v1099_v37  ;;  %v1324_v47 = vpack.c.bf16 %v1282_v22, %v1281_v12  ;;  %v1286_v46 = vld [vmem:[#allocation2 + $0x292] sm:$0xff] }
 0x2b4   : > { %v6486_v20 = vadd.f32 %v2659_v54, %v6259_v34  ;;  %v6489_v58 = vadd.f32 %v2820_v29, %v6262_v42  ;;  %3018 = vmatprep.mubr.bf16.mxu1 %v6283_v40  ;;  %4721 = vmatprep.mubr.bf16.mxu0 %v1323_v14  ;;  %v1325_v29 = vpack.c.bf16 %v1284_v26, %v1283_v56  ;;  %v1101_v54 = vld [vmem:[#allocation2 + $0x2e8] sm:$0xff] }
 0x2b5   : > { %v2661_v11 = vpop.f32.mrf.mxu0  ;;  %v2822_v61 = vpop.f32.mrf.mxu1  ;;  %v1288_v56 = vld [vmem:[#allocation2 + $0x2aa] sm:$0xff] }
 0x2b6   : > { %v1287_v61 = vld [vmem:[#allocation2 + $0x2a2] sm:$0xff] }
 0x2b7   : > { %v2662_v17 = vpop.f32.mrf.mxu0  ;;  %v2823_v32 = vpop.f32.mrf.mxu1 }
 0x2b8   : > { %v6493_v34 = vadd.f32 %v2662_v17, %v6269_v0  ;;  %v6496_v42 = vadd.f32 %v2823_v32, %v6272_v31  ;;  %v1102_v0 = vld [vmem:[#allocation2 + $0x2f0] sm:$0xff] }
 0x2b9   : > { %v2664_v40 = vpop.f32.mrf.mxu0  ;;  %v2825_v14 = vpop.f32.mrf.mxu1  ;;  %v1285_v31 = vld [vmem:[#allocation2 + $0x28a] sm:$0xff]  ;;  %v1138_v32 = vpack.c.bf16 %v1102_v0, %v1101_v54 }
 0x2ba   : > { %v8406_v40 = vld [vmem:[#allocation23_spill] sm:$0xff]  ;;  %v1327_v14 = vpack.c.bf16 %v1288_v56, %v1287_v61 }
 0x2bb   : > { %v2667_v52 = vpop.f32.mrf.mxu0  ;;  %v2828_v53 = vpop.f32.mrf.mxu1  ;;  %3019 = vmatmul.mubr.bf16.gmra.mxu1 %v1137_v49  ;;  %4722 = vmatmul.mubr.bf16.gmra.mxu0 %v1324_v47  ;;  %v1326_v49 = vpack.c.bf16 %v1286_v46, %v1285_v31  ;;  %v8404_v47 = vld [vmem:[#allocation25_spill] sm:$0xff]  ;;  %v1104_v0 = vld [vmem:[#allocation2 + $0x308] sm:$0xff]  ;;  %v1289_v31 = vld [vmem:[#allocation2 + $0x2ba] sm:$0xff] }
 0x2bc   : > { %v6499_v11 = vadd.f32 %v2667_v52, %v6276_v4  ;;  %v6502_v37 = vadd.f32 %v2828_v53, %v6279_v35  ;;  %3026 = vmatprep.mubr.bf16.mxu1 %v6300_v39  ;;  %4725 = vmatprep.mubr.bf16.mxu0 %v1325_v29  ;;  %v1290_v46 = vld [vmem:[#allocation2 + $0x2c2] sm:$0xff] }
 0x2bd   : > { %v2669_v12 = vpop.f32.mrf.mxu0  ;;  %v2830_v22 = vpop.f32.mrf.mxu1 }
 0x2be   : > { %8403 = vst [vmem:[#allocation48_spill] sm:$0xff] %v6499_v11  ;;  %v1103_v12 = vld [vmem:[#allocation2 + $0x300] sm:$0xff]  ;;  %v8408_v11 = vld [vmem:[#allocation24_spill] sm:$0xff] }
 0x2bf   : > { %v2670_v26 = vpop.f32.mrf.mxu0  ;;  %v2831_v17 = vpop.f32.mrf.mxu1 }
 0x2c0   : > { %v6506_v4 = vadd.f32 %v2670_v26, %v8404_v47  ;;  %v6509_v35 = vadd.f32 %v2831_v17, %v8406_v40  ;;  %v1291_v26 = vld [vmem:[#allocation2 + $0x2d2] sm:$0xff]  ;;  %v1292_v17 = vld [vmem:[#allocation2 + $0x2da] sm:$0xff]  ;;  %v1328_v40 = vpack.c.bf16 %v1290_v46, %v1289_v31 }
 0x2c1   : > { %v2672_v39 = vpop.f32.mrf.mxu0  ;;  %v2833_v29 = vpop.f32.mrf.mxu1 }
 0x2c2   : > { %8405 = vst [vmem:[#allocation25_spill] sm:$0xff] %v6506_v4  ;;  %v1329_v39 = vpack.c.bf16 %v1292_v17, %v1291_v26  ;;  %v1295_v26 = vld [vmem:[#allocation2 + $0x302] sm:$0xff]  ;;  %v1296_v17 = vld [vmem:[#allocation2 + $0x30a] sm:$0xff] }
 0x2c3   : > { %v2675_v52 = vpop.f32.mrf.mxu0  ;;  %v2836_v53 = vpop.f32.mrf.mxu1  ;;  %3027 = vmatmul.mubr.bf16.gmra.mxu1 %v1138_v32  ;;  %4726 = vmatmul.mubr.bf16.gmra.mxu0 %v1326_v49  ;;  %v1139_v49 = vpack.c.bf16 %v1104_v0, %v1103_v12  ;;  %v1294_v0 = vld [vmem:[#allocation2 + $0x2f2] sm:$0xff]  ;;  %v8416_v4 = vld [vmem:[#allocation31_spill] sm:$0xff] }
 0x2c4   : > { %v6512_v22 = vadd.f32 %v2675_v52, %v6293_v2  ;;  %v6515_v54 = vadd.f32 %v2836_v53, %v8408_v11  ;;  %3034 = vmatprep.mubr.bf16.mxu1 %v6317_v5  ;;  %4729 = vmatprep.mubr.bf16.mxu0 %v1327_v14  ;;  %v1105_v53 = vld [vmem:[#allocation2 + $0x318] sm:$0xff] }
 0x2c5   : > { %v2677_v61 = vpop.f32.mrf.mxu0  ;;  %v2838_v56 = vpop.f32.mrf.mxu1 }
 0x2c6   : > { %8407 = vst [vmem:[#allocation23_spill] sm:$0xff] %v6512_v22  ;;  %v8410_v61 = vld [vmem:[#allocation28_spill] sm:$0xff]  ;;  %v8412_v22 = vld [vmem:[#allocation29_spill] sm:$0xff] }
 0x2c7   : > { %v2678_v47 = vpop.f32.mrf.mxu0  ;;  %v2839_v32 = vpop.f32.mrf.mxu1 }
 0x2c8   : > { %v6519_v2 = vadd.f32 %v2678_v47, %v6303_v55  ;;  %v6522_v11 = vadd.f32 %v2839_v32, %v6306_v51  ;;  %v1106_v55 = vld [vmem:[#allocation2 + $0x320] sm:$0xff]  ;;  %v1293_v51 = vld [vmem:[#allocation2 + $0x2ea] sm:$0xff] }
 0x2c9   : > { %v2680_v5 = vpop.f32.mrf.mxu0  ;;  %v2841_v14 = vpop.f32.mrf.mxu1 }
 0x2ca   : > { %8409 = vst [vmem:[#allocation24_spill] sm:$0xff] %v6519_v2  ;;  %v8413_v5 = vld [vmem:[#allocation26_spill] sm:$0xff] }
 0x2cb   : > { %v2683_v29 = vpop.f32.mrf.mxu0  ;;  %v2844_v52 = vpop.f32.mrf.mxu1  ;;  %3035 = vmatmul.mubr.bf16.gmra.mxu1 %v1139_v49  ;;  %4730 = vmatmul.mubr.bf16.gmra.mxu0 %v1328_v40  ;;  %v1140_v49 = vpack.c.bf16 %v1106_v55, %v1105_v53  ;;  %v1330_v40 = vpack.c.bf16 %v1294_v0, %v1293_v51  ;;  %v1108_v55 = vld [vmem:[#allocation2 + $0x338] sm:$0xff]  ;;  %v1298_v0 = vld [vmem:[#allocation2 + $0x322] sm:$0xff] }
 0x2cc   : > { %v6525_v56 = vadd.f32 %v2683_v29, %v8410_v61  ;;  %v6528_v12 = vadd.f32 %v2844_v52, %v8412_v22  ;;  %3042 = vmatprep.mubr.bf16.mxu1 %v6334_v57  ;;  %4733 = vmatprep.mubr.bf16.mxu0 %v1329_v39  ;;  %v8414_v29 = vld [vmem:[#allocation27_spill] sm:$0xff]  ;;  %v1331_v52 = vpack.c.bf16 %v1296_v17, %v1295_v26  ;;  %v1297_v51 = vld [vmem:[#allocation2 + $0x31a] sm:$0xff] }
 0x2cd   : > { %v2685_v31 = vpop.f32.mrf.mxu0  ;;  %v2846_v46 = vpop.f32.mrf.mxu1 }
 0x2ce   : > { %8411 = vst [vmem:[#allocation28_spill] sm:$0xff] %v6525_v56  ;;  %v1107_v31 = vld [vmem:[#allocation2 + $0x330] sm:$0xff]  ;;  %v8415_v46 = vld [vmem:[#allocation30_spill] sm:$0xff] }
 0x2cf   : > { %v2686_v47 = vpop.f32.mrf.mxu0  ;;  %v2847_v32 = vpop.f32.mrf.mxu1 }
 0x2d0   : > { %v6532_v14 = vadd.f32 %v2686_v47, %v8413_v5  ;;  %v6535_v22 = vadd.f32 %v2847_v32, %v8414_v29  ;;  %v1205_v47 = vld [vmem:[#allocation2 + $0x349] sm:$0xff]  ;;  %v1206_v32 = vld [vmem:[#allocation2 + $0x351] sm:$0xff]  ;;  %v1332_v29 = vpack.c.bf16 %v1298_v0, %v1297_v51 }
 0x2d1   : > { %v2688_v57 = vpop.f32.mrf.mxu0  ;;  %v2849_v39 = vpop.f32.mrf.mxu1  ;;  %v1302_v51 = vld [vmem:[#allocation2 + $0x352] sm:$0xff] }
 0x2d3   : > { %v2691_v61 = vpop.f32.mrf.mxu0  ;;  %v2852_v56 = vpop.f32.mrf.mxu1  ;;  %3043 = vmatmul.mubr.bf16.gmra.mxu1 %v1140_v49  ;;  %4734 = vmatmul.mubr.bf16.gmra.mxu0 %v1330_v40  ;;  %v1141_v40 = vpack.c.bf16 %v1108_v55, %v1107_v31  ;;  %v1110_v55 = vld [vmem:[#allocation2 + $0x350] sm:$0xff] }
 0x2d4   : > { %v6538_v2 = vadd.f32 %v2691_v61, %v8415_v46  ;;  %v6541_v53 = vadd.f32 %v2852_v56, %v8416_v4  ;;  %3050 = vmatprep.mubr.bf16.mxu1 %v6352_v59  ;;  %4737 = vmatprep.mubr.bf16.mxu0 %v1331_v52  ;;  %v1238_v56 = vpack.c.bf16 %v1206_v32, %v1205_v47  ;;  %v1109_v46 = vld [vmem:[#allocation2 + $0x348] sm:$0xff] }
 0x2d5   : > { %v2693_v26 = vpop.f32.mrf.mxu0  ;;  %v2854_v17 = vpop.f32.mrf.mxu1 }
 0x2d6   : > { %v8417_v17 = vld [vmem:[#allocation32_spill] sm:$0xff] }
 0x2d7   : > { %v2694_v5 = vpop.f32.mrf.mxu0  ;;  %v2855_v49 = vpop.f32.mrf.mxu1 }
 0x2d8   : > { %v6545_v57 = vadd.f32 %v2694_v5, %v6337_v16  ;;  %v6548_v4 = vadd.f32 %v2855_v49, %v6340_v27  ;;  %v8418_v16 = vld [vmem:[#allocation41_spill] sm:$0xff]  ;;  %v1301_v27 = vld [vmem:[#allocation2 + $0x34a] sm:$0xff]  ;;  %v1142_v49 = vpack.c.bf16 %v1110_v55, %v1109_v46 }
 0x2d9   : > { %v2696_v59 = vpop.f32.mrf.mxu0  ;;  %v2857_v52 = vpop.f32.mrf.mxu1 }
 0x2db   : > { %v2699_v39 = vpop.f32.mrf.mxu0  ;;  %v2860_v61 = vpop.f32.mrf.mxu1  ;;  %3051 = vmatmul.mubr.bf16.gmra.mxu1 %v1141_v40  ;;  %4738 = vmatmul.mubr.bf16.gmra.mxu0 %v1332_v29  ;;  %v1334_v40 = vpack.c.bf16 %v1302_v51, %v1301_v27 }
 0x2dc   : > { %v6551_v26 = vadd.f32 %v2699_v39, %v6346_v8  ;;  %v6554_v31 = vadd.f32 %v2860_v61, %v8417_v17  ;;  %3058 = vmatprep.mubr.bf16.mxu1 %v1238_v56  ;;  %4741 = vmatprep.mubr.bf16.mxu0 %v8418_v16  ;;  %v8419_v17 = vld [vmem:[#allocation33_spill] sm:$0xff] }
 0x2dd   : > { %v2701_v0 = vpop.f32.mrf.mxu0  ;;  %v2862_v47 = vpop.f32.mrf.mxu1 }
 0x2df   : > { %v2702_v32 = vpop.f32.mrf.mxu0  ;;  %v2863_v5 = vpop.f32.mrf.mxu1 }
 0x2e0   : > { %v6558_v29 = vadd.f32 %v2702_v32, %v6355_v41  ;;  %v6561_v8 = vadd.f32 %v2863_v5, %v6358_v43  ;;  %v8420_v32 = vld [vmem:[#allocation7_spill] sm:$0xff] }
 0x2e1   : > { %v2704_v59 = vpop.f32.mrf.mxu0  ;;  %v2865_v52 = vpop.f32.mrf.mxu1  ;;  %v2427_v5 = vadd.f32 %v6374_v18, %v8420_v32 }
 0x2e3   : > { %v2707_v56 = vpop.f32.mrf.mxu0  ;;  %v2868_v39 = vpop.f32.mrf.mxu1  ;;  %3059 = vmatmul.mubr.bf16.gmra.mxu1 %v1142_v49  ;;  %4742 = vmatmul.mubr.bf16.gmra.mxu0 %v1334_v40 }
 0x2e4   : > { %v6564_v61 = vadd.f32 %v2707_v56, %v6362_v25  ;;  %v6567_v16 = vadd.f32 %v2868_v39, %v8419_v17  ;;  %v8421_v39 = vld [vmem:[#allocation8_spill] sm:$0xff] }
 0x2e5   : > { %v2709_v46 = vpop.f32.mrf.mxu0  ;;  %v2870_v55 = vpop.f32.mrf.mxu1 }
 0x2e7   : > { %v2710_v27 = vpop.f32.mrf.mxu0  ;;  %v2871_v41 = vpop.f32.mrf.mxu1 }
 0x2e8   : > { %v6570_v51 = vadd.f32 %v2710_v27, %v6369_v63  ;;  %v6573_v43 = vadd.f32 %v2871_v41, %v6372_v36  ;;  %v2430_v63 = vadd.f32 %v6380_v44, %v8421_v39  ;;  %v8423_v41 = vld [vmem:[#allocation9_spill] sm:$0xff] }
 0x2e9   : > { %v2712_v0 = vpop.f32.mrf.mxu0  ;;  %v2873_v47 = vpop.f32.mrf.mxu1 }
 0x2ea   : > { %v2435_v0 = vadd.f32 %v6385_v10, %v8423_v41 }
 0x2eb   : > { %v2715_v25 = vpop.f32.mrf.mxu0  ;;  %v2876_v49 = vpop.f32.mrf.mxu1 }
 0x2ec   : > { %v6577_v40 = vadd.f32 %v2715_v25, %v2427_v5  ;;  %v6580_v59 = vadd.f32 %v2876_v49, %v6377_v13  ;;  %v8424_v5 = vld [vmem:[#allocation34_spill] sm:$0xff] }
 0x2ed   : > { %v2717_v52 = vpop.f32.mrf.mxu0  ;;  %v2878_v56 = vpop.f32.mrf.mxu1 }
 0x2ee   : > { %v8425_v52 = vld [vmem:[#allocation10_spill] sm:$0xff] }
 0x2ef   : > { %v2718_v17 = vpop.f32.mrf.mxu0  ;;  %v2879_v36 = vpop.f32.mrf.mxu1  ;;  %v2438_v56 = vadd.f32 %v6391_v1, %v8425_v52  ;;  %v8430_v52 = vld [vmem:[#allocation12_spill] sm:$0xff] }
 0x2f0   : > { %v6584_v46 = vadd.f32 %v2718_v17, %v2430_v63  ;;  %v6587_v55 = vadd.f32 %v2879_v36, %v6383_v23 }
 0x2f1   : > { %v2720_v18 = vpop.f32.mrf.mxu0  ;;  %v2881_v27 = vpop.f32.mrf.mxu1 }
 0x2f2   : > { %8422 = vst [vmem:[#allocation29_spill] sm:$0xff] %v6584_v46  ;;  %v8426_v18 = vld [vmem:[#allocation11_spill] sm:$0xff]  ;;  %v8427_v27 = vld [vmem:[#allocation42_spill] sm:$0xff] }
 0x2f3   : > { %v2723_v47 = vpop.f32.mrf.mxu0  ;;  %v2884_v13 = vpop.f32.mrf.mxu1  ;;  %v2443_v41 = vadd.f32 %v8427_v27, %v8426_v18  ;;  %v8432_v27 = vld [vmem:[#allocation13_spill] sm:$0xff]  ;;  %v8436_v46 = vld [vmem:[#allocation14_spill] sm:$0xff] }
 0x2f4   : > { %v6591_v32 = vadd.f32 %v2723_v47, %v2435_v0  ;;  %v6594_v25 = vadd.f32 %v2884_v13, %v8424_v5  ;;  %v8429_v5 = vld [vmem:[#allocation35_spill] sm:$0xff] }
 0x2f5   : > { %v2725_v44 = vpop.f32.mrf.mxu0  ;;  %v2886_v49 = vpop.f32.mrf.mxu1 }
 0x2f7   : > { %v2726_v39 = vpop.f32.mrf.mxu0  ;;  %v2887_v23 = vpop.f32.mrf.mxu1 }
 0x2f8   : > { %v6598_v63 = vadd.f32 %v2726_v39, %v2438_v56  ;;  %v6601_v17 = vadd.f32 %v2887_v23, %v6394_v45  ;;  %v2446_v56 = vadd.f32 %v6402_v62, %v8430_v52 }
 0x2f9   : > { %v2728_v10 = vpop.f32.mrf.mxu0  ;;  %v2889_v36 = vpop.f32.mrf.mxu1 }
 0x2fb   : > { %v2731_v0 = vpop.f32.mrf.mxu0  ;;  %v2892_v47 = vpop.f32.mrf.mxu1 }
 0x2fc   : > { %v6605_v13 = vadd.f32 %v2731_v0, %v2443_v41  ;;  %v6608_v44 = vadd.f32 %v2892_v47, %v8429_v5  ;;  %v8433_v41 = vld [vmem:[#allocation43_spill] sm:$0xff] }
 0x2fd   : > { %v2733_v1 = vpop.f32.mrf.mxu0  ;;  %v2894_v49 = vpop.f32.mrf.mxu1  ;;  %v2451_v0 = vadd.f32 %v8433_v41, %v8432_v27  ;;  %v8437_v41 = vld [vmem:[#allocation15_spill] sm:$0xff] }
 0x2fe   : > { %8428 = vst [vmem:[#allocation26_spill] sm:$0xff] %v6605_v13  ;;  %v8435_v1 = vld [vmem:[#allocation36_spill] sm:$0xff] }
 0x2ff   : > { %v2734_v39 = vpop.f32.mrf.mxu0  ;;  %v2895_v45 = vpop.f32.mrf.mxu1 }
 0x300   : > { %v6612_v23 = vadd.f32 %v2734_v39, %v2446_v56  ;;  %v6615_v10 = vadd.f32 %v2895_v45, %v6405_v50  ;;  %v2454_v56 = vadd.f32 %v6413_v38, %v8436_v46 }
 0x301   : > { %v2736_v36 = vpop.f32.mrf.mxu0  ;;  %v2897_v18 = vpop.f32.mrf.mxu1 }
 0x302   : > { %8431 = vst [vmem:[#allocation27_spill] sm:$0xff] %v6612_v23 }
 0x303   : > { %v2739_v13 = vpop.f32.mrf.mxu0  ;;  %v2900_v47 = vpop.f32.mrf.mxu1 }
 0x304   : > { %v6619_v5 = vadd.f32 %v2739_v13, %v2451_v0  ;;  %v6622_v49 = vadd.f32 %v2900_v47, %v8435_v1  ;;  %v8438_v13 = vld [vmem:[#allocation44_spill] sm:$0xff] }
 0x305   : > { %v2741_v62 = vpop.f32.mrf.mxu0  ;;  %v2902_v52 = vpop.f32.mrf.mxu1  ;;  %v2459_v0 = vadd.f32 %v8438_v13, %v8437_v41  ;;  %v8443_v13 = vld [vmem:[#allocation17_spill] sm:$0xff] }
 0x306   : > { %8434 = vst [vmem:[#allocation30_spill] sm:$0xff] %v6619_v5  ;;  %v8440_v62 = vld [vmem:[#allocation37_spill] sm:$0xff]  ;;  %v8441_v5 = vld [vmem:[#allocation16_spill] sm:$0xff] }
 0x307   : > { %v2742_v39 = vpop.f32.mrf.mxu0  ;;  %v2903_v50 = vpop.f32.mrf.mxu1 }
 0x308   : > { %v6626_v45 = vadd.f32 %v2742_v39, %v2454_v56  ;;  %v6629_v36 = vadd.f32 %v2903_v50, %v6416_v21  ;;  %v2462_v56 = vadd.f32 %v6424_v9, %v8441_v5 }
 0x309   : > { %v2744_v18 = vpop.f32.mrf.mxu0  ;;  %v2905_v27 = vpop.f32.mrf.mxu1 }
 0x30b   : > { %v2747_v23 = vpop.f32.mrf.mxu0  ;;  %v2908_v47 = vpop.f32.mrf.mxu1 }
 0x30c   : > { %v6633_v1 = vadd.f32 %v2747_v23, %v2459_v0  ;;  %v6636_v52 = vadd.f32 %v2908_v47, %v8440_v62  ;;  %v2467_v23 = vadd.f32 %v6429_v6, %v8443_v13  ;;  %v8447_v13 = vld [vmem:[#allocation19_spill] sm:$0xff] }
 0x30d   : > { %v2749_v38 = vpop.f32.mrf.mxu0  ;;  %v2910_v46 = vpop.f32.mrf.mxu1 }
 0x30e   : > { %8439 = vst [vmem:[#allocation31_spill] sm:$0xff] %v6633_v1  ;;  %v8444_v38 = vld [vmem:[#allocation38_spill] sm:$0xff] }
 0x30f   : > { %v2750_v39 = vpop.f32.mrf.mxu0  ;;  %v2911_v21 = vpop.f32.mrf.mxu1  ;;  %v8445_v1 = vld [vmem:[#allocation18_spill] sm:$0xff] }
 0x310   : > { %v6640_v50 = vadd.f32 %v2750_v39, %v2462_v56  ;;  %v6643_v18 = vadd.f32 %v2911_v21, %v6427_v30  ;;  %v8446_v56 = vld [vmem:[#allocation45_spill] sm:$0xff] }
 0x311   : > { %v2752_v27 = vpop.f32.mrf.mxu0  ;;  %v2913_v41 = vpop.f32.mrf.mxu1  ;;  %v2470_v39 = vadd.f32 %v8446_v56, %v8445_v1  ;;  %v8450_v56 = vld [vmem:[#allocation39_spill] sm:$0xff] }
 0x312   : > { %8442 = vst [vmem:[#allocation32_spill] sm:$0xff] %v6640_v50 }
 0x313   : > { %v2755_v0 = vpop.f32.mrf.mxu0  ;;  %v2916_v47 = vpop.f32.mrf.mxu1 }
 0x314   : > { %v6647_v62 = vadd.f32 %v2755_v0, %v2467_v23  ;;  %v6650_v46 = vadd.f32 %v2916_v47, %v8444_v38  ;;  %v2475_v23 = vadd.f32 %v6440_v24, %v8447_v13 }
 0x315   : > { %v2757_v9 = vpop.f32.mrf.mxu0  ;;  %v2918_v5 = vpop.f32.mrf.mxu1 }
 0x317   : > { %v2758_v50 = vpop.f32.mrf.mxu0  ;;  %v2919_v30 = vpop.f32.mrf.mxu1 }
 0x318   : > { %v6654_v21 = vadd.f32 %v2758_v50, %v2470_v39  ;;  %v6657_v27 = vadd.f32 %v2919_v30, %v6438_v33  ;;  %v8449_v50 = vld [vmem:[#allocation20_spill] sm:$0xff] }
 0x319   : > { %v2760_v6 = vpop.f32.mrf.mxu0  ;;  %v2921_v41 = vpop.f32.mrf.mxu1  ;;  %v2478_v39 = vadd.f32 %v8450_v56, %v8449_v50 }
 0x31b   : > { %v2763_v0 = vpop.f32.mrf.mxu0  ;;  %v2924_v47 = vpop.f32.mrf.mxu1 }
 0x31c   : > { %v6661_v38 = vadd.f32 %v2763_v0, %v2475_v23  ;;  %v6664_v9 = vadd.f32 %v2924_v47, %v6444_v48  ;;  %v8452_v23 = vld [vmem:[#allocation21_spill] sm:$0xff] }
 0x31d   : > { %v2765_v1 = vpop.f32.mrf.mxu0  ;;  %v2926_v5 = vpop.f32.mrf.mxu1  ;;  %v2483_v0 = vadd.f32 %v6454_v28, %v8452_v23 }
 0x31e   : > { %8448 = vst [vmem:[#allocation41_spill] sm:$0xff] %v6661_v38  ;;  %v8453_v1 = vld [vmem:[#allocation40_spill] sm:$0xff] }
 0x31f   : > { %v2766_v33 = vpop.f32.mrf.mxu0  ;;  %v2927_v30 = vpop.f32.mrf.mxu1 }
 0x320   : > { %v6668_v6 = vadd.f32 %v2766_v33, %v2478_v39  ;;  %v6671_v41 = vadd.f32 %v2927_v30, %v6452_v7  ;;  %v8454_v39 = vld [vmem:[#allocation22_spill] sm:$0xff] }
 0x321   : > { %v2768_v24 = vpop.f32.mrf.mxu0  ;;  %v2929_v13 = vpop.f32.mrf.mxu1  ;;  %v8455_v7 = vld [vmem:[#allocation46_spill] sm:$0xff] }
 0x322   : > { %8451 = vst [vmem:[#allocation33_spill] sm:$0xff] %v6668_v6  ;;  %v2486_v33 = vadd.f32 %v8455_v7, %v8454_v39 }
 0x323   : > { %v2771_v38 = vpop.f32.mrf.mxu0  ;;  %v2932_v48 = vpop.f32.mrf.mxu1 }
 0x324   : > { %v6675_v47 = vadd.f32 %v2771_v38, %v2483_v0  ;;  %v6678_v5 = vadd.f32 %v2932_v48, %v8453_v1 }
 0x325   : > { %v2773_v50 = vpop.f32.mrf.mxu0  ;;  %v2934_v56 = vpop.f32.mrf.mxu1 }
 0x326   : > { %v4906_v56 = vld [vmem:[#allocation3 + $0xd8] sm:%s6690_s11] }
 0x327   : > { %v2774_v30 = vpop.f32.mrf.mxu0  ;;  %v2935_v24 = vpop.f32.mrf.mxu1 }
 0x328   : > { %v6685_v13 = vadd.f32 %v2774_v30, %v2486_v33  ;;  %v6688_v28 = vadd.f32 %v2935_v24, %v6464_v60  ;;  %v8458_v33 = vld [vmem:[#allocation47_spill] sm:$0xff]  ;;  %v4909_v24 = vld [vmem:[#allocation3 + $0xb0] sm:%s6690_s11] }
 0x329   : > { %v2776_v38 = vpop.f32.mrf.mxu0  ;;  %v2937_v23 = vpop.f32.mrf.mxu1 }
 0x32a   : > { %8456 = vst [vmem:[#allocation7_spill] sm:$0xff] %v6685_v13 }
 0x32b   : > { %v2940_v0 = vpop.f32.mrf.mxu1  ;;  %v4683_v48 = vpop.f32.mrf.mxu0 }
 0x32c   : > { %v6693_v1 = vadd.f32 %v2940_v0, %v6471_v15  ;;  %v3110_v50 = vadd.f32 %v4683_v48, %v6489_v58  ;;  %v4912_v0 = vld [vmem:[#allocation3 + $0x18] sm:%s6690_s11] }
 0x32d   : > { %v2942_v39 = vpop.f32.mrf.mxu1  ;;  %v3101_v7 = vpop.f32.mrf.mxu0 }
 0x32e   : > { %v6697_v60 = vmax.f32 %v3110_v50, 0.0  ;;  %v3102_v30 = vadd.f32 %v3101_v7, %v8458_v33  ;;  %v4915_v33 = vld [vmem:[#allocation3 + $0x1b0] sm:%s6690_s11] }
 0x32f   : > { %v2943_v13 = vpop.f32.mrf.mxu1  ;;  %v4684_v38 = vpop.f32.mrf.mxu0 }
 0x330   : > { %8457 = vst [vmem:[#allocation8_spill] sm:$0xff] %v6697_v60  ;;  %v6702_v23 = vadd.f32 %v4906_v56, %v6697_v60  ;;  %v6704_v6 = vmax.f32 %v3102_v30, 0.0  ;;  %v6707_v15 = vadd.f32 %v2943_v13, %v6480_v19  ;;  %v3113_v58 = vadd.f32 %v4684_v38, %v6496_v42 }
 0x331   : > { %v2945_v48 = vpop.f32.mrf.mxu1  ;;  %v3104_v50 = vpop.f32.mrf.mxu0 }
 0x332   : > { %8459 = vst [vmem:[#allocation9_spill] sm:$0xff] %v6702_v23  ;;  %8460 = vst [vmem:[#allocation34_spill] sm:$0xff] %v6704_v6  ;;  %v6712_v39 = vadd.f32 %v4909_v24, %v6704_v6  ;;  %v6714_v7 = vmax.f32 %v3113_v58, 0.0  ;;  %v3105_v56 = vadd.f32 %v3104_v50, %v6483_v3  ;;  %v4918_v24 = vld [vmem:[#allocation3 + $0x130] sm:%s6690_s11] }
 0x333   : > { %v2948_v30 = vpop.f32.mrf.mxu1  ;;  %v4687_v60 = vpop.f32.mrf.mxu0  ;;  %v4921_v50 = vld [vmem:[#allocation3 + $0x50] sm:%s6690_s11] }
 0x334   : > { %8461 = vst [vmem:[#allocation10_spill] sm:$0xff] %v6712_v39  ;;  %8462 = vst [vmem:[#allocation11_spill] sm:$0xff] %v6714_v7  ;;  %v6719_v23 = vadd.f32 %v4912_v0, %v6714_v7  ;;  %v6721_v19 = vmax.f32 %v3105_v56, 0.0  ;;  %v6724_v42 = vadd.f32 %v2948_v30, %v6486_v20  ;;  %v3126_v13 = vadd.f32 %v4687_v60, %v6515_v54 }
 0x335   : > { %v2950_v38 = vpop.f32.mrf.mxu1  ;;  %v3117_v58 = vpop.f32.mrf.mxu0 }
 0x336   : > { %8463 = vst [vmem:[#allocation42_spill] sm:$0xff] %v6719_v23  ;;  %8464 = vst [vmem:[#allocation35_spill] sm:$0xff] %v6721_v19  ;;  %v6729_v48 = vadd.f32 %v4915_v33, %v6721_v19  ;;  %v6731_v3 = vmax.f32 %v3126_v13, 0.0  ;;  %v3118_v0 = vadd.f32 %v3117_v58, %v6502_v37  ;;  %v4924_v33 = vld [vmem:[#allocation3 + $0x48] sm:%s6690_s11] }
 0x337   : > { %v2951_v56 = vpop.f32.mrf.mxu1  ;;  %v4688_v7 = vpop.f32.mrf.mxu0  ;;  %v4927_v58 = vld [vmem:[#allocation3 + $0x168] sm:%s6690_s11] }
 0x338   : > { %8465 = vst [vmem:[#allocation12_spill] sm:$0xff] %v6729_v48  ;;  %8466 = vst [vmem:[#allocation13_spill] sm:$0xff] %v6731_v3  ;;  %v6736_v6 = vadd.f32 %v4918_v24, %v6731_v3  ;;  %v6738_v20 = vmax.f32 %v3118_v0, 0.0  ;;  %v6741_v54 = vadd.f32 %v2951_v56, %v6493_v34  ;;  %v3129_v60 = vadd.f32 %v4688_v7, %v6522_v11  ;;  %v8473_v11 = vld [vmem:[#allocation48_spill] sm:$0xff]  ;;  %v4930_v56 = vld [vmem:[#allocation3 + $0x118] sm:%s6690_s11] }
 0x339   : > { %v2953_v30 = vpop.f32.mrf.mxu1  ;;  %v3120_v13 = vpop.f32.mrf.mxu0 }
 0x33a   : > { %8467 = vst [vmem:[#allocation43_spill] sm:$0xff] %v6736_v6  ;;  %8468 = vst [vmem:[#allocation36_spill] sm:$0xff] %v6738_v20  ;;  %v6746_v38 = vadd.f32 %v4921_v50, %v6738_v20  ;;  %v6748_v37 = vmax.f32 %v3129_v60, 0.0  ;;  %v3121_v24 = vadd.f32 %v3120_v13, %v6509_v35  ;;  %v4933_v13 = vld [vmem:[#allocation3 + $0x180] sm:%s6690_s11] }
 0x33b   : > { %v2956_v0 = vpop.f32.mrf.mxu1  ;;  %v4691_v3 = vpop.f32.mrf.mxu0 }
 0x33c   : > { %8469 = vst [vmem:[#allocation14_spill] sm:$0xff] %v6746_v38  ;;  %8470 = vst [vmem:[#allocation15_spill] sm:$0xff] %v6748_v37  ;;  %v6753_v19 = vadd.f32 %v4924_v33, %v6748_v37  ;;  %v6755_v34 = vmax.f32 %v3121_v24, 0.0  ;;  %v6758_v7 = vadd.f32 %v2956_v0, %v8473_v11  ;;  %v3142_v50 = vadd.f32 %v4691_v3, %v6541_v53  ;;  %v8478_v53 = vld [vmem:[#allocation25_spill] sm:$0xff] }
 0x33d   : > { %v2958_v30 = vpop.f32.mrf.mxu1  ;;  %v3133_v60 = vpop.f32.mrf.mxu0  ;;  %v4936_v11 = vld [vmem:[#allocation3 + $0x98] sm:%s6690_s11] }
 0x33e   : > { %8471 = vst [vmem:[#allocation44_spill] sm:$0xff] %v6753_v19  ;;  %8472 = vst [vmem:[#allocation37_spill] sm:$0xff] %v6755_v34  ;;  %v6763_v20 = vadd.f32 %v4927_v58, %v6755_v34  ;;  %v6765_v35 = vmax.f32 %v3142_v50, 0.0  ;;  %v3134_v33 = vadd.f32 %v3133_v60, %v6528_v12  ;;  %v4939_v60 = vld [vmem:[#allocation3 + $0x110] sm:%s6690_s11] }
 0x33f   : > { %v2959_v24 = vpop.f32.mrf.mxu1  ;;  %v4692_v37 = vpop.f32.mrf.mxu0 }
 0x340   : > { %8474 = vst [vmem:[#allocation16_spill] sm:$0xff] %v6763_v20  ;;  %8475 = vst [vmem:[#allocation17_spill] sm:$0xff] %v6765_v35  ;;  %v6770_v19 = vadd.f32 %v4930_v56, %v6765_v35  ;;  %v6772_v0 = vmax.f32 %v3134_v33, 0.0  ;;  %v6775_v3 = vadd.f32 %v2959_v24, %v8478_v53  ;;  %v3145_v58 = vadd.f32 %v4692_v37, %v6548_v4  ;;  %v8483_v4 = vld [vmem:[#allocation23_spill] sm:$0xff] }
 0x341   : > { %v2961_v30 = vpop.f32.mrf.mxu1  ;;  %v3136_v50 = vpop.f32.mrf.mxu0  ;;  %v4942_v53 = vld [vmem:[#allocation3 + $0x108] sm:%s6690_s11] }
 0x342   : > { %8476 = vst [vmem:[#allocation38_spill] sm:$0xff] %v6770_v19  ;;  %8477 = vst [vmem:[#allocation18_spill] sm:$0xff] %v6772_v0  ;;  %v6780_v34 = vadd.f32 %v4933_v13, %v6772_v0  ;;  %v6782_v12 = vmax.f32 %v3145_v58, 0.0  ;;  %v3137_v56 = vadd.f32 %v3136_v50, %v6535_v22  ;;  %v4945_v50 = vld [vmem:[#allocation3 + $0x120] sm:%s6690_s11] }
 0x343   : > { %v2964_v33 = vpop.f32.mrf.mxu1  ;;  %v4695_v35 = vpop.f32.mrf.mxu0 }
 0x344   : > { %8479 = vst [vmem:[#allocation45_spill] sm:$0xff] %v6780_v34  ;;  %8480 = vst [vmem:[#allocation19_spill] sm:$0xff] %v6782_v12  ;;  %v6787_v19 = vadd.f32 %v4936_v11, %v6782_v12  ;;  %v6789_v24 = vmax.f32 %v3137_v56, 0.0  ;;  %v6792_v37 = vadd.f32 %v2964_v33, %v8483_v4  ;;  %v3158_v13 = vadd.f32 %v4695_v35, %v6567_v16  ;;  %v8488_v16 = vld [vmem:[#allocation24_spill] sm:$0xff]  ;;  %v4948_v4 = vld [vmem:[#allocation3 + $0x60] sm:%s6690_s11] }
 0x345   : > { %v2966_v30 = vpop.f32.mrf.mxu1  ;;  %v3149_v58 = vpop.f32.mrf.mxu0 }
 0x346   : > { %8481 = vst [vmem:[#allocation20_spill] sm:$0xff] %v6787_v19  ;;  %8482 = vst [vmem:[#allocation39_spill] sm:$0xff] %v6789_v24  ;;  %v6797_v0 = vadd.f32 %v4939_v60, %v6789_v24  ;;  %v6799_v22 = vmax.f32 %v3158_v13, 0.0  ;;  %v3150_v11 = vadd.f32 %v3149_v58, %v6554_v31  ;;  %v4951_v58 = vld [vmem:[#allocation3 + $0x150] sm:%s6690_s11] }
 0x347   : > { %v2967_v56 = vpop.f32.mrf.mxu1  ;;  %v4696_v12 = vpop.f32.mrf.mxu0 }
 0x348   : > { %8484 = vst [vmem:[#allocation21_spill] sm:$0xff] %v6797_v0  ;;  %8485 = vst [vmem:[#allocation40_spill] sm:$0xff] %v6799_v22  ;;  %v6804_v19 = vadd.f32 %v4942_v53, %v6799_v22  ;;  %v6806_v33 = vmax.f32 %v3150_v11, 0.0  ;;  %v6809_v35 = vadd.f32 %v2967_v56, %v8488_v16  ;;  %v3161_v60 = vadd.f32 %v4696_v12, %v6573_v43  ;;  %v8493_v43 = vld [vmem:[#allocation28_spill] sm:$0xff]  ;;  %v4954_v16 = vld [vmem:[#allocation3 + $0x138] sm:%s6690_s11] }
 0x349   : > { %v2969_v30 = vpop.f32.mrf.mxu1  ;;  %v3152_v13 = vpop.f32.mrf.mxu0 }
 0x34a   : > { %8486 = vst [vmem:[#allocation22_spill] sm:$0xff] %v6804_v19  ;;  %8487 = vst [vmem:[#allocation46_spill] sm:$0xff] %v6806_v33  ;;  %v6814_v24 = vadd.f32 %v4945_v50, %v6806_v33  ;;  %v6816_v31 = vmax.f32 %v3161_v60, 0.0  ;;  %v3153_v53 = vadd.f32 %v3152_v13, %v6561_v8  ;;  %v4957_v13 = vld [vmem:[#allocation3 + $0xe0] sm:%s6690_s11] }
 0x34b   : > { %v2972_v11 = vpop.f32.mrf.mxu1  ;;  %v4699_v22 = vpop.f32.mrf.mxu0 }
 0x34c   : > { %8489 = vst [vmem:[#allocation47_spill] sm:$0xff] %v6814_v24  ;;  %8490 = vst [vmem:[#allocation48_spill] sm:$0xff] %v6816_v31  ;;  %v6821_v19 = vadd.f32 %v4948_v4, %v6816_v31  ;;  %v6823_v56 = vmax.f32 %v3153_v53, 0.0  ;;  %v6826_v12 = vadd.f32 %v2972_v11, %v8493_v43  ;;  %v3174_v50 = vadd.f32 %v4699_v22, %v6594_v25 }
 0x34d   : > { %v2974_v30 = vpop.f32.mrf.mxu1  ;;  %v3165_v60 = vpop.f32.mrf.mxu0 }
 0x34e   : > { %8491 = vst [vmem:[#allocation25_spill] sm:$0xff] %v6821_v19  ;;  %8492 = vst [vmem:[#allocation23_spill] sm:$0xff] %v6823_v56  ;;  %v6831_v33 = vadd.f32 %v4951_v58, %v6823_v56  ;;  %v6833_v8 = vmax.f32 %v3174_v50, 0.0  ;;  %v3166_v4 = vadd.f32 %v3165_v60, %v6580_v59  ;;  %v4960_v58 = vld [vmem:[#allocation3 + $0x140] sm:%s6690_s11]  ;;  %v4963_v60 = vld [vmem:[#allocation3 + $0x188] sm:%s6690_s11] }
 0x34f   : > { %v2975_v53 = vpop.f32.mrf.mxu1  ;;  %v4700_v31 = vpop.f32.mrf.mxu0 }
 0x350   : > { %8494 = vst [vmem:[#allocation24_spill] sm:$0xff] %v6831_v33  ;;  %8495 = vst [vmem:[#allocation28_spill] sm:$0xff] %v6833_v8  ;;  %v6838_v19 = vadd.f32 %v4954_v16, %v6833_v8  ;;  %v6840_v11 = vmax.f32 %v3166_v4, 0.0  ;;  %v6843_v25 = vadd.f32 %v2975_v53, %v6532_v14  ;;  %v3177_v22 = vadd.f32 %v4700_v31, %v6601_v17 }
 0x351   : > { %v2977_v43 = vpop.f32.mrf.mxu1  ;;  %v3168_v50 = vpop.f32.mrf.mxu0 }
 0x352   : > { %8496 = vst [vmem:[#allocation49_spill] sm:$0xff] %v6838_v19  ;;  %8497 = vst [vmem:[#allocation50_spill] sm:$0xff] %v6840_v11  ;;  %v6848_v30 = vadd.f32 %v4957_v13, %v6840_v11  ;;  %v6850_v59 = vmax.f32 %v3177_v22, 0.0  ;;  %v3169_v16 = vadd.f32 %v3168_v50, %v6587_v55  ;;  %v4966_v13 = vld [vmem:[#allocation3 + $0x1b8] sm:%s6690_s11]  ;;  %v4969_v50 = vld [vmem:[#allocation3 + $0x80] sm:%s6690_s11] }
 0x353   : > { %v2980_v4 = vpop.f32.mrf.mxu1  ;;  %v4703_v8 = vpop.f32.mrf.mxu0 }
 0x354   : > { %8498 = vst [vmem:[#allocation51_spill] sm:$0xff] %v6848_v30  ;;  %8499 = vst [vmem:[#allocation52_spill] sm:$0xff] %v6850_v59  ;;  %v6855_v56 = vadd.f32 %v4960_v58, %v6850_v59  ;;  %v6857_v14 = vmax.f32 %v3169_v16, 0.0  ;;  %v6860_v17 = vadd.f32 %v2980_v4, %v6538_v2  ;;  %v3190_v31 = vadd.f32 %v4703_v8, %v6622_v49 }
 0x355   : > { %v2982_v53 = vpop.f32.mrf.mxu1  ;;  %v3181_v22 = vpop.f32.mrf.mxu0 }
 0x356   : > { %8500 = vst [vmem:[#allocation53_spill] sm:$0xff] %v6855_v56  ;;  %8501 = vst [vmem:[#allocation54_spill] sm:$0xff] %v6857_v14  ;;  %v6865_v43 = vadd.f32 %v4963_v60, %v6857_v14  ;;  %v6867_v55 = vmax.f32 %v3190_v31, 0.0  ;;  %v3182_v58 = vadd.f32 %v3181_v22, %v6608_v44  ;;  %v4972_v60 = vld [vmem:[#allocation3 + $0x28] sm:%s6690_s11] }
 0x357   : > { %v2983_v16 = vpop.f32.mrf.mxu1  ;;  %v4704_v59 = vpop.f32.mrf.mxu0  ;;  %v4975_v22 = vld [vmem:[#allocation3 + $0x1a8] sm:%s6690_s11] }
 0x358   : > { %8502 = vst [vmem:[#allocation55_spill] sm:$0xff] %v6865_v43  ;;  %8503 = vst [vmem:[#allocation56_spill] sm:$0xff] %v6867_v55  ;;  %v6872_v11 = vadd.f32 %v4966_v13, %v6867_v55  ;;  %v6874_v2 = vmax.f32 %v3182_v58, 0.0  ;;  %v6877_v49 = vadd.f32 %v2983_v16, %v6545_v57  ;;  %v3193_v8 = vadd.f32 %v4704_v59, %v6629_v36 }
 0x359   : > { %v2985_v4 = vpop.f32.mrf.mxu1  ;;  %v3184_v31 = vpop.f32.mrf.mxu0 }
 0x35a   : > { %8504 = vst [vmem:[#allocation57_spill] sm:$0xff] %v6872_v11  ;;  %8505 = vst [vmem:[#allocation58_spill] sm:$0xff] %v6874_v2  ;;  %v6882_v53 = vadd.f32 %v4969_v50, %v6874_v2  ;;  %v6884_v44 = vmax.f32 %v3193_v8, 0.0  ;;  %v3185_v13 = vadd.f32 %v3184_v31, %v6615_v10  ;;  %v4978_v50 = vld [vmem:[#allocation3 + $0x160] sm:%s6690_s11]  ;;  %v4981_v31 = vld [vmem:[#allocation3 + $0x1e8] sm:%s6690_s11] }
 0x35b   : > { %v2988_v58 = vpop.f32.mrf.mxu1  ;;  %v4707_v55 = vpop.f32.mrf.mxu0 }
 0x35c   : > { %8506 = vst [vmem:[#allocation59_spill] sm:$0xff] %v6882_v53  ;;  %8507 = vst [vmem:[#allocation60_spill] sm:$0xff] %v6884_v44  ;;  %v6889_v14 = vadd.f32 %v4972_v60, %v6884_v44  ;;  %v6891_v57 = vmax.f32 %v3185_v13, 0.0  ;;  %v6894_v36 = vadd.f32 %v2988_v58, %v6551_v26  ;;  %v3206_v59 = vadd.f32 %v4707_v55, %v6650_v46 }
 0x35d   : > { %v2990_v16 = vpop.f32.mrf.mxu1  ;;  %v3197_v8 = vpop.f32.mrf.mxu0 }
 0x35e   : > { %8508 = vst [vmem:[#allocation61_spill] sm:$0xff] %v6889_v14  ;;  %8509 = vst [vmem:[#allocation62_spill] sm:$0xff] %v6891_v57  ;;  %v6899_v4 = vadd.f32 %v4975_v22, %v6891_v57  ;;  %v6901_v10 = vmax.f32 %v3206_v59, 0.0  ;;  %v3198_v60 = vadd.f32 %v3197_v8, %v6636_v52  ;;  %v4984_v22 = vld [vmem:[#allocation3 + $0x30] sm:%s6690_s11]  ;;  %v4987_v8 = vld [vmem:[#allocation3 + $0xf8] sm:%s6690_s11] }
 0x35f   : > { %v2991_v13 = vpop.f32.mrf.mxu1  ;;  %v4708_v44 = vpop.f32.mrf.mxu0 }
 0x360   : > { %8510 = vst [vmem:[#allocation63_spill] sm:$0xff] %v6899_v4  ;;  %8511 = vst [vmem:[#allocation64_spill] sm:$0xff] %v6901_v10  ;;  %v6906_v2 = vadd.f32 %v4978_v50, %v6901_v10  ;;  %v6908_v26 = vmax.f32 %v3198_v60, 0.0  ;;  %v6911_v46 = vadd.f32 %v2991_v13, %v6558_v29  ;;  %v3209_v55 = vadd.f32 %v4708_v44, %v6657_v27 }
 0x361   : > { %v2993_v58 = vpop.f32.mrf.mxu1  ;;  %v3200_v59 = vpop.f32.mrf.mxu0 }
 0x362   : > { %8512 = vst [vmem:[#allocation65_spill] sm:$0xff] %v6906_v2  ;;  %8513 = vst [vmem:[#allocation66_spill] sm:$0xff] %v6908_v26  ;;  %v6916_v16 = vadd.f32 %v4981_v31, %v6908_v26  ;;  %v6918_v52 = vmax.f32 %v3209_v55, 0.0  ;;  %v3201_v50 = vadd.f32 %v3200_v59, %v6643_v18  ;;  %v4990_v31 = vld [vmem:[#allocation3 + $0xf0] sm:%s6690_s11]  ;;  %v4993_v59 = vld [vmem:[#allocation3 + $0x1e0] sm:%s6690_s11] }
 0x363   : > { %v2996_v60 = vpop.f32.mrf.mxu1  ;;  %v4711_v10 = vpop.f32.mrf.mxu0 }
 0x364   : > { %8514 = vst [vmem:[#allocation67_spill] sm:$0xff] %v6916_v16  ;;  %8515 = vst [vmem:[#allocation68_spill] sm:$0xff] %v6918_v52  ;;  %v6923_v57 = vadd.f32 %v4984_v22, %v6918_v52  ;;  %v6925_v29 = vmax.f32 %v3201_v50, 0.0  ;;  %v6928_v27 = vadd.f32 %v2996_v60, %v6564_v61  ;;  %v3222_v44 = vadd.f32 %v4711_v10, %v6678_v5 }
 0x365   : > { %v2998_v13 = vpop.f32.mrf.mxu1  ;;  %v3213_v55 = vpop.f32.mrf.mxu0 }
 0x366   : > { %8516 = vst [vmem:[#allocation69_spill] sm:$0xff] %v6923_v57  ;;  %8517 = vst [vmem:[#allocation70_spill] sm:$0xff] %v6925_v29  ;;  %v6933_v58 = vadd.f32 %v4987_v8, %v6925_v29  ;;  %v6935_v18 = vmax.f32 %v3222_v44, 0.0  ;;  %v3214_v22 = vadd.f32 %v3213_v55, %v6664_v9  ;;  %v4996_v8 = vld [vmem:[#allocation3 + $0x8] sm:%s6690_s11]  ;;  %v4999_v55 = vld [vmem:[#allocation3] sm:%s6690_s11] }
 0x367   : > { %v2999_v50 = vpop.f32.mrf.mxu1  ;;  %v4712_v52 = vpop.f32.mrf.mxu0 }
 0x368   : > { %8518 = vst [vmem:[#allocation71_spill] sm:$0xff] %v6933_v58  ;;  %8519 = vst [vmem:[#allocation72_spill] sm:$0xff] %v6935_v18  ;;  %v6940_v26 = vadd.f32 %v4990_v31, %v6935_v18  ;;  %v6942_v61 = vmax.f32 %v3214_v22, 0.0  ;;  %v6945_v5 = vadd.f32 %v2999_v50, %v6570_v51  ;;  %v3225_v10 = vadd.f32 %v4712_v52, %v6688_v28  ;;  %v5002_v50 = vld [vmem:[#allocation3 + $0x100] sm:%s6690_s11] }
 0x369   : > { %v3001_v60 = vpop.f32.mrf.mxu1  ;;  %v3216_v44 = vpop.f32.mrf.mxu0 }
 0x36a   : > { %8520 = vst [vmem:[#allocation73_spill] sm:$0xff] %v6940_v26  ;;  %8521 = vst [vmem:[#allocation74_spill] sm:$0xff] %v6942_v61  ;;  %v6950_v9 = vadd.f32 %v4993_v59, %v6942_v61  ;;  %v6952_v13 = vmax.f32 %v3225_v10, 0.0  ;;  %v3217_v31 = vadd.f32 %v3216_v44, %v6671_v41  ;;  %v5005_v61 = vld [vmem:[#allocation3 + $0x148] sm:%s6690_s11] }
 0x36b   : > { %v6956_v18 = vpop.f32.mrf.mxu1  ;;  %v4715_v22 = vpop.f32.mrf.mxu0 }
 0x36c   : > { %8522 = vst [vmem:[#allocation75_spill] sm:$0xff] %v6950_v9  ;;  %8523 = vst [vmem:[#allocation76_spill] sm:$0xff] %v6952_v13  ;;  %v6959_v51 = vadd.f32 %v4996_v8, %v6952_v13  ;;  %v6961_v28 = vmax.f32 %v3217_v31, 0.0  ;;  %v3238_v52 = vadd.f32 %v4715_v22, %v6724_v42 }
 0x36d   : > { %v3006_v60 = vpop.f32.mrf.mxu1  ;;  %v3229_v59 = vpop.f32.mrf.mxu0 }
 0x36e   : > { %8524 = vst [vmem:[#allocation77_spill] sm:$0xff] %v6959_v51  ;;  %8525 = vst [vmem:[#allocation78_spill] sm:$0xff] %v6961_v28  ;;  %v6966_v10 = vadd.f32 %v4999_v55, %v6961_v28  ;;  %v6968_v41 = vmax.f32 %v3238_v52, 0.0  ;;  %v3230_v44 = vadd.f32 %v3229_v59, %v6693_v1  ;;  %v5008_v60 = vld [vmem:[#allocation3 + $0xc8] sm:%s6690_s11]  ;;  %v5011_v28 = vld [vmem:[#allocation3 + $0x1d0] sm:%s6690_s11] }
 0x36f   : > { %v6972_v29 = vpop.f32.mrf.mxu1  ;;  %v4716_v8 = vpop.f32.mrf.mxu0 }
 0x370   : > { %8526 = vst [vmem:[#allocation79_spill] sm:$0xff] %v6966_v10  ;;  %8527 = vst [vmem:[#allocation80_spill] sm:$0xff] %v6968_v41  ;;  %v6975_v31 = vadd.f32 %v5002_v50, %v6968_v41  ;;  %v6977_v42 = vmax.f32 %v3230_v44, 0.0  ;;  %v3241_v22 = vadd.f32 %v4716_v8, %v6741_v54  ;;  %v5014_v8 = vld [vmem:[#allocation3 + $0x20] sm:%s6690_s11] }
 0x371   : > { %v3009_v13 = vpop.f32.mrf.mxu1  ;;  %v3232_v55 = vpop.f32.mrf.mxu0 }
 0x372   : > { %8528 = vst [vmem:[#allocation81_spill] sm:$0xff] %v6975_v31  ;;  %8529 = vst [vmem:[#allocation82_spill] sm:$0xff] %v6977_v42  ;;  %v6982_v52 = vadd.f32 %v5005_v61, %v6977_v42  ;;  %v6984_v1 = vmax.f32 %v3241_v22, 0.0  ;;  %v3233_v59 = vadd.f32 %v3232_v55, %v6707_v15  ;;  %v5017_v42 = vld [vmem:[#allocation3 + $0x40] sm:%s6690_s11] }
 0x373   : > { %v6988_v51 = vpop.f32.mrf.mxu1  ;;  %v4719_v50 = vpop.f32.mrf.mxu0 }
 0x374   : > { %8530 = vst [vmem:[#allocation83_spill] sm:$0xff] %v6982_v52  ;;  %8531 = vst [vmem:[#allocation84_spill] sm:$0xff] %v6984_v1  ;;  %v6991_v44 = vadd.f32 %v5008_v60, %v6984_v1  ;;  %v6993_v54 = vmax.f32 %v3233_v59, 0.0  ;;  %v3254_v13 = vadd.f32 %v4719_v50, %v6792_v37  ;;  %v5020_v50 = vld [vmem:[#allocation3 + $0x128] sm:%s6690_s11] }
 0x375   : > { %v3014_v41 = vpop.f32.mrf.mxu1  ;;  %v3245_v61 = vpop.f32.mrf.mxu0 }
 0x376   : > { %8532 = vst [vmem:[#allocation85_spill] sm:$0xff] %v6991_v44  ;;  %8533 = vst [vmem:[#allocation86_spill] sm:$0xff] %v6993_v54  ;;  %v6998_v22 = vadd.f32 %v5011_v28, %v6993_v54  ;;  %v7000_v15 = vmax.f32 %v3254_v13, 0.0  ;;  %v3246_v55 = vadd.f32 %v3245_v61, %v6758_v7  ;;  %v5023_v54 = vld [vmem:[#allocation3 + $0x1f8] sm:%s6690_s11] }
 0x377   : > { %v7004_v31 = vpop.f32.mrf.mxu1  ;;  %v4720_v60 = vpop.f32.mrf.mxu0 }
 0x378   : > { %8534 = vst [vmem:[#allocation87_spill] sm:$0xff] %v6998_v22  ;;  %8535 = vst [vmem:[#allocation88_spill] sm:$0xff] %v7000_v15  ;;  %v7007_v59 = vadd.f32 %v5014_v8, %v7000_v15  ;;  %v7009_v37 = vmax.f32 %v3246_v55, 0.0  ;;  %v3257_v41 = vadd.f32 %v4720_v60, %v6809_v35  ;;  %v5026_v60 = vld [vmem:[#allocation3 + $0xe8] sm:%s6690_s11] }
 0x379   : > { %v3017_v1 = vpop.f32.mrf.mxu1  ;;  %v3248_v28 = vpop.f32.mrf.mxu0 }
 0x37a   : > { %8536 = vst [vmem:[#allocation89_spill] sm:$0xff] %v7007_v59  ;;  %8537 = vst [vmem:[#allocation90_spill] sm:$0xff] %v7009_v37  ;;  %v7014_v13 = vadd.f32 %v5017_v42, %v7009_v37  ;;  %v7016_v7 = vmax.f32 %v3257_v41, 0.0  ;;  %v3249_v61 = vadd.f32 %v3248_v28, %v6775_v3  ;;  %v5029_v37 = vld [vmem:[#allocation3 + $0x1a0] sm:%s6690_s11] }
 0x37b   : > { %v7020_v44 = vpop.f32.mrf.mxu1  ;;  %v4723_v8 = vpop.f32.mrf.mxu0 }
 0x37c   : > { %8538 = vst [vmem:[#allocation91_spill] sm:$0xff] %v7014_v13  ;;  %8539 = vst [vmem:[#allocation92_spill] sm:$0xff] %v7016_v7  ;;  %v7023_v55 = vadd.f32 %v5020_v50, %v7016_v7  ;;  %v7025_v35 = vmax.f32 %v3249_v61, 0.0  ;;  %v3270_v1 = vadd.f32 %v4723_v8, %v6860_v17  ;;  %v5032_v8 = vld [vmem:[#allocation3 + $0x78] sm:%s6690_s11] }
 0x37d   : > { %v3022_v15 = vpop.f32.mrf.mxu1  ;;  %v3261_v42 = vpop.f32.mrf.mxu0 }
 0x37e   : > { %8540 = vst [vmem:[#allocation93_spill] sm:$0xff] %v7023_v55  ;;  %8541 = vst [vmem:[#allocation94_spill] sm:$0xff] %v7025_v35  ;;  %v7030_v41 = vadd.f32 %v5023_v54, %v7025_v35  ;;  %v7032_v3 = vmax.f32 %v3270_v1, 0.0  ;;  %v3262_v28 = vadd.f32 %v3261_v42, %v6826_v12  ;;  %v5035_v35 = vld [vmem:[#allocation3 + $0x1f0] sm:%s6690_s11] }
 0x37f   : > { %v7036_v59 = vpop.f32.mrf.mxu1  ;;  %v4724_v50 = vpop.f32.mrf.mxu0 }
 0x380   : > { %8542 = vst [vmem:[#allocation95_spill] sm:$0xff] %v7030_v41  ;;  %8543 = vst [vmem:[#allocation96_spill] sm:$0xff] %v7032_v3  ;;  %v7039_v61 = vadd.f32 %v5026_v60, %v7032_v3  ;;  %v7041_v17 = vmax.f32 %v3262_v28, 0.0  ;;  %v3273_v15 = vadd.f32 %v4724_v50, %v6877_v49 }
 0x381   : > { %v3025_v7 = vpop.f32.mrf.mxu1  ;;  %v3264_v54 = vpop.f32.mrf.mxu0 }
 0x382   : > { %8544 = vst [vmem:[#allocation97_spill] sm:$0xff] %v7039_v61  ;;  %8545 = vst [vmem:[#allocation98_spill] sm:$0xff] %v7041_v17  ;;  %v7046_v1 = vadd.f32 %v5029_v37, %v7041_v17  ;;  %v7048_v12 = vmax.f32 %v3273_v15, 0.0  ;;  %v3265_v42 = vadd.f32 %v3264_v54, %v6843_v25  ;;  %v5038_v7 = vld [vmem:[#allocation3 + $0x1d8] sm:%s6690_s11]  ;;  %v5041_v54 = vld [vmem:[#allocation3 + $0x70] sm:%s6690_s11] }
 0x383   : > { %v3028_v55 = vpop.f32.mrf.mxu1  ;;  %v4727_v41 = vpop.f32.mrf.mxu0 }
 0x384   : > { %8546 = vst [vmem:[#allocation99_spill] sm:$0xff] %v7046_v1  ;;  %8547 = vst [vmem:[#allocation100_spill] sm:$0xff] %v7048_v12  ;;  %v7053_v60 = vadd.f32 %v5032_v8, %v7048_v12  ;;  %v7055_v28 = vmax.f32 %v3265_v42, 0.0  ;;  %v3286_v49 = vadd.f32 %v4727_v41, %v6928_v27  ;;  %v5044_v41 = vld [vmem:[#allocation3 + $0xd0] sm:%s6690_s11] }
 0x385   : > { %v3030_v50 = vpop.f32.mrf.mxu1  ;;  %v3277_v3 = vpop.f32.mrf.mxu0 }
 0x386   : > { %8548 = vst [vmem:[#allocation101_spill] sm:$0xff] %v7053_v60  ;;  %8549 = vst [vmem:[#allocation102_spill] sm:$0xff] %v7055_v28  ;;  %v7060_v37 = vadd.f32 %v5035_v35, %v7055_v28  ;;  %v7062_v15 = vmax.f32 %v3286_v49, 0.0  ;;  %v3278_v25 = vadd.f32 %v3277_v3, %v6894_v36  ;;  %v3013_v49 = vadd.f32 %v6988_v51, %v6591_v32  ;;  %v5050_v51 = vld [vmem:[#allocation3 + $0xa8] sm:%s6690_s11] }
 0x387   : > { %v3031_v17 = vpop.f32.mrf.mxu1  ;;  %v4728_v61 = vpop.f32.mrf.mxu0 }
 0x388   : > { %8550 = vst [vmem:[#allocation103_spill] sm:$0xff] %v7060_v37  ;;  %8551 = vst [vmem:[#allocation104_spill] sm:$0xff] %v7062_v15  ;;  %v7067_v8 = vadd.f32 %v5038_v7, %v7062_v15  ;;  %v7069_v42 = vmax.f32 %v3278_v25, 0.0  ;;  %v3289_v27 = vadd.f32 %v4728_v61, %v6945_v5  ;;  %v5047_v7 = vld [vmem:[#allocation3 + $0x90] sm:%s6690_s11]  ;;  %v3005_v5 = vadd.f32 %v6956_v18, %v6577_v40  ;;  %v5053_v18 = vld [vmem:[#allocation3 + $0xb8] sm:%s6690_s11] }
 0x389   : > { %v3033_v50 = vpop.f32.mrf.mxu1  ;;  %v3280_v35 = vpop.f32.mrf.mxu0 }
 0x38a   : > { %8552 = vst [vmem:[#allocation105_spill] sm:$0xff] %v7067_v8  ;;  %8553 = vst [vmem:[#allocation106_spill] sm:$0xff] %v7069_v42  ;;  %v7076_v12 = vadd.f32 %v5041_v54, %v7069_v42  ;;  %v7078_v36 = vmax.f32 %v3289_v27, 0.0  ;;  %v3281_v3 = vadd.f32 %v3280_v35, %v6911_v46  ;;  %v3016_v42 = vadd.f32 %v7004_v31, %v6598_v63  ;;  %v5056_v31 = vld [vmem:[#allocation3 + $0x1c8] sm:%s6690_s11] }
 0x38b   : > { %v3036_v25 = vpop.f32.mrf.mxu1  ;;  %v4731_v15 = vpop.f32.mrf.mxu0 }
 0x38c   : > { %8554 = vst [vmem:[#allocation107_spill] sm:$0xff] %v7076_v12  ;;  %8555 = vst [vmem:[#allocation108_spill] sm:$0xff] %v7078_v36  ;;  %v7085_v61 = vadd.f32 %v5044_v41, %v7078_v36  ;;  %v7087_v50 = vmax.f32 %v3281_v3, 0.0  ;;  %v3302_v32 = vadd.f32 %v4731_v15, %v3013_v49  ;;  %v8560_v3 = vld [vmem:[#allocation29_spill] sm:$0xff] }
 0x38d   : > { %v3038_v54 = vpop.f32.mrf.mxu1  ;;  %v3293_v27 = vpop.f32.mrf.mxu0  ;;  %v3008_v28 = vadd.f32 %v6972_v29, %v8560_v3  ;;  %v5059_v29 = vld [vmem:[#allocation3 + $0x88] sm:%s6690_s11] }
 0x38e   : > { %8556 = vst [vmem:[#allocation109_spill] sm:$0xff] %v7085_v61  ;;  %8557 = vst [vmem:[#allocation110_spill] sm:$0xff] %v7087_v50  ;;  %v7093_v46 = vadd.f32 %v5047_v7, %v7087_v50  ;;  %v7095_v35 = vmax.f32 %v3302_v32, 0.0  ;;  %v3294_v40 = vadd.f32 %v3293_v27, %v3005_v5  ;;  %v8563_v32 = vld [vmem:[#allocation30_spill] sm:$0xff] }
 0x38f   : > { %v3039_v41 = vpop.f32.mrf.mxu1  ;;  %v4732_v36 = vpop.f32.mrf.mxu0  ;;  %v3029_v50 = vadd.f32 %v3028_v55, %v8563_v32 }
 0x390   : > { %8558 = vst [vmem:[#allocation111_spill] sm:$0xff] %v7093_v46  ;;  %8559 = vst [vmem:[#allocation112_spill] sm:$0xff] %v7095_v35  ;;  %v7101_v15 = vadd.f32 %v5050_v51, %v7095_v35  ;;  %v7103_v49 = vmax.f32 %v3294_v40, 0.0  ;;  %v3305_v63 = vadd.f32 %v4732_v36, %v3016_v42  ;;  %v8566_v35 = vld [vmem:[#allocation26_spill] sm:$0xff] }
 0x391   : > { %v3041_v7 = vpop.f32.mrf.mxu1  ;;  %v3296_v54 = vpop.f32.mrf.mxu0  ;;  %v3021_v40 = vadd.f32 %v7020_v44, %v8566_v35  ;;  %v5065_v44 = vld [vmem:[#allocation3 + $0x170] sm:%s6690_s11] }
 0x392   : > { %8561 = vst [vmem:[#allocation29_spill] sm:$0xff] %v7101_v15  ;;  %8562 = vst [vmem:[#allocation113_spill] sm:$0xff] %v7103_v49  ;;  %v7108_v5 = vadd.f32 %v5053_v18, %v7103_v49  ;;  %v7110_v27 = vmax.f32 %v3305_v63, 0.0  ;;  %v3297_v61 = vadd.f32 %v3296_v54, %v3008_v28  ;;  %v5062_v7 = vld [vmem:[#allocation3 + $0x68] sm:%s6690_s11]  ;;  %v3032_v63 = vadd.f32 %v3031_v17, %v6626_v45  ;;  %v5068_v17 = vld [vmem:[#allocation3 + $0x190] sm:%s6690_s11] }
 0x393   : > { %v3044_v3 = vpop.f32.mrf.mxu1  ;;  %v4735_v51 = vpop.f32.mrf.mxu0 }
 0x394   : > { %8564 = vst [vmem:[#allocation30_spill] sm:$0xff] %v7108_v5  ;;  %8565 = vst [vmem:[#allocation114_spill] sm:$0xff] %v7110_v27  ;;  %v7116_v42 = vadd.f32 %v5056_v31, %v7110_v27  ;;  %v7118_v36 = vmax.f32 %v3297_v61, 0.0  ;;  %v3318_v55 = vadd.f32 %v4735_v51, %v3029_v50  ;;  %v8571_v27 = vld [vmem:[#allocation27_spill] sm:$0xff] }
 0x395   : > { %v3046_v18 = vpop.f32.mrf.mxu1  ;;  %v3309_v32 = vpop.f32.mrf.mxu0  ;;  %v3024_v61 = vadd.f32 %v7036_v59, %v8571_v27  ;;  %v5071_v59 = vld [vmem:[#allocation3 + $0x178] sm:%s6690_s11] }
 0x396   : > { %8567 = vst [vmem:[#allocation26_spill] sm:$0xff] %v7116_v42  ;;  %8568 = vst [vmem:[#allocation115_spill] sm:$0xff] %v7118_v36  ;;  %v7123_v28 = vadd.f32 %v5059_v29, %v7118_v36  ;;  %v7125_v54 = vmax.f32 %v3318_v55, 0.0  ;;  %v3310_v49 = vadd.f32 %v3309_v32, %v3021_v40  ;;  %v3045_v55 = vadd.f32 %v3044_v3, %v6647_v62  ;;  %v5074_v62 = vld [vmem:[#allocation3 + $0xc0] sm:%s6690_s11] }
 0x397   : > { %v3047_v35 = vpop.f32.mrf.mxu1  ;;  %v4736_v31 = vpop.f32.mrf.mxu0 }
 0x398   : > { %8569 = vst [vmem:[#allocation116_spill] sm:$0xff] %v7123_v28  ;;  %8570 = vst [vmem:[#allocation117_spill] sm:$0xff] %v7125_v54  ;;  %v7131_v50 = vadd.f32 %v5062_v7, %v7125_v54  ;;  %v7133_v51 = vmax.f32 %v3310_v49, 0.0  ;;  %v3321_v45 = vadd.f32 %v4736_v31, %v3032_v63  ;;  %v8576_v54 = vld [vmem:[#allocation31_spill] sm:$0xff] }
 0x399   : > { %v3049_v29 = vpop.f32.mrf.mxu1  ;;  %v3312_v18 = vpop.f32.mrf.mxu0  ;;  %v3037_v49 = vadd.f32 %v3036_v25, %v8576_v54  ;;  %v5077_v25 = vld [vmem:[#allocation3 + $0x198] sm:%s6690_s11] }
 0x39a   : > { %8572 = vst [vmem:[#allocation27_spill] sm:$0xff] %v7131_v50  ;;  %8573 = vst [vmem:[#allocation118_spill] sm:$0xff] %v7133_v51  ;;  %v7138_v40 = vadd.f32 %v5065_v44, %v7133_v51  ;;  %v7140_v32 = vmax.f32 %v3321_v45, 0.0  ;;  %v3313_v36 = vadd.f32 %v3312_v18, %v3024_v61  ;;  %v3048_v45 = vadd.f32 %v3047_v35, %v6654_v21 }
 0x39b   : > { %v3052_v27 = vpop.f32.mrf.mxu1  ;;  %v4739_v7 = vpop.f32.mrf.mxu0 }
 0x39c   : > { %8574 = vst [vmem:[#allocation119_spill] sm:$0xff] %v7138_v40  ;;  %8575 = vst [vmem:[#allocation120_spill] sm:$0xff] %v7140_v32  ;;  %v7145_v50 = vadd.f32 %v5068_v17, %v7140_v32  ;;  %v7147_v63 = vmax.f32 %v3313_v36, 0.0  ;;  %v3334_v31 = vadd.f32 %v4739_v7, %v3045_v55  ;;  %v8581_v32 = vld [vmem:[#allocation32_spill] sm:$0xff] }
 0x39d   : > { %v3054_v3 = vpop.f32.mrf.mxu1  ;;  %v3325_v44 = vpop.f32.mrf.mxu0  ;;  %v3040_v36 = vadd.f32 %v3039_v41, %v8581_v32  ;;  %v8586_v32 = vld [vmem:[#allocation41_spill] sm:$0xff] }
 0x39e   : > { %8577 = vst [vmem:[#allocation31_spill] sm:$0xff] %v7145_v50  ;;  %8578 = vst [vmem:[#allocation121_spill] sm:$0xff] %v7147_v63  ;;  %v7152_v29 = vadd.f32 %v5071_v59, %v7147_v63  ;;  %v7154_v61 = vmax.f32 %v3334_v31, 0.0  ;;  %v3326_v18 = vadd.f32 %v3325_v44, %v3037_v49  ;;  %v5080_v3 = vld [vmem:[#allocation3 + $0x1c0] sm:%s6690_s11]  ;;  %v5083_v44 = vld [vmem:[#allocation3 + $0x38] sm:%s6690_s11] }
 0x39f   : > { %v3055_v54 = vpop.f32.mrf.mxu1  ;;  %v4740_v17 = vpop.f32.mrf.mxu0 }
 0x3a0   : > { %8579 = vst [vmem:[#allocation122_spill] sm:$0xff] %v7152_v29  ;;  %8580 = vst [vmem:[#allocation123_spill] sm:$0xff] %v7154_v61  ;;  %v7159_v51 = vadd.f32 %v5074_v62, %v7154_v61  ;;  %v7161_v55 = vmax.f32 %v3326_v18, 0.0  ;;  %v3337_v7 = vadd.f32 %v4740_v17, %v3048_v45  ;;  %v3053_v62 = vadd.f32 %v3052_v27, %v8586_v32  ;;  %v8590_v32 = vld [vmem:[#allocation33_spill] sm:$0xff] }
 0x3a1   : > { %v3057_v21 = vpop.f32.mrf.mxu1  ;;  %v3328_v35 = vpop.f32.mrf.mxu0 }
 0x3a2   : > { %8582 = vst [vmem:[#allocation32_spill] sm:$0xff] %v7159_v51  ;;  %8583 = vst [vmem:[#allocation124_spill] sm:$0xff] %v7161_v55  ;;  %v7165_v59 = vadd.f32 %v5077_v25, %v7161_v55  ;;  %v7167_v49 = vmax.f32 %v3337_v7, 0.0  ;;  %v3329_v31 = vadd.f32 %v3328_v35, %v3040_v36  ;;  %v5086_v35 = vld [vmem:[#allocation3 + $0x58] sm:%s6690_s11] }
 0x3a3   : > { %v3060_v63 = vpop.f32.mrf.mxu1  ;;  %v4743_v41 = vpop.f32.mrf.mxu0  ;;  %v5089_v55 = vld [vmem:[#allocation3 + $0x158] sm:%s6690_s11] }
 0x3a4   : > { %8584 = vst [vmem:[#allocation125_spill] sm:$0xff] %v7165_v59  ;;  %8585 = vst [vmem:[#allocation126_spill] sm:$0xff] %v7167_v49  ;;  %v7172_v18 = vadd.f32 %v5080_v3, %v7167_v49  ;;  %v7174_v45 = vmax.f32 %v3329_v31, 0.0  ;;  %v3061_v17 = vadd.f32 %v3060_v63, %v6675_v47  ;;  %v3056_v3 = vadd.f32 %v3055_v54, %v8590_v32  ;;  %v8591_v47 = vld [vmem:[#allocation7_spill] sm:$0xff] }
 0x3a5   : > { %v3062_v21 = vpop.f32.mrf.mxu1  ;;  %v3341_v61 = vpop.f32.mrf.mxu0 }
 0x3a6   : > { %8587 = vst [vmem:[#allocation41_spill] sm:$0xff] %v7172_v18  ;;  %8588 = vst [vmem:[#allocation127_spill] sm:$0xff] %v7174_v45  ;;  %v7178_v25 = vadd.f32 %v5083_v44, %v7174_v45  ;;  %v3350_v7 = vadd.f32 %v4743_v41, %v3061_v17  ;;  %v3342_v36 = vadd.f32 %v3341_v61, %v3053_v62  ;;  %v5092_v17 = vld [vmem:[#allocation3 + $0xa0] sm:%s6690_s11]  ;;  %v5095_v45 = vld [vmem:[#allocation3 + $0x10] sm:%s6690_s11] }
 0x3a7   : > { %v3063_v51 = vpop.f32.mrf.mxu1  ;;  %v4744_v27 = vpop.f32.mrf.mxu0 }
 0x3a8   : > { %8589 = vst [vmem:[#allocation128_spill] sm:$0xff] %v7178_v25  ;;  %v7183_v49 = vmax.f32 %v3350_v7, 0.0  ;;  %v7185_v31 = vmax.f32 %v3342_v36, 0.0  ;;  %v3064_v63 = vadd.f32 %v3063_v51, %v8591_v47 }
 0x3a9   : > { %v3065_v21 = vpop.f32.mrf.mxu1  ;;  %v3344_v18 = vpop.f32.mrf.mxu0 }
 0x3aa   : > { %v7189_v44 = vadd.f32 %v5086_v35, %v7183_v49  ;;  %v7192_v61 = vadd.f32 %v5089_v55, %v7185_v31  ;;  %v3353_v41 = vadd.f32 %v4744_v27, %v3064_v63  ;;  %v3345_v62 = vadd.f32 %v3344_v18, %v3056_v3 }
 0x3ac   : > { %8592 = vst [vmem:[#allocation33_spill] sm:$0xff] %v7189_v44  ;;  %8593 = vst [vmem:[#allocation7_spill] sm:$0xff] %v7192_v61  ;;  %v7196_v25 = vmax.f32 %v3353_v41, 0.0  ;;  %v7198_v54 = vmax.f32 %v3345_v62, 0.0  ;;  %3632 = sbr.rel (%p6466_p9) target bundleno = 977 (0x3d1), region = 44 }
 0x3ae   : > { %v7201_v7 = vadd.f32 %v5092_v17, %v7196_v25  ;;  %v7204_v51 = vadd.f32 %v5095_v45, %v7198_v54 }
 0x3b0   : > { %8594 = vst [vmem:[#allocation129_spill] sm:$0xff] %v7201_v7  ;;  %8595 = vst [vmem:[#allocation130_spill] sm:$0xff] %v7204_v51 }
 0x3b1   : > { %3633 = vst [vmem:[#allocation3 + $0xb0] sm:$0xff] %v6712_v39  ;;  %3634 = vst [vmem:[#allocation3 + $0x1b0] sm:$0xff] %v6729_v48  ;;  %v8596_v55 = vld [vmem:[#allocation9_spill] sm:$0xff]  ;;  %v8597_v18 = vld [vmem:[#allocation44_spill] sm:$0xff] }
 0x3b2   : > { %3635 = vst [vmem:[#allocation3 + $0xd8] sm:$0xff] %v8596_v55  ;;  %3636 = vst [vmem:[#allocation3 + $0x18] sm:$0xff] %v6719_v23  ;;  %v8598_v45 = vld [vmem:[#allocation38_spill] sm:$0xff]  ;;  %v8599_v36 = vld [vmem:[#allocation20_spill] sm:$0xff] }
 0x3b3   : > { %3637 = vst [vmem:[#allocation3 + $0x50] sm:$0xff] %v6746_v38  ;;  %3638 = vst [vmem:[#allocation3 + $0x168] sm:$0xff] %v6763_v20  ;;  %v8600_v35 = vld [vmem:[#allocation22_spill] sm:$0xff]  ;;  %v8601_v27 = vld [vmem:[#allocation25_spill] sm:$0xff] }
 0x3b4   : > { %3639 = vst [vmem:[#allocation3 + $0x130] sm:$0xff] %v6736_v6  ;;  %3640 = vst [vmem:[#allocation3 + $0x48] sm:$0xff] %v8597_v18  ;;  %v8602_v32 = vld [vmem:[#allocation77_spill] sm:$0xff]  ;;  %v8605_v63 = vld [vmem:[#allocation95_spill] sm:$0xff] }
 0x3b5   : > { %3641 = vst [vmem:[#allocation3 + $0x180] sm:$0xff] %v6780_v34  ;;  %3642 = vst [vmem:[#allocation3 + $0x110] sm:$0xff] %v6797_v0  ;;  %v8603_v3 = vld [vmem:[#allocation81_spill] sm:$0xff]  ;;  %v8610_v55 = vld [vmem:[#allocation27_spill] sm:$0xff] }
 0x3b6   : > { %3643 = vst [vmem:[#allocation3 + $0x118] sm:$0xff] %v8598_v45  ;;  %3644 = vst [vmem:[#allocation3 + $0x98] sm:$0xff] %v8599_v36  ;;  %v8604_v47 = vld [vmem:[#allocation85_spill] sm:$0xff]  ;;  %v8611_v18 = vld [vmem:[#allocation128_spill] sm:$0xff] }
 0x3b7   : > { %3645 = vst [vmem:[#allocation3 + $0x120] sm:$0xff] %v6814_v24  ;;  %3646 = vst [vmem:[#allocation3 + $0x150] sm:$0xff] %v6831_v33  ;;  %v8606_v21 = vld [vmem:[#allocation89_spill] sm:$0xff]  ;;  %v8612_v45 = vld [vmem:[#allocation32_spill] sm:$0xff] }
 0x3b8   : > { %3647 = vst [vmem:[#allocation3 + $0x108] sm:$0xff] %v8600_v35  ;;  %3648 = vst [vmem:[#allocation3 + $0x60] sm:$0xff] %v8601_v27  ;;  %v8607_v41 = vld [vmem:[#allocation93_spill] sm:$0xff] }
 0x3b9   : > { %3649 = vst [vmem:[#allocation3 + $0xe0] sm:$0xff] %v6848_v30  ;;  %3650 = vst [vmem:[#allocation3 + $0x188] sm:$0xff] %v6865_v43  ;;  %v8608_v62 = vld [vmem:[#allocation97_spill] sm:$0xff] }
 0x3ba   : > { %3651 = vst [vmem:[#allocation3 + $0x138] sm:$0xff] %v6838_v19  ;;  %3652 = vst [vmem:[#allocation3 + $0x140] sm:$0xff] %v6855_v56  ;;  %v8609_v17 = vld [vmem:[#allocation109_spill] sm:$0xff] }
 0x3bb   : > { %3653 = vst [vmem:[#allocation3 + $0x80] sm:$0xff] %v6882_v53  ;;  %3654 = vst [vmem:[#allocation3 + $0x1a8] sm:$0xff] %v6899_v4  ;;  %v8613_v36 = vld [vmem:[#allocation41_spill] sm:$0xff] }
 0x3bc   : > { %3655 = vst [vmem:[#allocation3 + $0x1b8] sm:$0xff] %v6872_v11  ;;  %3656 = vst [vmem:[#allocation3 + $0x28] sm:$0xff] %v6889_v14 }
 0x3bd   : > { %3657 = vst [vmem:[#allocation3 + $0x1e8] sm:$0xff] %v6916_v16  ;;  %3658 = vst [vmem:[#allocation3 + $0xf8] sm:$0xff] %v6933_v58 }
 0x3be   : > { %3659 = vst [vmem:[#allocation3 + $0x160] sm:$0xff] %v6906_v2  ;;  %3660 = vst [vmem:[#allocation3 + $0x30] sm:$0xff] %v6923_v57 }
 0x3bf   : > { %3661 = vst [vmem:[#allocation3 + $0x1e0] sm:$0xff] %v6950_v9  ;;  %3662 = vst [vmem:[#allocation3] sm:$0xff] %v6966_v10 }
 0x3c0   : > { %3663 = vst [vmem:[#allocation3 + $0xf0] sm:$0xff] %v6940_v26  ;;  %3664 = vst [vmem:[#allocation3 + $0x8] sm:$0xff] %v8602_v32 }
 0x3c1   : > { %3665 = vst [vmem:[#allocation3 + $0x148] sm:$0xff] %v6982_v52  ;;  %3666 = vst [vmem:[#allocation3 + $0x1d0] sm:$0xff] %v6998_v22 }
 0x3c2   : > { %3667 = vst [vmem:[#allocation3 + $0x100] sm:$0xff] %v8603_v3  ;;  %3668 = vst [vmem:[#allocation3 + $0xc8] sm:$0xff] %v8604_v47 }
 0x3c3   : > { %3669 = vst [vmem:[#allocation3 + $0x40] sm:$0xff] %v7014_v13  ;;  %3670 = vst [vmem:[#allocation3 + $0x1f8] sm:$0xff] %v8605_v63 }
 0x3c4   : > { %3671 = vst [vmem:[#allocation3 + $0x20] sm:$0xff] %v8606_v21  ;;  %3672 = vst [vmem:[#allocation3 + $0x128] sm:$0xff] %v8607_v41 }
 0x3c5   : > { %3673 = vst [vmem:[#allocation3 + $0x1a0] sm:$0xff] %v7046_v1  ;;  %3674 = vst [vmem:[#allocation3 + $0x1f0] sm:$0xff] %v7060_v37 }
 0x3c6   : > { %3675 = vst [vmem:[#allocation3 + $0xe8] sm:$0xff] %v8608_v62  ;;  %3676 = vst [vmem:[#allocation3 + $0x78] sm:$0xff] %v7053_v60 }
 0x3c7   : > { %3677 = vst [vmem:[#allocation3 + $0x70] sm:$0xff] %v7076_v12  ;;  %3678 = vst [vmem:[#allocation3 + $0x90] sm:$0xff] %v7093_v46 }
 0x3c8   : > { %3679 = vst [vmem:[#allocation3 + $0x1d8] sm:$0xff] %v7067_v8  ;;  %3680 = vst [vmem:[#allocation3 + $0xd0] sm:$0xff] %v8609_v17 }
 0x3c9   : > { %3681 = vst [vmem:[#allocation3 + $0xb8] sm:$0xff] %v7108_v5  ;;  %3682 = vst [vmem:[#allocation3 + $0x88] sm:$0xff] %v7123_v28 }
 0x3ca   : > { %3683 = vst [vmem:[#allocation3 + $0xa8] sm:$0xff] %v7101_v15  ;;  %3684 = vst [vmem:[#allocation3 + $0x1c8] sm:$0xff] %v7116_v42 }
 0x3cb   : > { %3685 = vst [vmem:[#allocation3 + $0x170] sm:$0xff] %v7138_v40  ;;  %3686 = vst [vmem:[#allocation3 + $0x178] sm:$0xff] %v7152_v29 }
 0x3cc   : > { %3687 = vst [vmem:[#allocation3 + $0x68] sm:$0xff] %v8610_v55  ;;  %3688 = vst [vmem:[#allocation3 + $0x190] sm:$0xff] %v7145_v50 }
 0x3cd   : > { %3689 = vst [vmem:[#allocation3 + $0x198] sm:$0xff] %v7165_v59  ;;  %3690 = vst [vmem:[#allocation3 + $0x38] sm:$0xff] %v8611_v18 }
 0x3ce   : > { %3691 = vst [vmem:[#allocation3 + $0xc0] sm:$0xff] %v8612_v45  ;;  %3692 = vst [vmem:[#allocation3 + $0x1c0] sm:$0xff] %v8613_v36 }
 0x3cf   : > { %3693 = vst [vmem:[#allocation3 + $0x158] sm:$0xff] %v7192_v61  ;;  %3694 = vst [vmem:[#allocation3 + $0x10] sm:$0xff] %v7204_v51 }
 0x3d0   : > { %3695 = vst [vmem:[#allocation3 + $0x58] sm:$0xff] %v7189_v44  ;;  %3696 = vst [vmem:[#allocation3 + $0xa0] sm:$0xff] %v7201_v7 }
 0x3d1 PF: > { %3699 = sbr.rel (%p4523_p4) target bundleno = 1047 (0x417), region = 48 }
 0x3d6   : > { %v8614_v35 = vld [vmem:[#allocation34_spill] sm:$0xff]  ;;  %v8615_v27 = vld [vmem:[#allocation35_spill] sm:$0xff]  ;;  %v8616_v32 = vld [vmem:[#allocation8_spill] sm:$0xff]  ;;  %3760 = vst [vmem:[#allocation3 + $0x158] sm:$0xff] %v7185_v31 }
 0x3d7   : > { %3700 = vst [vmem:[#allocation3 + $0xb0] sm:$0xff] %v8614_v35  ;;  %3701 = vst [vmem:[#allocation3 + $0x1b0] sm:$0xff] %v8615_v27  ;;  %v8617_v3 = vld [vmem:[#allocation11_spill] sm:$0xff]  ;;  %v8618_v47 = vld [vmem:[#allocation36_spill] sm:$0xff] }
 0x3d8   : > { %3702 = vst [vmem:[#allocation3 + $0xd8] sm:$0xff] %v8616_v32  ;;  %3703 = vst [vmem:[#allocation3 + $0x18] sm:$0xff] %v8617_v3  ;;  %v8619_v63 = vld [vmem:[#allocation37_spill] sm:$0xff]  ;;  %v8621_v41 = vld [vmem:[#allocation15_spill] sm:$0xff] }
 0x3d9   : > { %3704 = vst [vmem:[#allocation3 + $0x50] sm:$0xff] %v8618_v47  ;;  %3705 = vst [vmem:[#allocation3 + $0x168] sm:$0xff] %v8619_v63  ;;  %v8620_v21 = vld [vmem:[#allocation13_spill] sm:$0xff]  ;;  %v8622_v62 = vld [vmem:[#allocation18_spill] sm:$0xff] }
 0x3da   : > { %3706 = vst [vmem:[#allocation3 + $0x130] sm:$0xff] %v8620_v21  ;;  %3707 = vst [vmem:[#allocation3 + $0x48] sm:$0xff] %v8621_v41  ;;  %v8623_v17 = vld [vmem:[#allocation39_spill] sm:$0xff]  ;;  %v8624_v55 = vld [vmem:[#allocation17_spill] sm:$0xff] }
 0x3db   : > { %3708 = vst [vmem:[#allocation3 + $0x180] sm:$0xff] %v8622_v62  ;;  %3709 = vst [vmem:[#allocation3 + $0x110] sm:$0xff] %v8623_v17  ;;  %v8625_v18 = vld [vmem:[#allocation19_spill] sm:$0xff]  ;;  %v8626_v45 = vld [vmem:[#allocation46_spill] sm:$0xff] }
 0x3dc   : > { %3710 = vst [vmem:[#allocation3 + $0x118] sm:$0xff] %v8624_v55  ;;  %3711 = vst [vmem:[#allocation3 + $0x98] sm:$0xff] %v8625_v18  ;;  %v8627_v36 = vld [vmem:[#allocation23_spill] sm:$0xff]  ;;  %v8628_v7 = vld [vmem:[#allocation40_spill] sm:$0xff] }
 0x3dd   : > { %3712 = vst [vmem:[#allocation3 + $0x120] sm:$0xff] %v8626_v45  ;;  %3713 = vst [vmem:[#allocation3 + $0x150] sm:$0xff] %v8627_v36  ;;  %v8629_v44 = vld [vmem:[#allocation48_spill] sm:$0xff]  ;;  %v8630_v51 = vld [vmem:[#allocation50_spill] sm:$0xff] }
 0x3de   : > { %3714 = vst [vmem:[#allocation3 + $0x108] sm:$0xff] %v8628_v7  ;;  %3715 = vst [vmem:[#allocation3 + $0x60] sm:$0xff] %v8629_v44  ;;  %v8631_v61 = vld [vmem:[#allocation54_spill] sm:$0xff]  ;;  %v8632_v59 = vld [vmem:[#allocation28_spill] sm:$0xff] }
 0x3df   : > { %3716 = vst [vmem:[#allocation3 + $0xe0] sm:$0xff] %v8630_v51  ;;  %3717 = vst [vmem:[#allocation3 + $0x188] sm:$0xff] %v8631_v61  ;;  %v8633_v50 = vld [vmem:[#allocation52_spill] sm:$0xff]  ;;  %v8634_v29 = vld [vmem:[#allocation58_spill] sm:$0xff] }
 0x3e0   : > { %3718 = vst [vmem:[#allocation3 + $0x138] sm:$0xff] %v8632_v59  ;;  %3719 = vst [vmem:[#allocation3 + $0x140] sm:$0xff] %v8633_v50  ;;  %v8635_v40 = vld [vmem:[#allocation62_spill] sm:$0xff]  ;;  %v8636_v42 = vld [vmem:[#allocation56_spill] sm:$0xff] }
 0x3e1   : > { %3720 = vst [vmem:[#allocation3 + $0x80] sm:$0xff] %v8634_v29  ;;  %3721 = vst [vmem:[#allocation3 + $0x1a8] sm:$0xff] %v8635_v40  ;;  %v8637_v15 = vld [vmem:[#allocation60_spill] sm:$0xff]  ;;  %v8638_v28 = vld [vmem:[#allocation66_spill] sm:$0xff] }
 0x3e2   : > { %3722 = vst [vmem:[#allocation3 + $0x1b8] sm:$0xff] %v8636_v42  ;;  %3723 = vst [vmem:[#allocation3 + $0x28] sm:$0xff] %v8637_v15  ;;  %v8639_v5 = vld [vmem:[#allocation70_spill] sm:$0xff]  ;;  %v8640_v8 = vld [vmem:[#allocation64_spill] sm:$0xff] }
 0x3e3   : > { %3724 = vst [vmem:[#allocation3 + $0x1e8] sm:$0xff] %v8638_v28  ;;  %3725 = vst [vmem:[#allocation3 + $0xf8] sm:$0xff] %v8639_v5  ;;  %v8641_v46 = vld [vmem:[#allocation68_spill] sm:$0xff]  ;;  %v8642_v12 = vld [vmem:[#allocation74_spill] sm:$0xff] }
 0x3e4   : > { %3726 = vst [vmem:[#allocation3 + $0x160] sm:$0xff] %v8640_v8  ;;  %3727 = vst [vmem:[#allocation3 + $0x30] sm:$0xff] %v8641_v46  ;;  %v8643_v60 = vld [vmem:[#allocation78_spill] sm:$0xff]  ;;  %v8644_v37 = vld [vmem:[#allocation72_spill] sm:$0xff] }
 0x3e5   : > { %3728 = vst [vmem:[#allocation3 + $0x1e0] sm:$0xff] %v8642_v12  ;;  %3729 = vst [vmem:[#allocation3] sm:$0xff] %v8643_v60  ;;  %v8645_v1 = vld [vmem:[#allocation76_spill] sm:$0xff]  ;;  %v8646_v13 = vld [vmem:[#allocation82_spill] sm:$0xff] }
 0x3e6   : > { %3730 = vst [vmem:[#allocation3 + $0xf0] sm:$0xff] %v8644_v37  ;;  %3731 = vst [vmem:[#allocation3 + $0x8] sm:$0xff] %v8645_v1  ;;  %v8647_v22 = vld [vmem:[#allocation86_spill] sm:$0xff]  ;;  %v8648_v52 = vld [vmem:[#allocation80_spill] sm:$0xff] }
 0x3e7   : > { %3732 = vst [vmem:[#allocation3 + $0x148] sm:$0xff] %v8646_v13  ;;  %3733 = vst [vmem:[#allocation3 + $0x1d0] sm:$0xff] %v8647_v22  ;;  %v8649_v26 = vld [vmem:[#allocation84_spill] sm:$0xff]  ;;  %v8650_v10 = vld [vmem:[#allocation90_spill] sm:$0xff] }
 0x3e8   : > { %3734 = vst [vmem:[#allocation3 + $0x100] sm:$0xff] %v8648_v52  ;;  %3735 = vst [vmem:[#allocation3 + $0xc8] sm:$0xff] %v8649_v26  ;;  %v8651_v9 = vld [vmem:[#allocation94_spill] sm:$0xff]  ;;  %v8652_v57 = vld [vmem:[#allocation88_spill] sm:$0xff] }
 0x3e9   : > { %3736 = vst [vmem:[#allocation3 + $0x40] sm:$0xff] %v8650_v10  ;;  %3737 = vst [vmem:[#allocation3 + $0x1f8] sm:$0xff] %v8651_v9  ;;  %v8653_v2 = vld [vmem:[#allocation92_spill] sm:$0xff]  ;;  %v8654_v58 = vld [vmem:[#allocation98_spill] sm:$0xff] }
 0x3ea   : > { %3738 = vst [vmem:[#allocation3 + $0x20] sm:$0xff] %v8652_v57  ;;  %3739 = vst [vmem:[#allocation3 + $0x128] sm:$0xff] %v8653_v2  ;;  %v8655_v16 = vld [vmem:[#allocation102_spill] sm:$0xff]  ;;  %v8656_v14 = vld [vmem:[#allocation96_spill] sm:$0xff] }
 0x3eb   : > { %3740 = vst [vmem:[#allocation3 + $0x1a0] sm:$0xff] %v8654_v58  ;;  %3741 = vst [vmem:[#allocation3 + $0x1f0] sm:$0xff] %v8655_v16  ;;  %v8657_v11 = vld [vmem:[#allocation100_spill] sm:$0xff]  ;;  %v8658_v4 = vld [vmem:[#allocation106_spill] sm:$0xff] }
 0x3ec   : > { %3742 = vst [vmem:[#allocation3 + $0xe8] sm:$0xff] %v8656_v14  ;;  %3743 = vst [vmem:[#allocation3 + $0x78] sm:$0xff] %v8657_v11  ;;  %v8659_v53 = vld [vmem:[#allocation110_spill] sm:$0xff]  ;;  %v8660_v56 = vld [vmem:[#allocation104_spill] sm:$0xff] }
 0x3ed   : > { %3744 = vst [vmem:[#allocation3 + $0x70] sm:$0xff] %v8658_v4  ;;  %3745 = vst [vmem:[#allocation3 + $0x90] sm:$0xff] %v8659_v53  ;;  %v8661_v19 = vld [vmem:[#allocation108_spill] sm:$0xff]  ;;  %v8662_v43 = vld [vmem:[#allocation113_spill] sm:$0xff] }
 0x3ee   : > { %3746 = vst [vmem:[#allocation3 + $0x1d8] sm:$0xff] %v8660_v56  ;;  %3747 = vst [vmem:[#allocation3 + $0xd0] sm:$0xff] %v8661_v19  ;;  %v8663_v30 = vld [vmem:[#allocation115_spill] sm:$0xff]  ;;  %v8664_v33 = vld [vmem:[#allocation112_spill] sm:$0xff] }
 0x3ef   : > { %3748 = vst [vmem:[#allocation3 + $0xb8] sm:$0xff] %v8662_v43  ;;  %3749 = vst [vmem:[#allocation3 + $0x88] sm:$0xff] %v8663_v30  ;;  %v8665_v24 = vld [vmem:[#allocation114_spill] sm:$0xff]  ;;  %v8667_v34 = vld [vmem:[#allocation121_spill] sm:$0xff] }
 0x3f0   : > { %3750 = vst [vmem:[#allocation3 + $0xa8] sm:$0xff] %v8664_v33  ;;  %3751 = vst [vmem:[#allocation3 + $0x1c8] sm:$0xff] %v8665_v24  ;;  %v8666_v0 = vld [vmem:[#allocation118_spill] sm:$0xff]  ;;  %v8668_v6 = vld [vmem:[#allocation117_spill] sm:$0xff] }
 0x3f1   : > { %3752 = vst [vmem:[#allocation3 + $0x170] sm:$0xff] %v8666_v0  ;;  %3753 = vst [vmem:[#allocation3 + $0x178] sm:$0xff] %v8667_v34  ;;  %v8669_v20 = vld [vmem:[#allocation120_spill] sm:$0xff]  ;;  %v8671_v23 = vld [vmem:[#allocation127_spill] sm:$0xff] }
 0x3f2   : > { %3754 = vst [vmem:[#allocation3 + $0x68] sm:$0xff] %v8668_v6  ;;  %3755 = vst [vmem:[#allocation3 + $0x190] sm:$0xff] %v8669_v20  ;;  %v8670_v38 = vld [vmem:[#allocation124_spill] sm:$0xff]  ;;  %v8672_v48 = vld [vmem:[#allocation123_spill] sm:$0xff] }
 0x3f3   : > { %3756 = vst [vmem:[#allocation3 + $0x198] sm:$0xff] %v8670_v38  ;;  %3757 = vst [vmem:[#allocation3 + $0x38] sm:$0xff] %v8671_v23  ;;  %v8673_v39 = vld [vmem:[#allocation126_spill] sm:$0xff] }
 0x3f4   : > { %3758 = vst [vmem:[#allocation3 + $0xc0] sm:$0xff] %v8672_v48  ;;  %3759 = vst [vmem:[#allocation3 + $0x1c0] sm:$0xff] %v8673_v39 }
 0x3f5   : > { %3761 = vst [vmem:[#allocation3 + $0x10] sm:$0xff] %v7198_v54  ;;  %3762 = vst [vmem:[#allocation3 + $0x58] sm:$0xff] %v7183_v49 }
 0x3f6   : > { %3763 = vst [vmem:[#allocation3 + $0xa0] sm:$0xff] %v7196_v25  ;;  %3764 = vst [vmem:[#allocation2 + $0x19] sm:$0xff] %v8614_v35 }
 0x3f7   : > { %3765 = vst [vmem:[#allocation2 + $0x21] sm:$0xff] %v8615_v27  ;;  %3766 = vst [vmem:[#allocation2 + $0x31] sm:$0xff] %v8616_v32 }
 0x3f8   : > { %3767 = vst [vmem:[#allocation2 + $0x39] sm:$0xff] %v8617_v3  ;;  %3768 = vst [vmem:[#allocation2 + $0x49] sm:$0xff] %v8618_v47 }
 0x3f9   : > { %3769 = vst [vmem:[#allocation2 + $0x51] sm:$0xff] %v8619_v63  ;;  %3770 = vst [vmem:[#allocation2 + $0x61] sm:$0xff] %v8620_v21 }
 0x3fa   : > { %3771 = vst [vmem:[#allocation2 + $0x69] sm:$0xff] %v8621_v41  ;;  %3772 = vst [vmem:[#allocation2 + $0x79] sm:$0xff] %v8622_v62 }
 0x3fb   : > { %3773 = vst [vmem:[#allocation2 + $0x81] sm:$0xff] %v8623_v17  ;;  %3774 = vst [vmem:[#allocation2 + $0x91] sm:$0xff] %v8624_v55 }
 0x3fc   : > { %3775 = vst [vmem:[#allocation2 + $0x99] sm:$0xff] %v8625_v18  ;;  %3776 = vst [vmem:[#allocation2 + $0xa9] sm:$0xff] %v8626_v45 }
 0x3fd   : > { %3777 = vst [vmem:[#allocation2 + $0xb1] sm:$0xff] %v8627_v36  ;;  %3778 = vst [vmem:[#allocation2 + $0xc1] sm:$0xff] %v8628_v7 }
 0x3fe   : > { %3779 = vst [vmem:[#allocation2 + $0xc9] sm:$0xff] %v8629_v44  ;;  %3780 = vst [vmem:[#allocation2 + $0xd9] sm:$0xff] %v8630_v51 }
 0x3ff   : > { %3781 = vst [vmem:[#allocation2 + $0xe1] sm:$0xff] %v8631_v61  ;;  %3782 = vst [vmem:[#allocation2 + $0xf1] sm:$0xff] %v8632_v59 }
 0x400   : > { %3783 = vst [vmem:[#allocation2 + $0xf9] sm:$0xff] %v8633_v50  ;;  %3784 = vst [vmem:[#allocation2 + $0x109] sm:$0xff] %v8634_v29 }
 0x401   : > { %3785 = vst [vmem:[#allocation2 + $0x111] sm:$0xff] %v8635_v40  ;;  %3786 = vst [vmem:[#allocation2 + $0x121] sm:$0xff] %v8636_v42 }
 0x402   : > { %3787 = vst [vmem:[#allocation2 + $0x129] sm:$0xff] %v8637_v15  ;;  %3788 = vst [vmem:[#allocation2 + $0x139] sm:$0xff] %v8638_v28 }
 0x403   : > { %3789 = vst [vmem:[#allocation2 + $0x141] sm:$0xff] %v8639_v5  ;;  %3790 = vst [vmem:[#allocation2 + $0x151] sm:$0xff] %v8640_v8 }
 0x404   : > { %3791 = vst [vmem:[#allocation2 + $0x159] sm:$0xff] %v8641_v46  ;;  %3792 = vst [vmem:[#allocation2 + $0x169] sm:$0xff] %v8642_v12 }
 0x405   : > { %3793 = vst [vmem:[#allocation2 + $0x171] sm:$0xff] %v8643_v60  ;;  %3794 = vst [vmem:[#allocation2 + $0x181] sm:$0xff] %v8644_v37 }
 0x406   : > { %3795 = vst [vmem:[#allocation2 + $0x189] sm:$0xff] %v8645_v1  ;;  %3796 = vst [vmem:[#allocation2 + $0x1c9] sm:$0xff] %v8646_v13 }
 0x407   : > { %3797 = vst [vmem:[#allocation2 + $0x1d1] sm:$0xff] %v8647_v22  ;;  %3798 = vst [vmem:[#allocation2 + $0x1e1] sm:$0xff] %v8648_v52 }
 0x408   : > { %3799 = vst [vmem:[#allocation2 + $0x1e9] sm:$0xff] %v8649_v26  ;;  %3800 = vst [vmem:[#allocation2 + $0x1f9] sm:$0xff] %v8650_v10 }
 0x409   : > { %3801 = vst [vmem:[#allocation2 + $0x201] sm:$0xff] %v8651_v9  ;;  %3802 = vst [vmem:[#allocation2 + $0x211] sm:$0xff] %v8652_v57 }
 0x40a   : > { %3803 = vst [vmem:[#allocation2 + $0x219] sm:$0xff] %v8653_v2  ;;  %3804 = vst [vmem:[#allocation2 + $0x229] sm:$0xff] %v8654_v58 }
 0x40b   : > { %3805 = vst [vmem:[#allocation2 + $0x231] sm:$0xff] %v8655_v16  ;;  %3806 = vst [vmem:[#allocation2 + $0x241] sm:$0xff] %v8656_v14 }
 0x40c   : > { %3807 = vst [vmem:[#allocation2 + $0x249] sm:$0xff] %v8657_v11  ;;  %3808 = vst [vmem:[#allocation2 + $0x259] sm:$0xff] %v8658_v4 }
 0x40d   : > { %3809 = vst [vmem:[#allocation2 + $0x261] sm:$0xff] %v8659_v53  ;;  %3810 = vst [vmem:[#allocation2 + $0x271] sm:$0xff] %v8660_v56 }
 0x40e   : > { %3811 = vst [vmem:[#allocation2 + $0x279] sm:$0xff] %v8661_v19  ;;  %3812 = vst [vmem:[#allocation2 + $0x289] sm:$0xff] %v8662_v43 }
 0x40f   : > { %3813 = vst [vmem:[#allocation2 + $0x291] sm:$0xff] %v8663_v30  ;;  %3814 = vst [vmem:[#allocation2 + $0x2a1] sm:$0xff] %v8664_v33 }
 0x410   : > { %3815 = vst [vmem:[#allocation2 + $0x2a9] sm:$0xff] %v8665_v24  ;;  %3816 = vst [vmem:[#allocation2 + $0x2b9] sm:$0xff] %v8666_v0 }
 0x411   : > { %3817 = vst [vmem:[#allocation2 + $0x2c1] sm:$0xff] %v8667_v34  ;;  %3818 = vst [vmem:[#allocation2 + $0x2d1] sm:$0xff] %v8668_v6 }
 0x412   : > { %3819 = vst [vmem:[#allocation2 + $0x2d9] sm:$0xff] %v8669_v20  ;;  %3820 = vst [vmem:[#allocation2 + $0x2e9] sm:$0xff] %v8670_v38 }
 0x413   : > { %3821 = vst [vmem:[#allocation2 + $0x2f1] sm:$0xff] %v8671_v23  ;;  %3822 = vst [vmem:[#allocation2 + $0x301] sm:$0xff] %v8672_v48 }
 0x414   : > { %3823 = vst [vmem:[#allocation2 + $0x309] sm:$0xff] %v8673_v39  ;;  %3824 = vst [vmem:[#allocation2 + $0x319] sm:$0xff] %v7185_v31 }
 0x415   : > { %3825 = vst [vmem:[#allocation2 + $0x321] sm:$0xff] %v7198_v54  ;;  %3826 = vst [vmem:[#allocation2 + $0x331] sm:$0xff] %v7183_v49 }
 0x416   : > { %3827 = vst [vmem:[#allocation2 + $0x339] sm:$0xff] %v7196_v25 }
 0x417 PF: > { %p4601_p11 = scmp.le.s32.totalorder %s5170_s16, 0 }
 0x419   : > { %3830 = sbr.rel (%p4601_p11) target bundleno = 1389 (0x56d), region = 52 }
 0x41e   : > { %v8674_v6 = vld [vmem:[#allocation10_spill] sm:$0xff]  ;;  %v8675_v19 = vld [vmem:[#allocation12_spill] sm:$0xff]  ;;  %v8676_v23 = vld [vmem:[#allocation9_spill] sm:$0xff] }
 0x41f   : > { %v3831_v20 = vadd.f32 %v8675_v19, %v8674_v6  ;;  %v8677_v48 = vld [vmem:[#allocation42_spill] sm:$0xff]  ;;  %v8679_v24 = vld [vmem:[#allocation16_spill] sm:$0xff]  ;;  %v8680_v56 = vld [vmem:[#allocation43_spill] sm:$0xff] }
 0x420   : > { %v8678_v39 = vld [vmem:[#allocation14_spill] sm:$0xff]  ;;  %v8681_v30 = vld [vmem:[#allocation44_spill] sm:$0xff]  ;;  %v8682_v43 = vld [vmem:[#allocation45_spill] sm:$0xff] }
 0x421   : > { %v3832_v38 = vadd.f32 %v3831_v20, %v8676_v23  ;;  %v8683_v53 = vld [vmem:[#allocation21_spill] sm:$0xff]  ;;  %v8684_v4 = vld [vmem:[#allocation38_spill] sm:$0xff]  ;;  %v8685_v16 = vld [vmem:[#allocation20_spill] sm:$0xff] }
 0x422   : > { %v8686_v9 = vld [vmem:[#allocation47_spill] sm:$0xff]  ;;  %v8687_v52 = vld [vmem:[#allocation24_spill] sm:$0xff]  ;;  %v8688_v13 = vld [vmem:[#allocation22_spill] sm:$0xff] }
 0x423   : > { %v3833_v34 = vadd.f32 %v3832_v38, %v8677_v48  ;;  %v8689_v12 = vld [vmem:[#allocation25_spill] sm:$0xff]  ;;  %v8690_v37 = vld [vmem:[#allocation51_spill] sm:$0xff] }
 0x424   : > { %v8691_v46 = vld [vmem:[#allocation55_spill] sm:$0xff]  ;;  %v8692_v5 = vld [vmem:[#allocation49_spill] sm:$0xff] }
 0x425   : > { %v3834_v0 = vadd.f32 %v3833_v34, %v8678_v39  ;;  %v8693_v28 = vld [vmem:[#allocation53_spill] sm:$0xff]  ;;  %v8694_v40 = vld [vmem:[#allocation59_spill] sm:$0xff] }
 0x426   : > { %v8695_v59 = vld [vmem:[#allocation63_spill] sm:$0xff]  ;;  %v8696_v25 = vld [vmem:[#allocation57_spill] sm:$0xff] }
 0x427   : > { %v3835_v33 = vadd.f32 %v3834_v0, %v8679_v24  ;;  %v8697_v44 = vld [vmem:[#allocation61_spill] sm:$0xff]  ;;  %v8698_v54 = vld [vmem:[#allocation67_spill] sm:$0xff] }
 0x428   : > { %v8699_v51 = vld [vmem:[#allocation71_spill] sm:$0xff]  ;;  %v8700_v27 = vld [vmem:[#allocation65_spill] sm:$0xff] }
 0x429   : > { %v3836_v11 = vadd.f32 %v3835_v33, %v8680_v56  ;;  %v8701_v3 = vld [vmem:[#allocation69_spill] sm:$0xff]  ;;  %v8702_v63 = vld [vmem:[#allocation75_spill] sm:$0xff] }
 0x42a   : > { %v8703_v41 = vld [vmem:[#allocation79_spill] sm:$0xff]  ;;  %v8704_v17 = vld [vmem:[#allocation73_spill] sm:$0xff] }
 0x42b   : > { %v3837_v14 = vadd.f32 %v3836_v11, %v8681_v30  ;;  %v8705_v18 = vld [vmem:[#allocation77_spill] sm:$0xff]  ;;  %v8706_v36 = vld [vmem:[#allocation83_spill] sm:$0xff] }
 0x42c   : > { %v8707_v38 = vld [vmem:[#allocation87_spill] sm:$0xff]  ;;  %v8708_v0 = vld [vmem:[#allocation81_spill] sm:$0xff] }
 0x42d   : > { %v3838_v2 = vadd.f32 %v3837_v14, %v8682_v43  ;;  %v8709_v11 = vld [vmem:[#allocation85_spill] sm:$0xff] }
 0x42f   : > { %v3839_v57 = vadd.f32 %v3838_v2, %v8683_v53  ;;  %v8710_v2 = vld [vmem:[#allocation91_spill] sm:$0xff] }
 0x431   : > { %v3840_v26 = vadd.f32 %v3839_v57, %v8684_v4 }
 0x433   : > { %v3841_v58 = vadd.f32 %v3840_v26, %v8685_v16  ;;  %v8711_v26 = vld [vmem:[#allocation95_spill] sm:$0xff] }
 0x435   : > { %v3842_v10 = vadd.f32 %v3841_v58, %v8686_v9 }
 0x437   : > { %v3843_v22 = vadd.f32 %v3842_v10, %v8687_v52  ;;  %v8712_v10 = vld [vmem:[#allocation89_spill] sm:$0xff] }
 0x439   : > { %v3844_v1 = vadd.f32 %v3843_v22, %v8688_v13 }
 0x43b   : > { %v3845_v60 = vadd.f32 %v3844_v1, %v8689_v12  ;;  %v8713_v1 = vld [vmem:[#allocation93_spill] sm:$0xff] }
 0x43d   : > { %v3846_v8 = vadd.f32 %v3845_v60, %v8690_v37 }
 0x43f   : > { %v3847_v15 = vadd.f32 %v3846_v8, %v8691_v46  ;;  %v8714_v8 = vld [vmem:[#allocation99_spill] sm:$0xff] }
 0x441   : > { %v3848_v42 = vadd.f32 %v3847_v15, %v8692_v5 }
 0x443   : > { %v3849_v50 = vadd.f32 %v3848_v42, %v8693_v28  ;;  %v8715_v42 = vld [vmem:[#allocation103_spill] sm:$0xff] }
 0x445   : > { %v3850_v29 = vadd.f32 %v3849_v50, %v8694_v40 }
 0x447   : > { %v3851_v49 = vadd.f32 %v3850_v29, %v8695_v59  ;;  %v8716_v29 = vld [vmem:[#allocation97_spill] sm:$0xff] }
 0x449   : > { %v3852_v31 = vadd.f32 %v3851_v49, %v8696_v25 }
 0x44b   : > { %v3853_v61 = vadd.f32 %v3852_v31, %v8697_v44  ;;  %v8717_v31 = vld [vmem:[#allocation101_spill] sm:$0xff] }
 0x44d   : > { %v3854_v7 = vadd.f32 %v3853_v61, %v8698_v54 }
 0x44f   : > { %v3855_v35 = vadd.f32 %v3854_v7, %v8699_v51  ;;  %v8718_v7 = vld [vmem:[#allocation107_spill] sm:$0xff] }
 0x451   : > { %v3856_v32 = vadd.f32 %v3855_v35, %v8700_v27 }
 0x453   : > { %v3857_v47 = vadd.f32 %v3856_v32, %v8701_v3  ;;  %v8719_v32 = vld [vmem:[#allocation111_spill] sm:$0xff] }
 0x455   : > { %v3858_v21 = vadd.f32 %v3857_v47, %v8702_v63 }
 0x457   : > { %v3859_v62 = vadd.f32 %v3858_v21, %v8703_v41  ;;  %v8720_v21 = vld [vmem:[#allocation105_spill] sm:$0xff] }
 0x459   : > { %v3860_v55 = vadd.f32 %v3859_v62, %v8704_v17 }
 0x45b   : > { %v3861_v45 = vadd.f32 %v3860_v55, %v8705_v18  ;;  %v8721_v55 = vld [vmem:[#allocation109_spill] sm:$0xff] }
 0x45d   : > { %v3862_v20 = vadd.f32 %v3861_v45, %v8706_v36 }
 0x45f   : > { %v3863_v34 = vadd.f32 %v3862_v20, %v8707_v38  ;;  %v8722_v20 = vld [vmem:[#allocation30_spill] sm:$0xff] }
 0x461   : > { %v3864_v33 = vadd.f32 %v3863_v34, %v8708_v0 }
 0x463   : > { %v3865_v14 = vadd.f32 %v3864_v33, %v8709_v11  ;;  %v8723_v33 = vld [vmem:[#allocation116_spill] sm:$0xff] }
 0x465   : > { %v3866_v57 = vadd.f32 %v3865_v14, %v8710_v2 }
 0x467   : > { %v3867_v58 = vadd.f32 %v3866_v57, %v8711_v26  ;;  %v8724_v57 = vld [vmem:[#allocation29_spill] sm:$0xff] }
 0x469   : > { %v3868_v22 = vadd.f32 %v3867_v58, %v8712_v10 }
 0x46b   : > { %v3869_v60 = vadd.f32 %v3868_v22, %v8713_v1  ;;  %v8725_v22 = vld [vmem:[#allocation26_spill] sm:$0xff] }
 0x46d   : > { %v3870_v15 = vadd.f32 %v3869_v60, %v8714_v8 }
 0x46f   : > { %v3871_v50 = vadd.f32 %v3870_v15, %v8715_v42  ;;  %v8726_v15 = vld [vmem:[#allocation119_spill] sm:$0xff] }
 0x471   : > { %v3872_v49 = vadd.f32 %v3871_v50, %v8716_v29  ;;  %v8727_v29 = vld [vmem:[#allocation122_spill] sm:$0xff] }
 0x473   : > { %v3873_v61 = vadd.f32 %v3872_v49, %v8717_v31  ;;  %v8728_v31 = vld [vmem:[#allocation27_spill] sm:$0xff] }
 0x475   : > { %v3874_v35 = vadd.f32 %v3873_v61, %v8718_v7  ;;  %v8729_v7 = vld [vmem:[#allocation31_spill] sm:$0xff] }
 0x477   : > { %v3875_v47 = vadd.f32 %v3874_v35, %v8719_v32  ;;  %v8730_v32 = vld [vmem:[#allocation125_spill] sm:$0xff] }
 0x479   : > { %v3876_v62 = vadd.f32 %v3875_v47, %v8720_v21  ;;  %v8731_v21 = vld [vmem:[#allocation128_spill] sm:$0xff] }
 0x47b   : > { %v3877_v45 = vadd.f32 %v3876_v62, %v8721_v55  ;;  %v8732_v55 = vld [vmem:[#allocation32_spill] sm:$0xff] }
 0x47d   : > { %v3878_v34 = vadd.f32 %v3877_v45, %v8722_v20  ;;  %v8733_v20 = vld [vmem:[#allocation41_spill] sm:$0xff] }
 0x47f   : > { %v3879_v14 = vadd.f32 %v3878_v34, %v8723_v33  ;;  %v8734_v33 = vld [vmem:[#allocation7_spill] sm:$0xff] }
 0x481   : > { %v3880_v58 = vadd.f32 %v3879_v14, %v8724_v57  ;;  %v8735_v57 = vld [vmem:[#allocation130_spill] sm:$0xff] }
 0x483   : > { %v3881_v60 = vadd.f32 %v3880_v58, %v8725_v22  ;;  %v8736_v22 = vld [vmem:[#allocation33_spill] sm:$0xff] }
 0x485   : > { %v3882_v50 = vadd.f32 %v3881_v60, %v8726_v15  ;;  %v8737_v15 = vld [vmem:[#allocation129_spill] sm:$0xff] }
 0x487   : > { %v3883_v49 = vadd.f32 %v3882_v50, %v8727_v29 }
 0x489   : > { %v3884_v61 = vadd.f32 %v3883_v49, %v8728_v31 }
 0x48b   : > { %v3885_v35 = vadd.f32 %v3884_v61, %v8729_v7 }
 0x48d   : > { %v3886_v47 = vadd.f32 %v3885_v35, %v8730_v32 }
 0x48f   : > { %v3887_v62 = vadd.f32 %v3886_v47, %v8731_v21 }
 0x491   : > { %v3888_v45 = vadd.f32 %v3887_v62, %v8732_v55 }
 0x493   : > { %v3889_v34 = vadd.f32 %v3888_v45, %v8733_v20 }
 0x495   : > { %v3890_v14 = vadd.f32 %v3889_v34, %v8734_v33 }
 0x497   : > { %v3891_v58 = vadd.f32 %v3890_v14, %v8735_v57 }
 0x499   : > { %v3892_v60 = vadd.f32 %v3891_v58, %v8736_v22 }
 0x49b   : > { %v3893_v50 = vadd.f32 %v3892_v60, %v8737_v15 }
 0x49d   : > { %v3894_v29 = vrot.slane %v3893_v50, 4 }
 0x49f   : > { %v3895_v49 = vadd.f32 %v3894_v29, %v3893_v50 }
 0x4a1   : > { %v3896_v31 = vrot.slane %v3895_v49, 2 }
 0x4a3   : > { %v3897_v61 = vadd.f32 %v3896_v31, %v3895_v49 }
 0x4a5   : > { %v3898_v7 = vrot.slane %v3897_v61, 1 }
 0x4a7   : > { %v3899_v35 = vadd.f32 %v3898_v7, %v3897_v61 }
 0x4a9   : > { %v7467_v32 = vmul.f32 0.001953125, %v3899_v35 }
 0x4ab   : > { %v7471_v47 = vsub.f32 %v8674_v6, %v7467_v32  ;;  %v7475_v62 = vsub.f32 %v8675_v19, %v7467_v32  ;;  %v7479_v45 = vsub.f32 %v8676_v23, %v7467_v32  ;;  %v7483_v29 = vsub.f32 %v8677_v48, %v7467_v32 }
 0x4ac   : > { %v7491_v6 = vsub.f32 %v8678_v39, %v7467_v32  ;;  %v7497_v23 = vsub.f32 %v8679_v24, %v7467_v32  ;;  %v7503_v14 = vsub.f32 %v8680_v56, %v7467_v32  ;;  %v7509_v60 = vsub.f32 %v8681_v30, %v7467_v32 }
 0x4ad   : > { %v3965_v31 = vmul.f32 %v7471_v47, %v7471_v47  ;;  %v3966_v7 = vmul.f32 %v7475_v62, %v7475_v62  ;;  %v3967_v19 = vmul.f32 %v7479_v45, %v7479_v45  ;;  %v3968_v48 = vmul.f32 %v7483_v29, %v7483_v29 }
 0x4ae   : > { %v3969_v58 = vmul.f32 %v7491_v6, %v7491_v6  ;;  %v3970_v24 = vmul.f32 %v7497_v23, %v7497_v23  ;;  %v7515_v49 = vsub.f32 %v8682_v43, %v7467_v32  ;;  %v3971_v56 = vmul.f32 %v7503_v14, %v7503_v14 }
 0x4af   : > { %v4029_v34 = vadd.f32 %v3966_v7, %v3965_v31  ;;  %v7521_v35 = vsub.f32 %v8683_v53, %v7467_v32  ;;  %v3972_v30 = vmul.f32 %v7509_v60, %v7509_v60  ;;  %v7527_v7 = vsub.f32 %v8684_v4, %v7467_v32 }
 0x4b0   : > { %v3973_v43 = vmul.f32 %v7515_v49, %v7515_v49 }
 0x4b1   : > { %v4030_v39 = vadd.f32 %v4029_v34, %v3967_v19  ;;  %v3974_v53 = vmul.f32 %v7521_v35, %v7521_v35  ;;  %v3975_v4 = vmul.f32 %v7527_v7, %v7527_v7 }
 0x4b3   : > { %v4031_v50 = vadd.f32 %v4030_v39, %v3968_v48  ;;  %v7533_v48 = vsub.f32 %v8685_v16, %v7467_v32 }
 0x4b5   : > { %v4032_v61 = vadd.f32 %v4031_v50, %v3969_v58  ;;  %v7539_v58 = vsub.f32 %v8686_v9, %v7467_v32  ;;  %v3976_v16 = vmul.f32 %v7533_v48, %v7533_v48 }
 0x4b7   : > { %v4033_v31 = vadd.f32 %v4032_v61, %v3970_v24  ;;  %v7545_v24 = vsub.f32 %v8687_v52, %v7467_v32  ;;  %v3977_v9 = vmul.f32 %v7539_v58, %v7539_v58 }
 0x4b9   : > { %v4034_v19 = vadd.f32 %v4033_v31, %v3971_v56  ;;  %v7551_v56 = vsub.f32 %v8688_v13, %v7467_v32  ;;  %v3978_v52 = vmul.f32 %v7545_v24, %v7545_v24 }
 0x4bb   : > { %v4035_v34 = vadd.f32 %v4034_v19, %v3972_v30  ;;  %v7557_v30 = vsub.f32 %v8689_v12, %v7467_v32  ;;  %v3979_v13 = vmul.f32 %v7551_v56, %v7551_v56 }
 0x4bd   : > { %v4036_v39 = vadd.f32 %v4035_v34, %v3973_v43  ;;  %v7563_v43 = vsub.f32 %v8690_v37, %v7467_v32  ;;  %v3980_v12 = vmul.f32 %v7557_v30, %v7557_v30 }
 0x4bf   : > { %v4037_v50 = vadd.f32 %v4036_v39, %v3974_v53  ;;  %v7569_v53 = vsub.f32 %v8691_v46, %v7467_v32  ;;  %v3981_v37 = vmul.f32 %v7563_v43, %v7563_v43 }
 0x4c1   : > { %v4038_v61 = vadd.f32 %v4037_v50, %v3975_v4  ;;  %v7575_v4 = vsub.f32 %v8692_v5, %v7467_v32  ;;  %v3982_v46 = vmul.f32 %v7569_v53, %v7569_v53 }
 0x4c3   : > { %v4039_v31 = vadd.f32 %v4038_v61, %v3976_v16  ;;  %v7581_v16 = vsub.f32 %v8693_v28, %v7467_v32  ;;  %v3983_v5 = vmul.f32 %v7575_v4, %v7575_v4 }
 0x4c5   : > { %v4040_v19 = vadd.f32 %v4039_v31, %v3977_v9  ;;  %v7587_v9 = vsub.f32 %v8694_v40, %v7467_v32  ;;  %v3984_v28 = vmul.f32 %v7581_v16, %v7581_v16 }
 0x4c7   : > { %v4041_v34 = vadd.f32 %v4040_v19, %v3978_v52  ;;  %v7593_v52 = vsub.f32 %v8695_v59, %v7467_v32  ;;  %v3985_v40 = vmul.f32 %v7587_v9, %v7587_v9 }
 0x4c9   : > { %v4042_v39 = vadd.f32 %v4041_v34, %v3979_v13  ;;  %v7599_v13 = vsub.f32 %v8696_v25, %v7467_v32  ;;  %v3986_v59 = vmul.f32 %v7593_v52, %v7593_v52 }
 0x4cb   : > { %v4043_v50 = vadd.f32 %v4042_v39, %v3980_v12  ;;  %v7605_v12 = vsub.f32 %v8697_v44, %v7467_v32  ;;  %v3987_v25 = vmul.f32 %v7599_v13, %v7599_v13 }
 0x4cd   : > { %v4044_v61 = vadd.f32 %v4043_v50, %v3981_v37  ;;  %v7611_v37 = vsub.f32 %v8698_v54, %v7467_v32  ;;  %v3988_v44 = vmul.f32 %v7605_v12, %v7605_v12 }
 0x4cf   : > { %v4045_v31 = vadd.f32 %v4044_v61, %v3982_v46  ;;  %v7617_v46 = vsub.f32 %v8699_v51, %v7467_v32  ;;  %v3989_v54 = vmul.f32 %v7611_v37, %v7611_v37 }
 0x4d1   : > { %v4046_v19 = vadd.f32 %v4045_v31, %v3983_v5  ;;  %v7623_v5 = vsub.f32 %v8700_v27, %v7467_v32  ;;  %v3990_v51 = vmul.f32 %v7617_v46, %v7617_v46 }
 0x4d3   : > { %v4047_v34 = vadd.f32 %v4046_v19, %v3984_v28  ;;  %v7629_v28 = vsub.f32 %v8701_v3, %v7467_v32  ;;  %v3991_v27 = vmul.f32 %v7623_v5, %v7623_v5 }
 0x4d5   : > { %v4048_v39 = vadd.f32 %v4047_v34, %v3985_v40  ;;  %v7635_v40 = vsub.f32 %v8702_v63, %v7467_v32  ;;  %v3992_v3 = vmul.f32 %v7629_v28, %v7629_v28 }
 0x4d7   : > { %v4049_v50 = vadd.f32 %v4048_v39, %v3986_v59  ;;  %v7641_v59 = vsub.f32 %v8703_v41, %v7467_v32  ;;  %v3993_v63 = vmul.f32 %v7635_v40, %v7635_v40 }
 0x4d9   : > { %v4050_v61 = vadd.f32 %v4049_v50, %v3987_v25  ;;  %v7647_v25 = vsub.f32 %v8704_v17, %v7467_v32  ;;  %v3994_v41 = vmul.f32 %v7641_v59, %v7641_v59 }
 0x4db   : > { %v4051_v31 = vadd.f32 %v4050_v61, %v3988_v44  ;;  %v7653_v44 = vsub.f32 %v8705_v18, %v7467_v32  ;;  %v3995_v17 = vmul.f32 %v7647_v25, %v7647_v25 }
 0x4dd   : > { %v4052_v19 = vadd.f32 %v4051_v31, %v3989_v54  ;;  %v7659_v54 = vsub.f32 %v8706_v36, %v7467_v32  ;;  %v3996_v18 = vmul.f32 %v7653_v44, %v7653_v44 }
 0x4df   : > { %v4053_v34 = vadd.f32 %v4052_v19, %v3990_v51  ;;  %v7665_v51 = vsub.f32 %v8707_v38, %v7467_v32  ;;  %v3997_v36 = vmul.f32 %v7659_v54, %v7659_v54 }
 0x4e1   : > { %v4054_v39 = vadd.f32 %v4053_v34, %v3991_v27  ;;  %v7671_v27 = vsub.f32 %v8708_v0, %v7467_v32  ;;  %v3998_v38 = vmul.f32 %v7665_v51, %v7665_v51 }
 0x4e3   : > { %v4055_v50 = vadd.f32 %v4054_v39, %v3992_v3  ;;  %v7677_v3 = vsub.f32 %v8709_v11, %v7467_v32  ;;  %v3999_v0 = vmul.f32 %v7671_v27, %v7671_v27 }
 0x4e5   : > { %v4056_v61 = vadd.f32 %v4055_v50, %v3993_v63  ;;  %v7683_v63 = vsub.f32 %v8710_v2, %v7467_v32  ;;  %v4000_v11 = vmul.f32 %v7677_v3, %v7677_v3 }
 0x4e7   : > { %v4057_v31 = vadd.f32 %v4056_v61, %v3994_v41  ;;  %v7689_v41 = vsub.f32 %v8711_v26, %v7467_v32  ;;  %v4001_v2 = vmul.f32 %v7683_v63, %v7683_v63 }
 0x4e9   : > { %v4058_v19 = vadd.f32 %v4057_v31, %v3995_v17  ;;  %v7695_v17 = vsub.f32 %v8712_v10, %v7467_v32  ;;  %v4002_v26 = vmul.f32 %v7689_v41, %v7689_v41 }
 0x4eb   : > { %v4059_v34 = vadd.f32 %v4058_v19, %v3996_v18  ;;  %v7701_v18 = vsub.f32 %v8713_v1, %v7467_v32  ;;  %v4003_v10 = vmul.f32 %v7695_v17, %v7695_v17 }
 0x4ed   : > { %v4060_v39 = vadd.f32 %v4059_v34, %v3997_v36  ;;  %8738 = vst [vmem:[#allocation131_spill] sm:$0xff] %v7701_v18  ;;  %v7707_v36 = vsub.f32 %v8714_v8, %v7467_v32  ;;  %v4004_v1 = vmul.f32 %v7701_v18, %v7701_v18 }
 0x4ef   : > { %v4061_v50 = vadd.f32 %v4060_v39, %v3998_v38  ;;  %8739 = vst [vmem:[#allocation132_spill] sm:$0xff] %v7707_v36  ;;  %v7713_v38 = vsub.f32 %v8715_v42, %v7467_v32  ;;  %v4005_v8 = vmul.f32 %v7707_v36, %v7707_v36 }
 0x4f1   : > { %v4062_v61 = vadd.f32 %v4061_v50, %v3999_v0  ;;  %8740 = vst [vmem:[#allocation133_spill] sm:$0xff] %v7713_v38  ;;  %v8741_v0 = vld [vmem:[#allocation97_spill] sm:$0xff]  ;;  %v4006_v42 = vmul.f32 %v7713_v38, %v7713_v38 }
 0x4f2   : > { %v7719_v39 = vsub.f32 %v8741_v0, %v7467_v32  ;;  %v8743_v50 = vld [vmem:[#allocation101_spill] sm:$0xff]  ;;  %v8747_v0 = vld [vmem:[#allocation111_spill] sm:$0xff] }
 0x4f3   : > { %v4063_v31 = vadd.f32 %v4062_v61, %v4000_v11  ;;  %v7725_v61 = vsub.f32 %v8743_v50, %v7467_v32  ;;  %v7737_v36 = vsub.f32 %v8747_v0, %v7467_v32  ;;  %v8749_v50 = vld [vmem:[#allocation105_spill] sm:$0xff]  ;;  %v8753_v0 = vld [vmem:[#allocation30_spill] sm:$0xff] }
 0x4f4   : > { %8742 = vst [vmem:[#allocation134_spill] sm:$0xff] %v7719_v39  ;;  %v7743_v38 = vsub.f32 %v8749_v50, %v7467_v32  ;;  %v8755_v50 = vld [vmem:[#allocation116_spill] sm:$0xff] }
 0x4f5   : > { %v4064_v19 = vadd.f32 %v4063_v31, %v4001_v2  ;;  %8744 = vst [vmem:[#allocation135_spill] sm:$0xff] %v7725_v61  ;;  %v8745_v31 = vld [vmem:[#allocation107_spill] sm:$0xff]  ;;  %8748 = vst [vmem:[#allocation137_spill] sm:$0xff] %v7737_v36 }
 0x4f6   : > { %v7731_v18 = vsub.f32 %v8745_v31, %v7467_v32  ;;  %8750 = vst [vmem:[#allocation138_spill] sm:$0xff] %v7743_v38  ;;  %v8751_v31 = vld [vmem:[#allocation109_spill] sm:$0xff] }
 0x4f7   : > { %v4065_v34 = vadd.f32 %v4064_v19, %v4002_v26  ;;  %v4007_v26 = vmul.f32 %v7719_v39, %v7719_v39  ;;  %v7749_v39 = vsub.f32 %v8751_v31, %v7467_v32  ;;  %v8757_v31 = vld [vmem:[#allocation29_spill] sm:$0xff] }
 0x4f8   : > { %8746 = vst [vmem:[#allocation136_spill] sm:$0xff] %v7731_v18 }
 0x4f9   : > { %v4066_v11 = vadd.f32 %v4065_v34, %v4003_v10  ;;  %v4008_v10 = vmul.f32 %v7725_v61, %v7725_v61  ;;  %8752 = vst [vmem:[#allocation139_spill] sm:$0xff] %v7749_v39  ;;  %v7755_v61 = vsub.f32 %v8753_v0, %v7467_v32  ;;  %v8759_v0 = vld [vmem:[#allocation26_spill] sm:$0xff] }
 0x4fb   : > { %v4067_v2 = vadd.f32 %v4066_v11, %v4004_v1  ;;  %v4009_v1 = vmul.f32 %v7731_v18, %v7731_v18  ;;  %8754 = vst [vmem:[#allocation140_spill] sm:$0xff] %v7755_v61  ;;  %v7761_v18 = vsub.f32 %v8755_v50, %v7467_v32  ;;  %v8761_v50 = vld [vmem:[#allocation119_spill] sm:$0xff] }
 0x4fd   : > { %v4068_v19 = vadd.f32 %v4067_v2, %v4005_v8  ;;  %v4010_v8 = vmul.f32 %v7737_v36, %v7737_v36  ;;  %8756 = vst [vmem:[#allocation141_spill] sm:$0xff] %v7761_v18  ;;  %v7767_v36 = vsub.f32 %v8757_v31, %v7467_v32  ;;  %v8762_v31 = vld [vmem:[#allocation122_spill] sm:$0xff] }
 0x4ff   : > { %v4069_v34 = vadd.f32 %v4068_v19, %v4006_v42  ;;  %v4011_v42 = vmul.f32 %v7743_v38, %v7743_v38  ;;  %8758 = vst [vmem:[#allocation142_spill] sm:$0xff] %v7767_v36  ;;  %v7773_v38 = vsub.f32 %v8759_v0, %v7467_v32  ;;  %v8763_v0 = vld [vmem:[#allocation27_spill] sm:$0xff] }
 0x501   : > { %v4070_v11 = vadd.f32 %v4069_v34, %v4007_v26  ;;  %v4012_v26 = vmul.f32 %v7749_v39, %v7749_v39  ;;  %8760 = vst [vmem:[#allocation143_spill] sm:$0xff] %v7773_v38  ;;  %v7779_v39 = vsub.f32 %v8761_v50, %v7467_v32  ;;  %v8764_v50 = vld [vmem:[#allocation31_spill] sm:$0xff] }
 0x503   : > { %v4071_v2 = vadd.f32 %v4070_v11, %v4008_v10  ;;  %v4013_v10 = vmul.f32 %v7755_v61, %v7755_v61  ;;  %v7785_v61 = vsub.f32 %v8762_v31, %v7467_v32  ;;  %v8766_v31 = vld [vmem:[#allocation125_spill] sm:$0xff] }
 0x505   : > { %v4072_v19 = vadd.f32 %v4071_v2, %v4009_v1  ;;  %v4014_v1 = vmul.f32 %v7761_v18, %v7761_v18  ;;  %v7791_v18 = vsub.f32 %v8763_v0, %v7467_v32  ;;  %v7809_v0 = vsub.f32 %v8731_v21, %v7467_v32 }
 0x507   : > { %v4073_v34 = vadd.f32 %v4072_v19, %v4010_v8  ;;  %v4015_v8 = vmul.f32 %v7767_v36, %v7767_v36  ;;  %v7797_v36 = vsub.f32 %v8764_v50, %v7467_v32  ;;  %8768 = vst [vmem:[#allocation146_spill] sm:$0xff] %v7809_v0  ;;  %v7815_v50 = vsub.f32 %v8732_v55, %v7467_v32 }
 0x508   : > { %v4022_v21 = vmul.f32 %v7809_v0, %v7809_v0 }
 0x509   : > { %v4074_v11 = vadd.f32 %v4073_v34, %v4011_v42  ;;  %v4016_v42 = vmul.f32 %v7773_v38, %v7773_v38  ;;  %8765 = vst [vmem:[#allocation144_spill] sm:$0xff] %v7797_v36  ;;  %v7803_v38 = vsub.f32 %v8766_v31, %v7467_v32  ;;  %8769 = vst [vmem:[#allocation147_spill] sm:$0xff] %v7815_v50 }
 0x50a   : > { %v7821_v31 = vsub.f32 %v8733_v20, %v7467_v32  ;;  %v4023_v55 = vmul.f32 %v7815_v50, %v7815_v50 }
 0x50b   : > { %v4075_v2 = vadd.f32 %v4074_v11, %v4012_v26  ;;  %v4017_v26 = vmul.f32 %v7779_v39, %v7779_v39  ;;  %8767 = vst [vmem:[#allocation145_spill] sm:$0xff] %v7803_v38 }
 0x50c   : > { %8770 = vst [vmem:[#allocation148_spill] sm:$0xff] %v7821_v31  ;;  %v4024_v20 = vmul.f32 %v7821_v31, %v7821_v31 }
 0x50d   : > { %v4076_v19 = vadd.f32 %v4075_v2, %v4013_v10  ;;  %v4018_v10 = vmul.f32 %v7785_v61, %v7785_v61 }
 0x50f   : > { %v4077_v34 = vadd.f32 %v4076_v19, %v4014_v1  ;;  %v4019_v1 = vmul.f32 %v7791_v18, %v7791_v18 }
 0x511   : > { %v4078_v11 = vadd.f32 %v4077_v34, %v4015_v8  ;;  %v4020_v8 = vmul.f32 %v7797_v36, %v7797_v36 }
 0x513   : > { %v4079_v2 = vadd.f32 %v4078_v11, %v4016_v42  ;;  %v4021_v42 = vmul.f32 %v7803_v38, %v7803_v38 }
 0x515   : > { %v4080_v19 = vadd.f32 %v4079_v2, %v4017_v26  ;;  %v7827_v2 = vsub.f32 %v8734_v33, %v7467_v32 }
 0x517   : > { %v4081_v34 = vadd.f32 %v4080_v19, %v4018_v10  ;;  %8771 = vst [vmem:[#allocation149_spill] sm:$0xff] %v7827_v2  ;;  %v7833_v19 = vsub.f32 %v8735_v57, %v7467_v32  ;;  %v4025_v33 = vmul.f32 %v7827_v2, %v7827_v2 }
 0x519   : > { %v4082_v11 = vadd.f32 %v4081_v34, %v4019_v1  ;;  %v7839_v34 = vsub.f32 %v8736_v22, %v7467_v32  ;;  %v4026_v57 = vmul.f32 %v7833_v19, %v7833_v19 }
 0x51b   : > { %v4083_v26 = vadd.f32 %v4082_v11, %v4020_v8  ;;  %v7845_v11 = vsub.f32 %v8737_v15, %v7467_v32 }
 0x51d   : > { %v4084_v10 = vadd.f32 %v4083_v26, %v4021_v42  ;;  %v4027_v26 = vmul.f32 %v7839_v34, %v7839_v34  ;;  %v4028_v22 = vmul.f32 %v7845_v11, %v7845_v11 }
 0x51f   : > { %v4085_v1 = vadd.f32 %v4084_v10, %v4022_v21 }
 0x521   : > { %v4086_v8 = vadd.f32 %v4085_v1, %v4023_v55 }
 0x523   : > { %v4087_v42 = vadd.f32 %v4086_v8, %v4024_v20 }
 0x525   : > { %v4088_v21 = vadd.f32 %v4087_v42, %v4025_v33 }
 0x527   : > { %v4089_v10 = vadd.f32 %v4088_v21, %v4026_v57 }
 0x529   : > { %v4090_v31 = vadd.f32 %v4089_v10, %v4027_v26 }
 0x52b   : > { %v4091_v50 = vadd.f32 %v4090_v31, %v4028_v22  ;;  %v8778_v22 = vld [vmem:[#allocation137_spill] sm:$0xff] }
 0x52d   : > { %v4092_v2 = vrot.slane %v4091_v50, 4 }
 0x52f   : > { %v4093_v55 = vadd.f32 %v4092_v2, %v4091_v50  ;;  %v8774_v2 = vld [vmem:[#allocation133_spill] sm:$0xff] }
 0x531   : > { %v4094_v1 = vrot.slane %v4093_v55, 2 }
 0x533   : > { %v4095_v0 = vadd.f32 %v4094_v1, %v4093_v55  ;;  %v8779_v55 = vld [vmem:[#allocation138_spill] sm:$0xff] }
 0x535   : > { %v4096_v32 = vrot.slane %v4095_v0, 1 }
 0x537   : > { %v4097_v15 = vadd.f32 %v4096_v32, %v4095_v0  ;;  %v8780_v32 = vld [vmem:[#allocation139_spill] sm:$0xff] }
 0x539   : > { %v4098_v38 = vmul.f32 0.001953125, %v4097_v15 }
 0x53b   : > { %v4099_v36 = vadd.f32 1e-05, %v4098_v38 }
 0x53d   : > { %5096 = vrsqrt.f32 %v4099_v36 }
 0x54a   : > { %v7853_v20 = vpop.eup %5096 }
 0x54b   : > { %v4101_v33 = vmul.f32 %v7853_v20, %v7471_v47  ;;  %v4102_v8 = vmul.f32 %v7853_v20, %v7475_v62  ;;  %v4103_v31 = vmul.f32 %v7853_v20, %v7479_v45  ;;  %v4104_v50 = vmul.f32 %v7853_v20, %v7483_v29 }
 0x54c   : > { %v4105_v0 = vmul.f32 %v7853_v20, %v7491_v6  ;;  %v4106_v36 = vmul.f32 %v7853_v20, %v7497_v23  ;;  %v4107_v38 = vmul.f32 %v7853_v20, %v7503_v14  ;;  %v4108_v47 = vmul.f32 %v7853_v20, %v7509_v60 }
 0x54d   : > { %4165 = vst [vmem:[#allocation2 + $0x19] sm:$0xff] %v4101_v33  ;;  %4166 = vst [vmem:[#allocation2 + $0x21] sm:$0xff] %v4102_v8  ;;  %v4109_v62 = vmul.f32 %v7853_v20, %v7515_v49  ;;  %v4110_v45 = vmul.f32 %v7853_v20, %v7521_v35  ;;  %v4111_v29 = vmul.f32 %v7853_v20, %v7527_v7  ;;  %v8781_v33 = vld [vmem:[#allocation140_spill] sm:$0xff] }
 0x54e   : > { %4167 = vst [vmem:[#allocation2 + $0x31] sm:$0xff] %v4103_v31  ;;  %4168 = vst [vmem:[#allocation2 + $0x39] sm:$0xff] %v4104_v50  ;;  %v4112_v6 = vmul.f32 %v7853_v20, %v7533_v48  ;;  %v4113_v23 = vmul.f32 %v7853_v20, %v7539_v58  ;;  %v4114_v14 = vmul.f32 %v7853_v20, %v7545_v24  ;;  %v8782_v31 = vld [vmem:[#allocation141_spill] sm:$0xff] }
 0x54f   : > { %4169 = vst [vmem:[#allocation2 + $0x49] sm:$0xff] %v4105_v0  ;;  %4170 = vst [vmem:[#allocation2 + $0x51] sm:$0xff] %v4106_v36  ;;  %v4115_v60 = vmul.f32 %v7853_v20, %v7551_v56  ;;  %v4116_v49 = vmul.f32 %v7853_v20, %v7557_v30  ;;  %v4117_v35 = vmul.f32 %v7853_v20, %v7563_v43  ;;  %v8783_v0 = vld [vmem:[#allocation142_spill] sm:$0xff] }
 0x550   : > { %4171 = vst [vmem:[#allocation2 + $0x61] sm:$0xff] %v4107_v38  ;;  %4172 = vst [vmem:[#allocation2 + $0x69] sm:$0xff] %v4108_v47  ;;  %v4118_v7 = vmul.f32 %v7853_v20, %v7569_v53  ;;  %v4119_v48 = vmul.f32 %v7853_v20, %v7575_v4  ;;  %v4120_v58 = vmul.f32 %v7853_v20, %v7581_v16  ;;  %v8784_v38 = vld [vmem:[#allocation143_spill] sm:$0xff] }
 0x551   : > { %4173 = vst [vmem:[#allocation2 + $0x79] sm:$0xff] %v4109_v62  ;;  %4174 = vst [vmem:[#allocation2 + $0x81] sm:$0xff] %v4110_v45  ;;  %v4121_v24 = vmul.f32 %v7853_v20, %v7587_v9  ;;  %v4122_v56 = vmul.f32 %v7853_v20, %v7593_v52  ;;  %v4123_v30 = vmul.f32 %v7853_v20, %v7599_v13 }
 0x552   : > { %4175 = vst [vmem:[#allocation2 + $0x91] sm:$0xff] %v4111_v29  ;;  %4176 = vst [vmem:[#allocation2 + $0x99] sm:$0xff] %v4112_v6  ;;  %v4124_v43 = vmul.f32 %v7853_v20, %v7605_v12  ;;  %v4125_v53 = vmul.f32 %v7853_v20, %v7611_v37  ;;  %v4126_v4 = vmul.f32 %v7853_v20, %v7617_v46  ;;  %v8785_v6 = vld [vmem:[#allocation144_spill] sm:$0xff] }
 0x553   : > { %4177 = vst [vmem:[#allocation2 + $0xa9] sm:$0xff] %v4113_v23  ;;  %4178 = vst [vmem:[#allocation2 + $0xb1] sm:$0xff] %v4114_v14  ;;  %v4127_v16 = vmul.f32 %v7853_v20, %v7623_v5  ;;  %v4128_v9 = vmul.f32 %v7853_v20, %v7629_v28  ;;  %v4129_v52 = vmul.f32 %v7853_v20, %v7635_v40  ;;  %v8786_v14 = vld [vmem:[#allocation145_spill] sm:$0xff] }
 0x554   : > { %4179 = vst [vmem:[#allocation2 + $0xc1] sm:$0xff] %v4115_v60  ;;  %4180 = vst [vmem:[#allocation2 + $0xc9] sm:$0xff] %v4116_v49  ;;  %v4130_v13 = vmul.f32 %v7853_v20, %v7641_v59  ;;  %v4131_v12 = vmul.f32 %v7853_v20, %v7647_v25  ;;  %v4132_v37 = vmul.f32 %v7853_v20, %v7653_v44  ;;  %v8787_v49 = vld [vmem:[#allocation146_spill] sm:$0xff] }
 0x555   : > { %4181 = vst [vmem:[#allocation2 + $0xd9] sm:$0xff] %v4117_v35  ;;  %4182 = vst [vmem:[#allocation2 + $0xe1] sm:$0xff] %v4118_v7  ;;  %v4133_v46 = vmul.f32 %v7853_v20, %v7659_v54  ;;  %v4134_v5 = vmul.f32 %v7853_v20, %v7665_v51  ;;  %v4135_v28 = vmul.f32 %v7853_v20, %v7671_v27  ;;  %v8772_v54 = vld [vmem:[#allocation131_spill] sm:$0xff]  ;;  %v8773_v27 = vld [vmem:[#allocation132_spill] sm:$0xff] }
 0x556   : > { %4183 = vst [vmem:[#allocation2 + $0xf1] sm:$0xff] %v4119_v48  ;;  %4184 = vst [vmem:[#allocation2 + $0xf9] sm:$0xff] %v4120_v58  ;;  %v4136_v40 = vmul.f32 %v7853_v20, %v7677_v3  ;;  %v4137_v59 = vmul.f32 %v7853_v20, %v7683_v63  ;;  %v4138_v25 = vmul.f32 %v7853_v20, %v7689_v41  ;;  %v8775_v63 = vld [vmem:[#allocation134_spill] sm:$0xff]  ;;  %v8776_v41 = vld [vmem:[#allocation135_spill] sm:$0xff] }
 0x557   : > { %4185 = vst [vmem:[#allocation2 + $0x109] sm:$0xff] %v4121_v24  ;;  %4186 = vst [vmem:[#allocation2 + $0x111] sm:$0xff] %v4122_v56  ;;  %v4139_v44 = vmul.f32 %v7853_v20, %v7695_v17  ;;  %v4140_v51 = vmul.f32 %v7853_v20, %v8772_v54  ;;  %v4141_v3 = vmul.f32 %v7853_v20, %v8773_v27  ;;  %v8777_v17 = vld [vmem:[#allocation136_spill] sm:$0xff] }
 0x558   : > { %4187 = vst [vmem:[#allocation2 + $0x121] sm:$0xff] %v4123_v30  ;;  %4188 = vst [vmem:[#allocation2 + $0x129] sm:$0xff] %v4124_v43  ;;  %v4142_v57 = vmul.f32 %v7853_v20, %v8774_v2  ;;  %v4143_v42 = vmul.f32 %v7853_v20, %v8775_v63  ;;  %v4144_v26 = vmul.f32 %v7853_v20, %v8776_v41 }
 0x559   : > { %4189 = vst [vmem:[#allocation2 + $0x139] sm:$0xff] %v4125_v53  ;;  %4190 = vst [vmem:[#allocation2 + $0x141] sm:$0xff] %v4126_v4  ;;  %v4145_v21 = vmul.f32 %v7853_v20, %v8777_v17  ;;  %v4146_v10 = vmul.f32 %v7853_v20, %v8778_v22  ;;  %v4147_v1 = vmul.f32 %v7853_v20, %v8779_v55 }
 0x55a   : > { %4191 = vst [vmem:[#allocation2 + $0x151] sm:$0xff] %v4127_v16  ;;  %4192 = vst [vmem:[#allocation2 + $0x159] sm:$0xff] %v4128_v9  ;;  %v4148_v15 = vmul.f32 %v7853_v20, %v8780_v32  ;;  %v4149_v8 = vmul.f32 %v7853_v20, %v8781_v33  ;;  %v4150_v50 = vmul.f32 %v7853_v20, %v8782_v31 }
 0x55b   : > { %4193 = vst [vmem:[#allocation2 + $0x169] sm:$0xff] %v4129_v52  ;;  %4194 = vst [vmem:[#allocation2 + $0x171] sm:$0xff] %v4130_v13  ;;  %v4151_v36 = vmul.f32 %v7853_v20, %v8783_v0  ;;  %v4152_v47 = vmul.f32 %v7853_v20, %v8784_v38  ;;  %v4153_v62 = vmul.f32 %v7853_v20, %v7779_v39  ;;  %v8788_v39 = vld [vmem:[#allocation147_spill] sm:$0xff] }
 0x55c   : > { %4195 = vst [vmem:[#allocation2 + $0x181] sm:$0xff] %v4131_v12  ;;  %4196 = vst [vmem:[#allocation2 + $0x189] sm:$0xff] %v4132_v37  ;;  %v4154_v45 = vmul.f32 %v7853_v20, %v7785_v61  ;;  %v4155_v29 = vmul.f32 %v7853_v20, %v7791_v18  ;;  %v4156_v23 = vmul.f32 %v7853_v20, %v8785_v6  ;;  %v8789_v61 = vld [vmem:[#allocation148_spill] sm:$0xff]  ;;  %v8790_v18 = vld [vmem:[#allocation149_spill] sm:$0xff] }
 0x55d   : > { %4197 = vst [vmem:[#allocation2 + $0x1c9] sm:$0xff] %v4133_v46  ;;  %4198 = vst [vmem:[#allocation2 + $0x1d1] sm:$0xff] %v4134_v5  ;;  %v4157_v60 = vmul.f32 %v7853_v20, %v8786_v14  ;;  %v4158_v35 = vmul.f32 %v7853_v20, %v8787_v49  ;;  %v4159_v7 = vmul.f32 %v7853_v20, %v8788_v39 }
 0x55e   : > { %4199 = vst [vmem:[#allocation2 + $0x1e1] sm:$0xff] %v4135_v28  ;;  %4200 = vst [vmem:[#allocation2 + $0x1e9] sm:$0xff] %v4136_v40  ;;  %v4160_v48 = vmul.f32 %v7853_v20, %v8789_v61  ;;  %v4161_v58 = vmul.f32 %v7853_v20, %v8790_v18  ;;  %v4162_v24 = vmul.f32 %v7853_v20, %v7833_v19 }
 0x55f   : > { %4201 = vst [vmem:[#allocation2 + $0x1f9] sm:$0xff] %v4137_v59  ;;  %4202 = vst [vmem:[#allocation2 + $0x201] sm:$0xff] %v4138_v25  ;;  %v4163_v56 = vmul.f32 %v7853_v20, %v7839_v34  ;;  %v4164_v30 = vmul.f32 %v7853_v20, %v7845_v11 }
 0x560   : > { %4203 = vst [vmem:[#allocation2 + $0x211] sm:$0xff] %v4139_v44  ;;  %4204 = vst [vmem:[#allocation2 + $0x219] sm:$0xff] %v4140_v51 }
 0x561   : > { %4205 = vst [vmem:[#allocation2 + $0x229] sm:$0xff] %v4141_v3  ;;  %4206 = vst [vmem:[#allocation2 + $0x231] sm:$0xff] %v4142_v57 }
 0x562   : > { %4207 = vst [vmem:[#allocation2 + $0x241] sm:$0xff] %v4143_v42  ;;  %4208 = vst [vmem:[#allocation2 + $0x249] sm:$0xff] %v4144_v26 }
 0x563   : > { %4209 = vst [vmem:[#allocation2 + $0x259] sm:$0xff] %v4145_v21  ;;  %4210 = vst [vmem:[#allocation2 + $0x261] sm:$0xff] %v4146_v10 }
 0x564   : > { %4211 = vst [vmem:[#allocation2 + $0x271] sm:$0xff] %v4147_v1  ;;  %4212 = vst [vmem:[#allocation2 + $0x279] sm:$0xff] %v4148_v15 }
 0x565   : > { %4213 = vst [vmem:[#allocation2 + $0x289] sm:$0xff] %v4149_v8  ;;  %4214 = vst [vmem:[#allocation2 + $0x291] sm:$0xff] %v4150_v50 }
 0x566   : > { %4215 = vst [vmem:[#allocation2 + $0x2a1] sm:$0xff] %v4151_v36  ;;  %4216 = vst [vmem:[#allocation2 + $0x2a9] sm:$0xff] %v4152_v47 }
 0x567   : > { %4217 = vst [vmem:[#allocation2 + $0x2b9] sm:$0xff] %v4153_v62  ;;  %4218 = vst [vmem:[#allocation2 + $0x2c1] sm:$0xff] %v4154_v45 }
 0x568   : > { %4219 = vst [vmem:[#allocation2 + $0x2d1] sm:$0xff] %v4155_v29  ;;  %4220 = vst [vmem:[#allocation2 + $0x2d9] sm:$0xff] %v4156_v23 }
 0x569   : > { %4221 = vst [vmem:[#allocation2 + $0x2e9] sm:$0xff] %v4157_v60  ;;  %4222 = vst [vmem:[#allocation2 + $0x2f1] sm:$0xff] %v4158_v35 }
 0x56a   : > { %4223 = vst [vmem:[#allocation2 + $0x301] sm:$0xff] %v4159_v7  ;;  %4224 = vst [vmem:[#allocation2 + $0x309] sm:$0xff] %v4160_v48 }
 0x56b   : > { %4225 = vst [vmem:[#allocation2 + $0x319] sm:$0xff] %v4161_v58  ;;  %4226 = vst [vmem:[#allocation2 + $0x321] sm:$0xff] %v4162_v24 }
 0x56c   : > { %4227 = vst [vmem:[#allocation2 + $0x331] sm:$0xff] %v4163_v56  ;;  %4228 = vst [vmem:[#allocation2 + $0x339] sm:$0xff] %v4164_v30 }
 0x56d PF: > { %p4602_p12 = scmp.ne.s32.totalorder %s5170_s16, 9 }
 0x56f   : > { %4232 = sbr.rel (%p4602_p12) target bundleno = 1676 (0x68c), region = 56 }
 0x574   : > { %v4388_v19 = vld [vmem:[%s8069_s2 + $0x78] sm:$0xff]  ;;  %v5136_v34 = vmov 0.0   ;;  %v4387_v11 = vld [vmem:[%s8069_s2 + $0x70] sm:$0xff]  ;;  %vm5137_vm0 = vmmov 0   ;;  %v4386_v20 = vld [vmem:[%s8069_s2 + $0x68] sm:$0xff]  ;;  %vm4398_vm1 = vcmask 1041409  }
 0x575   : > { %4745 = vmatprep.subr.mxu0 %v5136_v34  ;;  %4777 = vmatprep.mubr.msk.f32.mxu0 %vm5137_vm0, %v5136_v34  ;;  %v4385_v43 = vld [vmem:[%s8069_s2 + $0x60] sm:$0xff]  ;;  %v4235_v16 = vld [vmem:[#allocation2 + $0x31] sm:$0xff]  ;;  %v4237_v46 = vld [vmem:[#allocation2 + $0x49] sm:$0xff] }
 0x576   : > { %4746 = vmatpush3.msra.mxu0 %v4388_v19  ;;  %v4233_v53 = vld [vmem:[#allocation2 + $0x19] sm:$0xff]  ;;  %v4234_v4 = vld [vmem:[#allocation2 + $0x21] sm:$0xff]  ;;  %v4383_v37 = vld [vmem:[%s8069_s2 + $0x50] sm:$0xff] }
 0x577   : > { %4747 = vmatprep.subr.mxu0 %v5136_v34  ;;  %v4297_v9 = vadd.f32 %v4234_v4, %v4233_v53  ;;  %v4384_v52 = vld [vmem:[%s8069_s2 + $0x58] sm:$0xff]  ;;  %v4382_v28 = vld [vmem:[%s8069_s2 + $0x48] sm:$0xff]  ;;  %v4381_v25 = vld [vmem:[%s8069_s2 + $0x40] sm:$0xff] }
 0x578   : > { %4748 = vmatpush3.msra.mxu0 %v4387_v11  ;;  %v4236_v13 = vld [vmem:[#allocation2 + $0x39] sm:$0xff]  ;;  %v4238_v40 = vld [vmem:[#allocation2 + $0x51] sm:$0xff]  ;;  %v4239_v44 = vld [vmem:[#allocation2 + $0x61] sm:$0xff] }
 0x579   : > { %4749 = vmatprep.subr.mxu0 %v5136_v34  ;;  %v4298_v12 = vadd.f32 %v4297_v9, %v4235_v16  ;;  %v4380_v51 = vld [vmem:[%s8069_s2 + $0x38] sm:$0xff]  ;;  %v4240_v27 = vld [vmem:[#allocation2 + $0x69] sm:$0xff]  ;;  %v4267_v57 = vld [vmem:[#allocation2 + $0x1e1] sm:$0xff] }
 0x57a   : > { %4750 = vmatpush3.msra.mxu0 %v4386_v20  ;;  %v4265_v3 = vld [vmem:[#allocation2 + $0x1c9] sm:$0xff]  ;;  %v4266_v2 = vld [vmem:[#allocation2 + $0x1d1] sm:$0xff]  ;;  %v4241_v41 = vld [vmem:[#allocation2 + $0x79] sm:$0xff] }
 0x57b   : > { %4751 = vmatprep.subr.mxu0 %v5136_v34  ;;  %v4299_v5 = vadd.f32 %v4298_v12, %v4236_v13  ;;  %v4379_v42 = vld [vmem:[%s8069_s2 + $0x30] sm:$0xff]  ;;  %v4334_v26 = vadd.f32 %v4266_v2, %v4265_v3  ;;  %v4378_v22 = vld [vmem:[%s8069_s2 + $0x28] sm:$0xff]  ;;  %v4269_v1 = vld [vmem:[#allocation2 + $0x1f9] sm:$0xff] }
 0x57c   : > { %4752 = vmatpush3.msra.mxu0 %v4385_v43  ;;  %v4268_v17 = vld [vmem:[#allocation2 + $0x1e9] sm:$0xff]  ;;  %v4242_v10 = vld [vmem:[#allocation2 + $0x81] sm:$0xff]  ;;  %v4243_v33 = vld [vmem:[#allocation2 + $0x91] sm:$0xff] }
 0x57d   : > { %4753 = vmatprep.subr.mxu0 %v5136_v34  ;;  %v4300_v59 = vadd.f32 %v4299_v5, %v4237_v46  ;;  %v4335_v55 = vadd.f32 %v4334_v26, %v4267_v57  ;;  %v4377_v15 = vld [vmem:[%s8069_s2 + $0x20] sm:$0xff]  ;;  %v4376_v0 = vld [vmem:[%s8069_s2 + $0x18] sm:$0xff]  ;;  %v4375_v45 = vld [vmem:[%s8069_s2 + $0x10] sm:$0xff] }
 0x57e   : > { %4754 = vmatpush3.msra.mxu0 %v4384_v52  ;;  %v4270_v31 = vld [vmem:[#allocation2 + $0x201] sm:$0xff]  ;;  %v4244_v36 = vld [vmem:[#allocation2 + $0x99] sm:$0xff]  ;;  %v4271_v47 = vld [vmem:[#allocation2 + $0x211] sm:$0xff] }
 0x57f   : > { %4755 = vmatprep.subr.mxu0 %v5136_v34  ;;  %v4301_v54 = vadd.f32 %v4300_v59, %v4238_v40  ;;  %v4336_v8 = vadd.f32 %v4335_v55, %v4268_v17  ;;  %v4245_v29 = vld [vmem:[#allocation2 + $0xa9] sm:$0xff]  ;;  %v4272_v23 = vld [vmem:[#allocation2 + $0x219] sm:$0xff]  ;;  %v4246_v49 = vld [vmem:[#allocation2 + $0xb1] sm:$0xff] }
 0x580   : > { %4756 = vmatpush3.msra.mxu0 %v4383_v37  ;;  %v4374_v60 = vld [vmem:[%s8069_s2 + $0x8] sm:$0xff]  ;;  %v4373_v61 = vld [vmem:[%s8069_s2] sm:$0xff]  ;;  %v4274_v58 = vld [vmem:[#allocation2 + $0x231] sm:$0xff] }
 0x581   : > { %4757 = vmatprep.subr.mxu0 %v5136_v34  ;;  %v4302_v63 = vadd.f32 %v4301_v54, %v4239_v44  ;;  %v4337_v38 = vadd.f32 %v4336_v8, %v4269_v1  ;;  %v4273_v39 = vld [vmem:[#allocation2 + $0x229] sm:$0xff]  ;;  %v4247_v48 = vld [vmem:[#allocation2 + $0xc1] sm:$0xff]  ;;  %v4249_v20 = vld [vmem:[#allocation2 + $0xd9] sm:$0xff] }
 0x582   : > { %4758 = vmatpush3.msra.mxu0 %v4382_v28  ;;  %v4248_v56 = vld [vmem:[#allocation2 + $0xc9] sm:$0xff]  ;;  %v4275_v19 = vld [vmem:[#allocation2 + $0x241] sm:$0xff]  ;;  %v4277_v52 = vld [vmem:[#allocation2 + $0x259] sm:$0xff] }
 0x583   : > { %4759 = vmatprep.subr.mxu0 %v5136_v34  ;;  %v4303_v21 = vadd.f32 %v4302_v63, %v4240_v27  ;;  %v4338_v6 = vadd.f32 %v4337_v38, %v4270_v31  ;;  %v4276_v53 = vld [vmem:[#allocation2 + $0x249] sm:$0xff]  ;;  %v4250_v16 = vld [vmem:[#allocation2 + $0xe1] sm:$0xff]  ;;  %v4251_v12 = vld [vmem:[#allocation2 + $0xf1] sm:$0xff] }
 0x584   : > { %4760 = vmatpush3.msra.mxu0 %v4381_v25  ;;  %v4278_v46 = vld [vmem:[#allocation2 + $0x261] sm:$0xff]  ;;  %v4252_v28 = vld [vmem:[#allocation2 + $0xf9] sm:$0xff]  ;;  %v4253_v25 = vld [vmem:[#allocation2 + $0x109] sm:$0xff] }
 0x585   : > { %4761 = vmatprep.subr.mxu0 %v5136_v34  ;;  %v4304_v32 = vadd.f32 %v4303_v21, %v4241_v41  ;;  %v4339_v35 = vadd.f32 %v4338_v6, %v4271_v47  ;;  %v4280_v54 = vld [vmem:[#allocation2 + $0x279] sm:$0xff]  ;;  %v4254_v27 = vld [vmem:[#allocation2 + $0x111] sm:$0xff]  ;;  %v4281_v2 = vld [vmem:[#allocation2 + $0x289] sm:$0xff] }
 0x586   : > { %4762 = vmatpush3.msra.mxu0 %v4380_v51  ;;  %v4255_v63 = vld [vmem:[#allocation2 + $0x121] sm:$0xff]  ;;  %v4282_v41 = vld [vmem:[#allocation2 + $0x291] sm:$0xff]  ;;  %v4256_v17 = vld [vmem:[#allocation2 + $0x129] sm:$0xff] }
 0x587   : > { %4763 = vmatprep.subr.mxu0 %v5136_v34  ;;  %v4305_v50 = vadd.f32 %v4304_v32, %v4242_v10  ;;  %v4340_v18 = vadd.f32 %v4339_v35, %v4272_v23  ;;  %v4257_v55 = vld [vmem:[#allocation2 + $0x139] sm:$0xff]  ;;  %v4284_v32 = vld [vmem:[#allocation2 + $0x2a9] sm:$0xff]  ;;  %v4286_v38 = vld [vmem:[#allocation2 + $0x2c1] sm:$0xff] }
 0x588   : > { %4764 = vmatpush3.msra.mxu0 %v4379_v42  ;;  %v4285_v31 = vld [vmem:[#allocation2 + $0x2b9] sm:$0xff]  ;;  %v4261_v23 = vld [vmem:[#allocation2 + $0x169] sm:$0xff]  ;;  %v4262_v35 = vld [vmem:[#allocation2 + $0x171] sm:$0xff] }
 0x589   : > { %4765 = vmatprep.subr.mxu0 %v5136_v34  ;;  %v4306_v62 = vadd.f32 %v4305_v50, %v4243_v33  ;;  %v4341_v30 = vadd.f32 %v4340_v18, %v4273_v39  ;;  %v4258_v33 = vld [vmem:[#allocation2 + $0x141] sm:$0xff] }
 0x58a   : > { %4766 = vmatpush3.msra.mxu0 %v4378_v22  ;;  %v4283_v22 = vld [vmem:[#allocation2 + $0x2a1] sm:$0xff] }
 0x58b   : > { %4767 = vmatprep.subr.mxu0 %v5136_v34  ;;  %v4307_v14 = vadd.f32 %v4306_v62, %v4244_v36  ;;  %v4342_v43 = vadd.f32 %v4341_v30, %v4274_v58  ;;  %v4260_v62 = vld [vmem:[#allocation2 + $0x159] sm:$0xff]  ;;  %v4290_v58 = vld [vmem:[#allocation2 + $0x2f1] sm:$0xff] }
 0x58c   : > { %4768 = vmatpush3.msra.mxu0 %v4377_v15 }
 0x58d   : > { %4769 = vmatprep.subr.mxu0 %v5136_v34  ;;  %v4308_v7 = vadd.f32 %v4307_v14, %v4245_v29  ;;  %v4343_v9 = vadd.f32 %v4342_v43, %v4275_v19  ;;  %v4287_v29 = vld [vmem:[#allocation2 + $0x2d1] sm:$0xff]  ;;  %v4291_v19 = vld [vmem:[#allocation2 + $0x301] sm:$0xff]  ;;  %v4292_v43 = vld [vmem:[#allocation2 + $0x309] sm:$0xff] }
 0x58e   : > { %4770 = vmatpush3.msra.mxu0 %v4376_v0  ;;  %v4259_v0 = vld [vmem:[#allocation2 + $0x151] sm:$0xff] }
 0x58f   : > { %4771 = vmatprep.subr.mxu0 %v5136_v34  ;;  %v4309_v24 = vadd.f32 %v4308_v7, %v4246_v49  ;;  %v4344_v37 = vadd.f32 %v4343_v9, %v4276_v53  ;;  %v4289_v7 = vld [vmem:[#allocation2 + $0x2e9] sm:$0xff] }
 0x590   : > { %4772 = vmatpush3.msra.mxu0 %v4375_v45 }
 0x591   : > { %4773 = vmatprep.subr.mxu0 %v5136_v34  ;;  %v4310_v11 = vadd.f32 %v4309_v24, %v4247_v48  ;;  %v4345_v40 = vadd.f32 %v4344_v37, %v4277_v52  ;;  %v4263_v48 = vld [vmem:[#allocation2 + $0x181] sm:$0xff] }
 0x592   : > { %4774 = vmatpush3.msra.mxu0 %v4374_v60  ;;  %v4288_v60 = vld [vmem:[#allocation2 + $0x2d9] sm:$0xff] }
 0x593   : > { %4775 = vmatprep.subr.mxu0 %v5136_v34  ;;  %v4311_v4 = vadd.f32 %v4310_v11, %v4248_v56  ;;  %v4279_v34 = vld [vmem:[#allocation2 + $0x271] sm:$0xff]  ;;  %v4346_v44 = vadd.f32 %v4345_v40, %v4278_v46  ;;  %v4264_v56 = vld [vmem:[#allocation2 + $0x189] sm:$0xff]  ;;  %v4296_v40 = vld [vmem:[#allocation2 + $0x339] sm:$0xff] }
 0x594   : > { %4776 = vmatpush3.msra.mxu0 %v4373_v61  ;;  %v4295_v46 = vld [vmem:[#allocation2 + $0x331] sm:$0xff] }
 0x595   : > { %v4312_v13 = vadd.f32 %v4311_v4, %v4249_v20  ;;  %v4347_v3 = vadd.f32 %v4346_v44, %v4279_v34 }
 0x597   : > { %v4313_v5 = vadd.f32 %v4312_v13, %v4250_v16  ;;  %v4348_v42 = vadd.f32 %v4347_v3, %v4280_v54  ;;  %v4293_v16 = vld [vmem:[#allocation2 + $0x319] sm:$0xff]  ;;  %v4294_v13 = vld [vmem:[#allocation2 + $0x321] sm:$0xff] }
 0x599   : > { %v4314_v59 = vadd.f32 %v4313_v5, %v4251_v12  ;;  %v4349_v21 = vadd.f32 %v4348_v42, %v4281_v2 }
 0x59b   : > { %v4315_v51 = vadd.f32 %v4314_v59, %v4252_v28  ;;  %v4350_v1 = vadd.f32 %v4349_v21, %v4282_v41 }
 0x59d   : > { %v4316_v57 = vadd.f32 %v4315_v51, %v4253_v25  ;;  %v4351_v8 = vadd.f32 %v4350_v1, %v4283_v22 }
 0x59f   : > { %v4317_v26 = vadd.f32 %v4316_v57, %v4254_v27  ;;  %v4352_v36 = vadd.f32 %v4351_v8, %v4284_v32 }
 0x5a1   : > { %v4318_v10 = vadd.f32 %v4317_v26, %v4255_v63  ;;  %v4353_v45 = vadd.f32 %v4352_v36, %v4285_v31 }
 0x5a3   : > { %v4319_v15 = vadd.f32 %v4318_v10, %v4256_v17  ;;  %v4354_v14 = vadd.f32 %v4353_v45, %v4286_v38  ;;  %v4603_v17 = vld [vmem:[%s8070_s3] ss:$0 sm:$0xff] }
 0x5a5   : > { %v4320_v50 = vadd.f32 %v4319_v15, %v4257_v55  ;;  %v4355_v39 = vadd.f32 %v4354_v14, %v4287_v29 }
 0x5a7   : > { %v4321_v47 = vadd.f32 %v4320_v50, %v4258_v33  ;;  %v4356_v18 = vadd.f32 %v4355_v39, %v4288_v60 }
 0x5a9   : > { %v4322_v6 = vadd.f32 %v4321_v47, %v4259_v0  ;;  %v4357_v30 = vadd.f32 %v4356_v18, %v4289_v7 }
 0x5ab   : > { %v4323_v49 = vadd.f32 %v4322_v6, %v4260_v62  ;;  %v4358_v20 = vadd.f32 %v4357_v30, %v4290_v58 }
 0x5ad   : > { %v4324_v61 = vadd.f32 %v4323_v49, %v4261_v23  ;;  %v4359_v4 = vadd.f32 %v4358_v20, %v4291_v19 }
 0x5af   : > { %v4325_v24 = vadd.f32 %v4324_v61, %v4262_v35  ;;  %v4360_v52 = vadd.f32 %v4359_v4, %v4292_v43 }
 0x5b1   : > { %v4326_v11 = vadd.f32 %v4325_v24, %v4263_v48  ;;  %v4361_v37 = vadd.f32 %v4360_v52, %v4293_v16 }
 0x5b3   : > { %v4327_v53 = vadd.f32 %v4326_v11, %v4264_v56  ;;  %v4362_v28 = vadd.f32 %v4361_v37, %v4294_v13 }
 0x5b5   : > { %v4328_v9 = vrot.slane %v4327_v53, 4  ;;  %v4363_v34 = vadd.f32 %v4362_v28, %v4295_v46 }
 0x5b7   : > { %v4329_v12 = vadd.f32 %v4328_v9, %v4327_v53  ;;  %v4364_v25 = vadd.f32 %v4363_v34, %v4296_v40 }
 0x5b9   : > { %v4330_v5 = vrot.slane %v4329_v12, 2  ;;  %v4365_v44 = vrot.slane %v4364_v25, 4 }
 0x5bb   : > { %v4331_v59 = vadd.f32 %v4330_v5, %v4329_v12  ;;  %v4366_v51 = vadd.f32 %v4365_v44, %v4364_v25 }
 0x5bd   : > { %v4332_v54 = vrot.slane %v4331_v59, 1  ;;  %v4367_v27 = vrot.slane %v4366_v51, 2 }
 0x5bf   : > { %v4333_v3 = vadd.f32 %v4332_v54, %v4331_v59  ;;  %v4368_v2 = vadd.f32 %v4367_v27, %v4366_v51 }
 0x5c1   : > { %v4369_v57 = vrot.slane %v4368_v2, 1  ;;  %v4371_v42 = vmul.f32 0.00390625, %v4333_v3 }
 0x5c3   : > { %v4370_v63 = vadd.f32 %v4369_v57, %v4368_v2 }
 0x5c5   : > { %v4372_v41 = vmul.f32 0.00390625, %v4370_v63 }
 0x5c7   : > { %v4399_v26 = vsel %vm4398_vm1, %v4372_v41, %v4371_v42 }
 0x5c8   : > { %4778 = vmatmul.mubr.f32.vlgmr.msra.gmra.mxu0 %v4399_v26 }
 0x688   : > { %v4467_v21 = vpop.f32.mrf.mxu0 }
 0x689   : > { %v4468_v22 = vadd.f32 %v4603_v17, %v4467_v21 }
 0x68a   : > { %v4779_v10 = vpop.f32.mrf.mxu0 }
 0x68b   : > { %4471 = vst [vmem:[#allocation4] sm:$0x3] %v4468_v22 }
 0x68c PF: > { %p4817_p13 = scmp.eq.s32.totalorder %s5170_s16, 9  ;;  %s5138_s25 = smov [#allocation4]  }
 0x68d   : > { %s4479_s26 = sshll.u32 %s5138_s25, 4  ;;  %s4480_s26 = int_to_ptr.vmem [resolvable:$true] %s4479_s26 }
 0x68e   : > { %s5098_s27 = scalar_lea.vmem %s4480_s26, 32  ;;  %p5105_p3 = scmp.lt.s32.totalorder %s4480_s26, %s4480_s26 }
 0x68f   : > { %p5099_p0 = scmp.ne.s32.totalorder %s4480_s26, %s5098_s27  ;;  %p5106_p4 = scmp.lt.s32.totalorder %s5098_s27, %s5098_s27 }
 0x691   : > { %p5100_p1 = pnand %p5099_p0, %p4817_p13  ;;  %p5107_p5 = por %p5106_p4, %p5105_p3 }
 0x693   : > { %p5101_p2 = pneg %p5100_p1 }
 0x695   : > { %p5108_p6 = pnand %p5107_p5, %p5101_p2 }
 0x697   : > { %5111 = shalt.err (!%p5108_p6)
}
 0x698   : > { %4814 = dma.vmem_to_hbm [thread:$0]  (%p4817_p13), %s4480_s26, 32, %s8071_s4, [#allocation5]  }
 0x699   : > { %5127 = dma.done.wait (%p4817_p13), [#allocation5], 32  }
 0x69a   : > { %5129 = vsyncadd (%p4817_p13), [#allocation5], 4294967264 }
 0x69b PF: > { %s15_s15 = sadd.s32 1, %s5132_s15  }
 0x69c   : > { %p12_p7 = scmp.ge.s32.totalorder %s15_s15, 12  }
 0x69e   :  { %14 = sbr.rel (!%p12_p7) target bundleno = 1 (0x1), region = 85 }
 0x6a3   :  { %4492 = vsyncpa [#allocation5], 1 }
 0x6a4   :  { %4494 = vsyncpa [#allocation5 + $0x1], 1 }

</bundles_post_ra>
